<compile_context>
chip_gen: v6e
topology: v6e:2x2x1
jax: 0.10.0
libtpu: 0.0.40
codegen_flags: <defaults>
</compile_context>

<pallas_src>
import functools

import jax
import jax.numpy as jnp
import numpy as np
from jax.experimental import pallas as pl
from jax.experimental.pallas import tpu as pltpu

EPS = 1e-5
NEG_SLOPE = 0.01

# Scoped-VMEM request: comfortably above what our tiles need, and safe on every
# generation (v5e default scoped 16 MiB / 128 physical, v6e 32/128, v7x 32/64).
VMEM_LIMIT = 32 * 1024 * 1024
# Lane-tile cap: keeps double-buffered window + y tiles far under the v7x
# 64 MiB-per-TC budget even for wide Cin (window bytes ~= 2*Cin_p*(TM+2*OFF)*2B).
TM_CAP = 4096


def _round_up(x, m):
    return ((x + m - 1) // m) * m


def _pick_tm(D, H, W, cap=TM_CAP):
    """Spatial (lane) tile: multiple of H*W, divides D*H*W, 128-aligned if < DHW."""
    HW = H * W
    DHW = D * HW
    if DHW <= cap:
        return DHW
    for t in range(D, 0, -1):
        if D % t:
            continue
        cand = t * HW
        if cand <= cap and cand % 128 == 0:
            return cand
    return DHW  # fallback: whole sample per tile


def _direct_conv_kernel(xw_ref, w_ref, b_ref, coords_ref, y_ref, st_ref, *,
                        tm, off, h_dim, w_dim, cout_p):
    """One (sample, spatial tile): 3x3x3 conv as 27 shifted MXU dots + BN stats.

    xw_ref:     (1, 1, Cin_p, TM + 2*OFF) bf16  halo'd flat-spatial window
    w_ref:      (27, Cout_p, Cin_p)       bf16  one (Cout_p, Cin_p) block per tap
    b_ref:      (Cout_p, 1)               f32   conv bias
    coords_ref: (2, TM)                   i32   [w-coord; h-coord] per lane
    y_ref:      (1, Cout_p, TM)           bf16  conv + bias tile
    st_ref:     (1, 1, Cout_p, 2)         f32   [sum, sumsq] of PRE-bias accumulator
    """
    hw = h_dim * w_dim
    wc = coords_ref[0:1, :]            # (1, TM)
    hc = coords_ref[1:2, :]
    w_lo = wc >= 1                     # valid lanes for kw-tap = -1
    w_hi = wc <= (w_dim - 2)           # valid lanes for kw-tap = +1
    h_lo = hc >= 1
    h_hi = hc <= (h_dim - 2)

    acc = jnp.zeros((cout_p, tm), jnp.float32)
    for kd in range(3):
        for kh in range(3):
            for kw in range(3):
                k = (kd * 3 + kh) * 3 + kw
                delta = (kd - 1) * hw + (kh - 1) * w_dim + (kw - 1)
                # Static lane-offset load of the shifted input (D shifts resolve
                # into the zero halo; only H/W wraps need masking).
                patch = xw_ref[0, 0, :, pl.ds(off + delta, tm)]   # (Cin_p, TM)
                valid = None
                if kh == 0:
                    valid = h_lo
                elif kh == 2:
                    valid = h_hi
                if kw == 0:
                    valid = w_lo if valid is None else (valid & w_lo)
                elif kw == 2:
                    valid = w_hi if valid is None else (valid & w_hi)
                if valid is not None:
                    patch = jnp.where(valid, patch, jnp.zeros_like(patch))
                acc = acc + jnp.dot(w_ref[k], patch,
                                    preferred_element_type=jnp.float32)

    y_ref[0] = (acc + b_ref[...]).astype(y_ref.dtype)        # bf16 activation
    # Bias-shifted streamed BN partial stats (f32, from the f32 accumulator).
    st_ref[0, 0, :, 0:1] = jnp.sum(acc, axis=1, keepdims=True)
    st_ref[0, 0, :, 1:2] = jnp.sum(acc * acc, axis=1, keepdims=True)


def _bn_lrelu_kernel(y_ref, scale_ref, shift_ref, o_ref):
    # Folded BN: z = y*scale + shift ; leaky relu = max(z, 0.01*z).  f32 math
    # (bf16 VPU not native on v5e); purely mem-bound elementwise pass.
    z = y_ref[...].astype(jnp.float32) * scale_ref[...] + shift_ref[...]
    o_ref[...] = jnp.maximum(z, NEG_SLOPE * z)


def conv3x3_forward(x, w, b, gamma, beta):
    """x: (N, Cin, D, H, W) f32; w: (Cout, Cin, 3, 3, 3); b/gamma/beta: (Cout,)."""
    N, Cin, D, H, W = x.shape
    Cout = w.shape[0]
    HW = H * W
    DHW = D * HW

    Cp = _round_up(Cout, 8)             # == Cout when Cout % 8 == 0 (test case)
    Cin_p = _round_up(Cin, 8)
    TM = _pick_tm(D, H, W)              # lane tile over flattened (d,h,w)
    tps = DHW // TM                     # spatial tiles per sample
    OFF = _round_up(HW + W + 1, 128)    # halo >= largest 3x3x3 tap offset
    TMW = TM + 2 * OFF

    # --- glue (all ~1x input-sized, no 27x im2col): bf16 halo'd flat windows ---
    xf = jnp.pad(x.reshape(N, Cin, DHW).astype(jnp.bfloat16),
                 ((0, 0), (0, Cin_p - Cin), (OFF, OFF)))      # (N, Cin_p, DHW+2*OFF)
    if tps == 1:
        xw = xf[:, None]                                       # (N, 1, Cin_p, TMW)
    else:
        xw = jnp.stack([xf[:, :, j * TM: j * TM + TMW] for j in range(tps)],
                       axis=1)                                 # (N, tps, Cin_p, TMW)

    # Weights: one (Cout_p, Cin_p) block per tap, tap index k = kd*9 + kh*3 + kw.
    w_t = jnp.pad(w.transpose(2, 3, 4, 0, 1).reshape(27, Cout, Cin),
                  ((0, 0), (0, Cp - Cout), (0, Cin_p - Cin))).astype(jnp.bfloat16)
    b2 = jnp.pad(b, (0, Cp - Cout)).reshape(Cp, 1).astype(jnp.float32)
    g1 = jnp.pad(gamma, (0, Cp - Cout)).astype(jnp.float32)
    be1 = jnp.pad(beta, (0, Cp - Cout)).astype(jnp.float32)

    # Per-lane (w, h) coordinates; tile-invariant since TM % (H*W) == 0.
    lane = np.arange(TM)
    coords = jnp.asarray(np.stack([lane % W, (lane // W) % H]).astype(np.int32))

    # --- pass 1: direct conv + bias + streamed BN partial stats ---
    kern1 = functools.partial(_direct_conv_kernel, tm=TM, off=OFF,
                              h_dim=H, w_dim=W, cout_p=Cp)
    y, stats = pl.pallas_call(
        kern1,
        out_shape=(jax.ShapeDtypeStruct((N, Cp, DHW), jnp.bfloat16),
                   jax.ShapeDtypeStruct((N, tps, Cp, 2), jnp.float32)),
        grid=(N, tps),
        in_specs=[pl.BlockSpec((1, 1, Cin_p, TMW), lambda n, j: (n, j, 0, 0)),
                  pl.BlockSpec((27, Cp, Cin_p), lambda n, j: (0, 0, 0)),
                  pl.BlockSpec((Cp, 1), lambda n, j: (0, 0)),
                  pl.BlockSpec((2, TM), lambda n, j: (0, 0))],
        out_specs=(pl.BlockSpec((1, Cp, TM), lambda n, j: (n, 0, j)),
                   pl.BlockSpec((1, 1, Cp, 2), lambda n, j: (n, j, 0, 0))),
        compiler_params=pltpu.CompilerParams(
            dimension_semantics=("parallel", "parallel"),
            vmem_limit_bytes=VMEM_LIMIT),
    )(xw, w_t, b2, coords)

    # --- tiny per-channel reduction + BN fold (bias-shifted sums, f32) ---
    count = float(N * DHW)
    s = jnp.sum(stats[..., 0], axis=(0, 1)) / count            # E[acc] (pre-bias)
    q = jnp.sum(stats[..., 1], axis=(0, 1)) / count            # E[acc^2]
    var = jnp.maximum(q - s * s, 0.0)                          # == Var[y] (biased, BN train)
    mean = s + b2[:, 0]                                        # E[y]
    scale = g1 * jax.lax.rsqrt(var + EPS)
    shift = be1 - mean * scale
    scale2 = scale.reshape(Cp, 1)
    shift2 = shift.reshape(Cp, 1)

    # --- pass 2: folded BN + leaky relu on large lane-dense panels ---
    TM2 = DHW if Cp * DHW * (4 + 2) * 2 <= 8 * 1024 * 1024 else TM
    tps2 = DHW // TM2
    out = pl.pallas_call(
        _bn_lrelu_kernel,
        out_shape=jax.ShapeDtypeStruct((N, Cp, DHW), jnp.float32),
        grid=(N, tps2),
        in_specs=[pl.BlockSpec((1, Cp, TM2), lambda n, j: (n, 0, j)),
                  pl.BlockSpec((Cp, 1), lambda n, j: (0, 0)),
                  pl.BlockSpec((Cp, 1), lambda n, j: (0, 0))],
        out_specs=pl.BlockSpec((1, Cp, TM2), lambda n, j: (n, 0, j)),
        compiler_params=pltpu.CompilerParams(
            dimension_semantics=("parallel", "parallel"),
            vmem_limit_bytes=VMEM_LIMIT),
    )(y, scale2, shift2)

    if Cp != Cout:                       # no-op when Cout is a multiple of 8
        out = out[:, :Cout]
    return out.reshape(N, Cout, D, H, W)


def reference_forward(x, w, b, gamma, beta):
    y = jax.lax.conv_general_dilated(
        x, w, window_strides=(1, 1, 1),
        padding=((1, 1), (1, 1), (1, 1)),
        dimension_numbers=("NCDHW", "OIDHW", "NCDHW"),
        precision=jax.lax.Precision.HIGHEST,
    ) + b[None, :, None, None, None]
    mean = y.mean(axis=(0, 2, 3, 4), keepdims=True)
    var = ((y - mean) ** 2).mean(axis=(0, 2, 3, 4), keepdims=True)
    y_hat = (y - mean) / jnp.sqrt(var + EPS)
    z = gamma[None, :, None, None, None] * y_hat + beta[None, :, None, None, None]
    return jnp.where(z >= 0, z, NEG_SLOPE * z)


if __name__ == "__main__":
    N, Cin, Cout, D, H, W = 2, 4, 8, 8, 8, 8

    key = jax.random.PRNGKey(0)
    kx, kwt, kb = jax.random.split(key, 3)

    x = jax.random.normal(kx, (N, Cin, D, H, W), dtype=jnp.float32)

    # Deterministic PyTorch-style init (uniform +/- 1/sqrt(fan_in)); BN: gamma=1, beta=0.
    fan_in = Cin * 3 * 3 * 3
    bound = 1.0 / np.sqrt(fan_in)
    w = jax.random.uniform(kwt, (Cout, Cin, 3, 3, 3), jnp.float32, -bound, bound)
    b = jax.random.uniform(kb, (Cout,), jnp.float32, -bound, bound)
    gamma = jnp.ones((Cout,), jnp.float32)
    beta = jnp.zeros((Cout,), jnp.float32)

    fwd = jax.jit(conv3x3_forward)
    out = jax.block_until_ready(fwd(x, w, b, gamma, beta))

    ref = jax.block_until_ready(reference_forward(x, w, b, gamma, beta))
    # bf16 streamed operands + bf16-stored intermediate activation (f32 MXU/BN math)
    # vs. a HIGHEST-precision f32 reference.
    np.testing.assert_allclose(np.asarray(out), np.asarray(ref), rtol=3e-2, atol=3e-2)

    print("KERNEL_OK")
</pallas_src>

<mosaic_0001>
module attributes {stable_mosaic.version = 11 : i64} {
  func.func @_direct_conv_kernel(%arg0: i32, %arg1: i32, %arg2: memref<1x1x8x768xbf16, #tpu.memory_space<vmem>>, %arg3: memref<27x8x8xbf16, #tpu.memory_space<vmem>>, %arg4: memref<8x1xf32, #tpu.memory_space<vmem>>, %arg5: memref<2x512xi32, #tpu.memory_space<vmem>>, %arg6: memref<1x8x512xbf16, #tpu.memory_space<vmem>>, %arg7: memref<1x1x8x2xf32, #tpu.memory_space<vmem>>) attributes {dimension_semantics = [#tpu.dimension_semantics<parallel>, #tpu.dimension_semantics<parallel>], iteration_bounds = array<i64: 2, 1>, scalar_prefetch = 0 : i64, scratch_operands = 0 : i64, tpu.core_type = #tpu.core_type<tc>, window_params = [{transform_indices = @transform_0, window_bounds = array<i64: 1, 1, 8, 768>}, {pipeline_mode = #tpu.pipeline_mode<synchronous>, transform_indices = @transform_1, window_bounds = array<i64: 27, 8, 8>}, {pipeline_mode = #tpu.pipeline_mode<synchronous>, transform_indices = @transform_2, window_bounds = array<i64: 8, 1>}, {pipeline_mode = #tpu.pipeline_mode<synchronous>, transform_indices = @transform_3, window_bounds = array<i64: 2, 512>}, {transform_indices = @transform_4, window_bounds = array<i64: 1, 8, 512>}, {transform_indices = @transform_5, window_bounds = array<i64: 1, 1, 8, 2>}]} {
    %c0 = arith.constant 0 : index
    %c0_0 = arith.constant 0 : index
    %0 = vector.load %arg5[%c0, %c0_0] : memref<2x512xi32, #tpu.memory_space<vmem>>, vector<1x512xi32>
    %c1 = arith.constant 1 : index
    %c0_1 = arith.constant 0 : index
    %1 = vector.load %arg5[%c1, %c0_1] : memref<2x512xi32, #tpu.memory_space<vmem>>, vector<1x512xi32>
    %c1_i32 = arith.constant 1 : i32
    %2 = vector.broadcast %c1_i32 : i32 to vector<1x512xi32>
    %3 = arith.cmpi sge, %0, %2 : vector<1x512xi32>
    %c6_i32 = arith.constant 6 : i32
    %4 = vector.broadcast %c6_i32 : i32 to vector<1x512xi32>
    %5 = arith.cmpi sle, %0, %4 : vector<1x512xi32>
    %c1_i32_2 = arith.constant 1 : i32
    %6 = vector.broadcast %c1_i32_2 : i32 to vector<1x512xi32>
    %7 = arith.cmpi sge, %1, %6 : vector<1x512xi32>
    %c6_i32_3 = arith.constant 6 : i32
    %8 = vector.broadcast %c6_i32_3 : i32 to vector<1x512xi32>
    %9 = arith.cmpi sle, %1, %8 : vector<1x512xi32>
    %cst = arith.constant 0.000000e+00 : f32
    %10 = vector.broadcast %cst : f32 to vector<8x512xf32>
    %c0_4 = arith.constant 0 : index
    %c0_5 = arith.constant 0 : index
    %c0_6 = arith.constant 0 : index
    %c55 = arith.constant 55 : index
    %11 = vector.load %arg2[%c0_4, %c0_5, %c0_6, %c55] : memref<1x1x8x768xbf16, #tpu.memory_space<vmem>>, vector<1x1x8x512xbf16>
    %12 = vector.shape_cast %11 : vector<1x1x8x512xbf16> to vector<8x512xbf16>
    %13 = arith.andi %7, %3 : vector<1x512xi1>
    %cst_7 = arith.constant 0.000000e+00 : bf16
    %14 = vector.broadcast %cst_7 : bf16 to vector<8x512xbf16>
    %15 = vector.shape_cast %13 : vector<1x512xi1> to vector<1x512xi1>
    %16 = vector.broadcast %15 : vector<1x512xi1> to vector<8x512xi1>
    %17 = arith.select %16, %12, %14 : vector<8x512xi1>, vector<8x512xbf16>
    %c0_8 = arith.constant 0 : index
    %c0_9 = arith.constant 0 : index
    %c0_10 = arith.constant 0 : index
    %18 = vector.load %arg3[%c0_8, %c0_9, %c0_10] : memref<27x8x8xbf16, #tpu.memory_space<vmem>>, vector<1x8x8xbf16>
    %19 = vector.shape_cast %18 : vector<1x8x8xbf16> to vector<8x8xbf16>
    %cst_11 = arith.constant dense<0.000000e+00> : vector<8x512xf32>
    %20 = tpu.matmul %19, %17, %cst_11 {dimension_numbers = #tpu.dot_dimension_numbers<[1], [0], [0], [1], [0, 0, 1, 1], [], []>} : vector<8x8xbf16>, vector<8x512xbf16>, vector<8x512xf32> -> vector<8x512xf32>
    %21 = arith.addf %10, %20 : vector<8x512xf32>
    %c0_12 = arith.constant 0 : index
    %c0_13 = arith.constant 0 : index
    %c0_14 = arith.constant 0 : index
    %c56 = arith.constant 56 : index
    %22 = vector.load %arg2[%c0_12, %c0_13, %c0_14, %c56] : memref<1x1x8x768xbf16, #tpu.memory_space<vmem>>, vector<1x1x8x512xbf16>
    %23 = vector.shape_cast %22 : vector<1x1x8x512xbf16> to vector<8x512xbf16>
    %cst_15 = arith.constant 0.000000e+00 : bf16
    %24 = vector.broadcast %cst_15 : bf16 to vector<8x512xbf16>
    %25 = vector.shape_cast %7 : vector<1x512xi1> to vector<1x512xi1>
    %26 = vector.broadcast %25 : vector<1x512xi1> to vector<8x512xi1>
    %27 = arith.select %26, %23, %24 : vector<8x512xi1>, vector<8x512xbf16>
    %c1_16 = arith.constant 1 : index
    %c0_17 = arith.constant 0 : index
    %c0_18 = arith.constant 0 : index
    %28 = vector.load %arg3[%c1_16, %c0_17, %c0_18] : memref<27x8x8xbf16, #tpu.memory_space<vmem>>, vector<1x8x8xbf16>
    %29 = vector.shape_cast %28 : vector<1x8x8xbf16> to vector<8x8xbf16>
    %cst_19 = arith.constant dense<0.000000e+00> : vector<8x512xf32>
    %30 = tpu.matmul %29, %27, %cst_19 {dimension_numbers = #tpu.dot_dimension_numbers<[1], [0], [0], [1], [0, 0, 1, 1], [], []>} : vector<8x8xbf16>, vector<8x512xbf16>, vector<8x512xf32> -> vector<8x512xf32>
    %31 = arith.addf %21, %30 : vector<8x512xf32>
    %c0_20 = arith.constant 0 : index
    %c0_21 = arith.constant 0 : index
    %c0_22 = arith.constant 0 : index
    %c57 = arith.constant 57 : index
    %32 = vector.load %arg2[%c0_20, %c0_21, %c0_22, %c57] : memref<1x1x8x768xbf16, #tpu.memory_space<vmem>>, vector<1x1x8x512xbf16>
    %33 = vector.shape_cast %32 : vector<1x1x8x512xbf16> to vector<8x512xbf16>
    %34 = arith.andi %7, %5 : vector<1x512xi1>
    %cst_23 = arith.constant 0.000000e+00 : bf16
    %35 = vector.broadcast %cst_23 : bf16 to vector<8x512xbf16>
    %36 = vector.shape_cast %34 : vector<1x512xi1> to vector<1x512xi1>
    %37 = vector.broadcast %36 : vector<1x512xi1> to vector<8x512xi1>
    %38 = arith.select %37, %33, %35 : vector<8x512xi1>, vector<8x512xbf16>
    %c2 = arith.constant 2 : index
    %c0_24 = arith.constant 0 : index
    %c0_25 = arith.constant 0 : index
    %39 = vector.load %arg3[%c2, %c0_24, %c0_25] : memref<27x8x8xbf16, #tpu.memory_space<vmem>>, vector<1x8x8xbf16>
    %40 = vector.shape_cast %39 : vector<1x8x8xbf16> to vector<8x8xbf16>
    %cst_26 = arith.constant dense<0.000000e+00> : vector<8x512xf32>
    %41 = tpu.matmul %40, %38, %cst_26 {dimension_numbers = #tpu.dot_dimension_numbers<[1], [0], [0], [1], [0, 0, 1, 1], [], []>} : vector<8x8xbf16>, vector<8x512xbf16>, vector<8x512xf32> -> vector<8x512xf32>
    %42 = arith.addf %31, %41 : vector<8x512xf32>
    %c0_27 = arith.constant 0 : index
    %c0_28 = arith.constant 0 : index
    %c0_29 = arith.constant 0 : index
    %c63 = arith.constant 63 : index
    %43 = vector.load %arg2[%c0_27, %c0_28, %c0_29, %c63] : memref<1x1x8x768xbf16, #tpu.memory_space<vmem>>, vector<1x1x8x512xbf16>
    %44 = vector.shape_cast %43 : vector<1x1x8x512xbf16> to vector<8x512xbf16>
    %cst_30 = arith.constant 0.000000e+00 : bf16
    %45 = vector.broadcast %cst_30 : bf16 to vector<8x512xbf16>
    %46 = vector.shape_cast %3 : vector<1x512xi1> to vector<1x512xi1>
    %47 = vector.broadcast %46 : vector<1x512xi1> to vector<8x512xi1>
    %48 = arith.select %47, %44, %45 : vector<8x512xi1>, vector<8x512xbf16>
    %c3 = arith.constant 3 : index
    %c0_31 = arith.constant 0 : index
    %c0_32 = arith.constant 0 : index
    %49 = vector.load %arg3[%c3, %c0_31, %c0_32] : memref<27x8x8xbf16, #tpu.memory_space<vmem>>, vector<1x8x8xbf16>
    %50 = vector.shape_cast %49 : vector<1x8x8xbf16> to vector<8x8xbf16>
    %cst_33 = arith.constant dense<0.000000e+00> : vector<8x512xf32>
    %51 = tpu.matmul %50, %48, %cst_33 {dimension_numbers = #tpu.dot_dimension_numbers<[1], [0], [0], [1], [0, 0, 1, 1], [], []>} : vector<8x8xbf16>, vector<8x512xbf16>, vector<8x512xf32> -> vector<8x512xf32>
    %52 = arith.addf %42, %51 : vector<8x512xf32>
    %c0_34 = arith.constant 0 : index
    %c0_35 = arith.constant 0 : index
    %c0_36 = arith.constant 0 : index
    %c64 = arith.constant 64 : index
    %53 = vector.load %arg2[%c0_34, %c0_35, %c0_36, %c64] : memref<1x1x8x768xbf16, #tpu.memory_space<vmem>>, vector<1x1x8x512xbf16>
    %54 = vector.shape_cast %53 : vector<1x1x8x512xbf16> to vector<8x512xbf16>
    %c4 = arith.constant 4 : index
    %c0_37 = arith.constant 0 : index
    %c0_38 = arith.constant 0 : index
    %55 = vector.load %arg3[%c4, %c0_37, %c0_38] : memref<27x8x8xbf16, #tpu.memory_space<vmem>>, vector<1x8x8xbf16>
    %56 = vector.shape_cast %55 : vector<1x8x8xbf16> to vector<8x8xbf16>
    %cst_39 = arith.constant dense<0.000000e+00> : vector<8x512xf32>
    %57 = tpu.matmul %56, %54, %cst_39 {dimension_numbers = #tpu.dot_dimension_numbers<[1], [0], [0], [1], [0, 0, 1, 1], [], []>} : vector<8x8xbf16>, vector<8x512xbf16>, vector<8x512xf32> -> vector<8x512xf32>
    %58 = arith.addf %52, %57 : vector<8x512xf32>
    %c0_40 = arith.constant 0 : index
    %c0_41 = arith.constant 0 : index
    %c0_42 = arith.constant 0 : index
    %c65 = arith.constant 65 : index
    %59 = vector.load %arg2[%c0_40, %c0_41, %c0_42, %c65] : memref<1x1x8x768xbf16, #tpu.memory_space<vmem>>, vector<1x1x8x512xbf16>
    %60 = vector.shape_cast %59 : vector<1x1x8x512xbf16> to vector<8x512xbf16>
    %cst_43 = arith.constant 0.000000e+00 : bf16
    %61 = vector.broadcast %cst_43 : bf16 to vector<8x512xbf16>
    %62 = vector.shape_cast %5 : vector<1x512xi1> to vector<1x512xi1>
    %63 = vector.broadcast %62 : vector<1x512xi1> to vector<8x512xi1>
    %64 = arith.select %63, %60, %61 : vector<8x512xi1>, vector<8x512xbf16>
    %c5 = arith.constant 5 : index
    %c0_44 = arith.constant 0 : index
    %c0_45 = arith.constant 0 : index
    %65 = vector.load %arg3[%c5, %c0_44, %c0_45] : memref<27x8x8xbf16, #tpu.memory_space<vmem>>, vector<1x8x8xbf16>
    %66 = vector.shape_cast %65 : vector<1x8x8xbf16> to vector<8x8xbf16>
    %cst_46 = arith.constant dense<0.000000e+00> : vector<8x512xf32>
    %67 = tpu.matmul %66, %64, %cst_46 {dimension_numbers = #tpu.dot_dimension_numbers<[1], [0], [0], [1], [0, 0, 1, 1], [], []>} : vector<8x8xbf16>, vector<8x512xbf16>, vector<8x512xf32> -> vector<8x512xf32>
    %68 = arith.addf %58, %67 : vector<8x512xf32>
    %c0_47 = arith.constant 0 : index
    %c0_48 = arith.constant 0 : index
    %c0_49 = arith.constant 0 : index
    %c71 = arith.constant 71 : index
    %69 = vector.load %arg2[%c0_47, %c0_48, %c0_49, %c71] : memref<1x1x8x768xbf16, #tpu.memory_space<vmem>>, vector<1x1x8x512xbf16>
    %70 = vector.shape_cast %69 : vector<1x1x8x512xbf16> to vector<8x512xbf16>
    %71 = arith.andi %9, %3 : vector<1x512xi1>
    %cst_50 = arith.constant 0.000000e+00 : bf16
    %72 = vector.broadcast %cst_50 : bf16 to vector<8x512xbf16>
    %73 = vector.shape_cast %71 : vector<1x512xi1> to vector<1x512xi1>
    %74 = vector.broadcast %73 : vector<1x512xi1> to vector<8x512xi1>
    %75 = arith.select %74, %70, %72 : vector<8x512xi1>, vector<8x512xbf16>
    %c6 = arith.constant 6 : index
    %c0_51 = arith.constant 0 : index
    %c0_52 = arith.constant 0 : index
    %76 = vector.load %arg3[%c6, %c0_51, %c0_52] : memref<27x8x8xbf16, #tpu.memory_space<vmem>>, vector<1x8x8xbf16>
    %77 = vector.shape_cast %76 : vector<1x8x8xbf16> to vector<8x8xbf16>
    %cst_53 = arith.constant dense<0.000000e+00> : vector<8x512xf32>
    %78 = tpu.matmul %77, %75, %cst_53 {dimension_numbers = #tpu.dot_dimension_numbers<[1], [0], [0], [1], [0, 0, 1, 1], [], []>} : vector<8x8xbf16>, vector<8x512xbf16>, vector<8x512xf32> -> vector<8x512xf32>
    %79 = arith.addf %68, %78 : vector<8x512xf32>
    %c0_54 = arith.constant 0 : index
    %c0_55 = arith.constant 0 : index
    %c0_56 = arith.constant 0 : index
    %c72 = arith.constant 72 : index
    %80 = vector.load %arg2[%c0_54, %c0_55, %c0_56, %c72] : memref<1x1x8x768xbf16, #tpu.memory_space<vmem>>, vector<1x1x8x512xbf16>
    %81 = vector.shape_cast %80 : vector<1x1x8x512xbf16> to vector<8x512xbf16>
    %cst_57 = arith.constant 0.000000e+00 : bf16
    %82 = vector.broadcast %cst_57 : bf16 to vector<8x512xbf16>
    %83 = vector.shape_cast %9 : vector<1x512xi1> to vector<1x512xi1>
    %84 = vector.broadcast %83 : vector<1x512xi1> to vector<8x512xi1>
    %85 = arith.select %84, %81, %82 : vector<8x512xi1>, vector<8x512xbf16>
    %c7 = arith.constant 7 : index
    %c0_58 = arith.constant 0 : index
    %c0_59 = arith.constant 0 : index
    %86 = vector.load %arg3[%c7, %c0_58, %c0_59] : memref<27x8x8xbf16, #tpu.memory_space<vmem>>, vector<1x8x8xbf16>
    %87 = vector.shape_cast %86 : vector<1x8x8xbf16> to vector<8x8xbf16>
    %cst_60 = arith.constant dense<0.000000e+00> : vector<8x512xf32>
    %88 = tpu.matmul %87, %85, %cst_60 {dimension_numbers = #tpu.dot_dimension_numbers<[1], [0], [0], [1], [0, 0, 1, 1], [], []>} : vector<8x8xbf16>, vector<8x512xbf16>, vector<8x512xf32> -> vector<8x512xf32>
    %89 = arith.addf %79, %88 : vector<8x512xf32>
    %c0_61 = arith.constant 0 : index
    %c0_62 = arith.constant 0 : index
    %c0_63 = arith.constant 0 : index
    %c73 = arith.constant 73 : index
    %90 = vector.load %arg2[%c0_61, %c0_62, %c0_63, %c73] : memref<1x1x8x768xbf16, #tpu.memory_space<vmem>>, vector<1x1x8x512xbf16>
    %91 = vector.shape_cast %90 : vector<1x1x8x512xbf16> to vector<8x512xbf16>
    %92 = arith.andi %9, %5 : vector<1x512xi1>
    %cst_64 = arith.constant 0.000000e+00 : bf16
    %93 = vector.broadcast %cst_64 : bf16 to vector<8x512xbf16>
    %94 = vector.shape_cast %92 : vector<1x512xi1> to vector<1x512xi1>
    %95 = vector.broadcast %94 : vector<1x512xi1> to vector<8x512xi1>
    %96 = arith.select %95, %91, %93 : vector<8x512xi1>, vector<8x512xbf16>
    %c8 = arith.constant 8 : index
    %c0_65 = arith.constant 0 : index
    %c0_66 = arith.constant 0 : index
    %97 = vector.load %arg3[%c8, %c0_65, %c0_66] : memref<27x8x8xbf16, #tpu.memory_space<vmem>>, vector<1x8x8xbf16>
    %98 = vector.shape_cast %97 : vector<1x8x8xbf16> to vector<8x8xbf16>
    %cst_67 = arith.constant dense<0.000000e+00> : vector<8x512xf32>
    %99 = tpu.matmul %98, %96, %cst_67 {dimension_numbers = #tpu.dot_dimension_numbers<[1], [0], [0], [1], [0, 0, 1, 1], [], []>} : vector<8x8xbf16>, vector<8x512xbf16>, vector<8x512xf32> -> vector<8x512xf32>
    %100 = arith.addf %89, %99 : vector<8x512xf32>
    %c0_68 = arith.constant 0 : index
    %c0_69 = arith.constant 0 : index
    %c0_70 = arith.constant 0 : index
    %c119 = arith.constant 119 : index
    %101 = vector.load %arg2[%c0_68, %c0_69, %c0_70, %c119] : memref<1x1x8x768xbf16, #tpu.memory_space<vmem>>, vector<1x1x8x512xbf16>
    %102 = vector.shape_cast %101 : vector<1x1x8x512xbf16> to vector<8x512xbf16>
    %103 = arith.andi %7, %3 : vector<1x512xi1>
    %cst_71 = arith.constant 0.000000e+00 : bf16
    %104 = vector.broadcast %cst_71 : bf16 to vector<8x512xbf16>
    %105 = vector.shape_cast %103 : vector<1x512xi1> to vector<1x512xi1>
    %106 = vector.broadcast %105 : vector<1x512xi1> to vector<8x512xi1>
    %107 = arith.select %106, %102, %104 : vector<8x512xi1>, vector<8x512xbf16>
    %c9 = arith.constant 9 : index
    %c0_72 = arith.constant 0 : index
    %c0_73 = arith.constant 0 : index
    %108 = vector.load %arg3[%c9, %c0_72, %c0_73] : memref<27x8x8xbf16, #tpu.memory_space<vmem>>, vector<1x8x8xbf16>
    %109 = vector.shape_cast %108 : vector<1x8x8xbf16> to vector<8x8xbf16>
    %cst_74 = arith.constant dense<0.000000e+00> : vector<8x512xf32>
    %110 = tpu.matmul %109, %107, %cst_74 {dimension_numbers = #tpu.dot_dimension_numbers<[1], [0], [0], [1], [0, 0, 1, 1], [], []>} : vector<8x8xbf16>, vector<8x512xbf16>, vector<8x512xf32> -> vector<8x512xf32>
    %111 = arith.addf %100, %110 : vector<8x512xf32>
    %c0_75 = arith.constant 0 : index
    %c0_76 = arith.constant 0 : index
    %c0_77 = arith.constant 0 : index
    %c120 = arith.constant 120 : index
    %112 = vector.load %arg2[%c0_75, %c0_76, %c0_77, %c120] : memref<1x1x8x768xbf16, #tpu.memory_space<vmem>>, vector<1x1x8x512xbf16>
    %113 = vector.shape_cast %112 : vector<1x1x8x512xbf16> to vector<8x512xbf16>
    %cst_78 = arith.constant 0.000000e+00 : bf16
    %114 = vector.broadcast %cst_78 : bf16 to vector<8x512xbf16>
    %115 = vector.shape_cast %7 : vector<1x512xi1> to vector<1x512xi1>
    %116 = vector.broadcast %115 : vector<1x512xi1> to vector<8x512xi1>
    %117 = arith.select %116, %113, %114 : vector<8x512xi1>, vector<8x512xbf16>
    %c10 = arith.constant 10 : index
    %c0_79 = arith.constant 0 : index
    %c0_80 = arith.constant 0 : index
    %118 = vector.load %arg3[%c10, %c0_79, %c0_80] : memref<27x8x8xbf16, #tpu.memory_space<vmem>>, vector<1x8x8xbf16>
    %119 = vector.shape_cast %118 : vector<1x8x8xbf16> to vector<8x8xbf16>
    %cst_81 = arith.constant dense<0.000000e+00> : vector<8x512xf32>
    %120 = tpu.matmul %119, %117, %cst_81 {dimension_numbers = #tpu.dot_dimension_numbers<[1], [0], [0], [1], [0, 0, 1, 1], [], []>} : vector<8x8xbf16>, vector<8x512xbf16>, vector<8x512xf32> -> vector<8x512xf32>
    %121 = arith.addf %111, %120 : vector<8x512xf32>
    %c0_82 = arith.constant 0 : index
    %c0_83 = arith.constant 0 : index
    %c0_84 = arith.constant 0 : index
    %c121 = arith.constant 121 : index
    %122 = vector.load %arg2[%c0_82, %c0_83, %c0_84, %c121] : memref<1x1x8x768xbf16, #tpu.memory_space<vmem>>, vector<1x1x8x512xbf16>
    %123 = vector.shape_cast %122 : vector<1x1x8x512xbf16> to vector<8x512xbf16>
    %124 = arith.andi %7, %5 : vector<1x512xi1>
    %cst_85 = arith.constant 0.000000e+00 : bf16
    %125 = vector.broadcast %cst_85 : bf16 to vector<8x512xbf16>
    %126 = vector.shape_cast %124 : vector<1x512xi1> to vector<1x512xi1>
    %127 = vector.broadcast %126 : vector<1x512xi1> to vector<8x512xi1>
    %128 = arith.select %127, %123, %125 : vector<8x512xi1>, vector<8x512xbf16>
    %c11 = arith.constant 11 : index
    %c0_86 = arith.constant 0 : index
    %c0_87 = arith.constant 0 : index
    %129 = vector.load %arg3[%c11, %c0_86, %c0_87] : memref<27x8x8xbf16, #tpu.memory_space<vmem>>, vector<1x8x8xbf16>
    %130 = vector.shape_cast %129 : vector<1x8x8xbf16> to vector<8x8xbf16>
    %cst_88 = arith.constant dense<0.000000e+00> : vector<8x512xf32>
    %131 = tpu.matmul %130, %128, %cst_88 {dimension_numbers = #tpu.dot_dimension_numbers<[1], [0], [0], [1], [0, 0, 1, 1], [], []>} : vector<8x8xbf16>, vector<8x512xbf16>, vector<8x512xf32> -> vector<8x512xf32>
    %132 = arith.addf %121, %131 : vector<8x512xf32>
    %c0_89 = arith.constant 0 : index
    %c0_90 = arith.constant 0 : index
    %c0_91 = arith.constant 0 : index
    %c127 = arith.constant 127 : index
    %133 = vector.load %arg2[%c0_89, %c0_90, %c0_91, %c127] : memref<1x1x8x768xbf16, #tpu.memory_space<vmem>>, vector<1x1x8x512xbf16>
    %134 = vector.shape_cast %133 : vector<1x1x8x512xbf16> to vector<8x512xbf16>
    %cst_92 = arith.constant 0.000000e+00 : bf16
    %135 = vector.broadcast %cst_92 : bf16 to vector<8x512xbf16>
    %136 = vector.shape_cast %3 : vector<1x512xi1> to vector<1x512xi1>
    %137 = vector.broadcast %136 : vector<1x512xi1> to vector<8x512xi1>
    %138 = arith.select %137, %134, %135 : vector<8x512xi1>, vector<8x512xbf16>
    %c12 = arith.constant 12 : index
    %c0_93 = arith.constant 0 : index
    %c0_94 = arith.constant 0 : index
    %139 = vector.load %arg3[%c12, %c0_93, %c0_94] : memref<27x8x8xbf16, #tpu.memory_space<vmem>>, vector<1x8x8xbf16>
    %140 = vector.shape_cast %139 : vector<1x8x8xbf16> to vector<8x8xbf16>
    %cst_95 = arith.constant dense<0.000000e+00> : vector<8x512xf32>
    %141 = tpu.matmul %140, %138, %cst_95 {dimension_numbers = #tpu.dot_dimension_numbers<[1], [0], [0], [1], [0, 0, 1, 1], [], []>} : vector<8x8xbf16>, vector<8x512xbf16>, vector<8x512xf32> -> vector<8x512xf32>
    %142 = arith.addf %132, %141 : vector<8x512xf32>
    %c0_96 = arith.constant 0 : index
    %c0_97 = arith.constant 0 : index
    %c0_98 = arith.constant 0 : index
    %c128 = arith.constant 128 : index
    %143 = vector.load %arg2[%c0_96, %c0_97, %c0_98, %c128] : memref<1x1x8x768xbf16, #tpu.memory_space<vmem>>, vector<1x1x8x512xbf16>
    %144 = vector.shape_cast %143 : vector<1x1x8x512xbf16> to vector<8x512xbf16>
    %c13 = arith.constant 13 : index
    %c0_99 = arith.constant 0 : index
    %c0_100 = arith.constant 0 : index
    %145 = vector.load %arg3[%c13, %c0_99, %c0_100] : memref<27x8x8xbf16, #tpu.memory_space<vmem>>, vector<1x8x8xbf16>
    %146 = vector.shape_cast %145 : vector<1x8x8xbf16> to vector<8x8xbf16>
    %cst_101 = arith.constant dense<0.000000e+00> : vector<8x512xf32>
    %147 = tpu.matmul %146, %144, %cst_101 {dimension_numbers = #tpu.dot_dimension_numbers<[1], [0], [0], [1], [0, 0, 1, 1], [], []>} : vector<8x8xbf16>, vector<8x512xbf16>, vector<8x512xf32> -> vector<8x512xf32>
    %148 = arith.addf %142, %147 : vector<8x512xf32>
    %c0_102 = arith.constant 0 : index
    %c0_103 = arith.constant 0 : index
    %c0_104 = arith.constant 0 : index
    %c129 = arith.constant 129 : index
    %149 = vector.load %arg2[%c0_102, %c0_103, %c0_104, %c129] : memref<1x1x8x768xbf16, #tpu.memory_space<vmem>>, vector<1x1x8x512xbf16>
    %150 = vector.shape_cast %149 : vector<1x1x8x512xbf16> to vector<8x512xbf16>
    %cst_105 = arith.constant 0.000000e+00 : bf16
    %151 = vector.broadcast %cst_105 : bf16 to vector<8x512xbf16>
    %152 = vector.shape_cast %5 : vector<1x512xi1> to vector<1x512xi1>
    %153 = vector.broadcast %152 : vector<1x512xi1> to vector<8x512xi1>
    %154 = arith.select %153, %150, %151 : vector<8x512xi1>, vector<8x512xbf16>
    %c14 = arith.constant 14 : index
    %c0_106 = arith.constant 0 : index
    %c0_107 = arith.constant 0 : index
    %155 = vector.load %arg3[%c14, %c0_106, %c0_107] : memref<27x8x8xbf16, #tpu.memory_space<vmem>>, vector<1x8x8xbf16>
    %156 = vector.shape_cast %155 : vector<1x8x8xbf16> to vector<8x8xbf16>
    %cst_108 = arith.constant dense<0.000000e+00> : vector<8x512xf32>
    %157 = tpu.matmul %156, %154, %cst_108 {dimension_numbers = #tpu.dot_dimension_numbers<[1], [0], [0], [1], [0, 0, 1, 1], [], []>} : vector<8x8xbf16>, vector<8x512xbf16>, vector<8x512xf32> -> vector<8x512xf32>
    %158 = arith.addf %148, %157 : vector<8x512xf32>
    %c0_109 = arith.constant 0 : index
    %c0_110 = arith.constant 0 : index
    %c0_111 = arith.constant 0 : index
    %c135 = arith.constant 135 : index
    %159 = vector.load %arg2[%c0_109, %c0_110, %c0_111, %c135] : memref<1x1x8x768xbf16, #tpu.memory_space<vmem>>, vector<1x1x8x512xbf16>
    %160 = vector.shape_cast %159 : vector<1x1x8x512xbf16> to vector<8x512xbf16>
    %161 = arith.andi %9, %3 : vector<1x512xi1>
    %cst_112 = arith.constant 0.000000e+00 : bf16
    %162 = vector.broadcast %cst_112 : bf16 to vector<8x512xbf16>
    %163 = vector.shape_cast %161 : vector<1x512xi1> to vector<1x512xi1>
    %164 = vector.broadcast %163 : vector<1x512xi1> to vector<8x512xi1>
    %165 = arith.select %164, %160, %162 : vector<8x512xi1>, vector<8x512xbf16>
    %c15 = arith.constant 15 : index
    %c0_113 = arith.constant 0 : index
    %c0_114 = arith.constant 0 : index
    %166 = vector.load %arg3[%c15, %c0_113, %c0_114] : memref<27x8x8xbf16, #tpu.memory_space<vmem>>, vector<1x8x8xbf16>
    %167 = vector.shape_cast %166 : vector<1x8x8xbf16> to vector<8x8xbf16>
    %cst_115 = arith.constant dense<0.000000e+00> : vector<8x512xf32>
    %168 = tpu.matmul %167, %165, %cst_115 {dimension_numbers = #tpu.dot_dimension_numbers<[1], [0], [0], [1], [0, 0, 1, 1], [], []>} : vector<8x8xbf16>, vector<8x512xbf16>, vector<8x512xf32> -> vector<8x512xf32>
    %169 = arith.addf %158, %168 : vector<8x512xf32>
    %c0_116 = arith.constant 0 : index
    %c0_117 = arith.constant 0 : index
    %c0_118 = arith.constant 0 : index
    %c136 = arith.constant 136 : index
    %170 = vector.load %arg2[%c0_116, %c0_117, %c0_118, %c136] : memref<1x1x8x768xbf16, #tpu.memory_space<vmem>>, vector<1x1x8x512xbf16>
    %171 = vector.shape_cast %170 : vector<1x1x8x512xbf16> to vector<8x512xbf16>
    %cst_119 = arith.constant 0.000000e+00 : bf16
    %172 = vector.broadcast %cst_119 : bf16 to vector<8x512xbf16>
    %173 = vector.shape_cast %9 : vector<1x512xi1> to vector<1x512xi1>
    %174 = vector.broadcast %173 : vector<1x512xi1> to vector<8x512xi1>
    %175 = arith.select %174, %171, %172 : vector<8x512xi1>, vector<8x512xbf16>
    %c16 = arith.constant 16 : index
    %c0_120 = arith.constant 0 : index
    %c0_121 = arith.constant 0 : index
    %176 = vector.load %arg3[%c16, %c0_120, %c0_121] : memref<27x8x8xbf16, #tpu.memory_space<vmem>>, vector<1x8x8xbf16>
    %177 = vector.shape_cast %176 : vector<1x8x8xbf16> to vector<8x8xbf16>
    %cst_122 = arith.constant dense<0.000000e+00> : vector<8x512xf32>
    %178 = tpu.matmul %177, %175, %cst_122 {dimension_numbers = #tpu.dot_dimension_numbers<[1], [0], [0], [1], [0, 0, 1, 1], [], []>} : vector<8x8xbf16>, vector<8x512xbf16>, vector<8x512xf32> -> vector<8x512xf32>
    %179 = arith.addf %169, %178 : vector<8x512xf32>
    %c0_123 = arith.constant 0 : index
    %c0_124 = arith.constant 0 : index
    %c0_125 = arith.constant 0 : index
    %c137 = arith.constant 137 : index
    %180 = vector.load %arg2[%c0_123, %c0_124, %c0_125, %c137] : memref<1x1x8x768xbf16, #tpu.memory_space<vmem>>, vector<1x1x8x512xbf16>
    %181 = vector.shape_cast %180 : vector<1x1x8x512xbf16> to vector<8x512xbf16>
    %182 = arith.andi %9, %5 : vector<1x512xi1>
    %cst_126 = arith.constant 0.000000e+00 : bf16
    %183 = vector.broadcast %cst_126 : bf16 to vector<8x512xbf16>
    %184 = vector.shape_cast %182 : vector<1x512xi1> to vector<1x512xi1>
    %185 = vector.broadcast %184 : vector<1x512xi1> to vector<8x512xi1>
    %186 = arith.select %185, %181, %183 : vector<8x512xi1>, vector<8x512xbf16>
    %c17 = arith.constant 17 : index
    %c0_127 = arith.constant 0 : index
    %c0_128 = arith.constant 0 : index
    %187 = vector.load %arg3[%c17, %c0_127, %c0_128] : memref<27x8x8xbf16, #tpu.memory_space<vmem>>, vector<1x8x8xbf16>
    %188 = vector.shape_cast %187 : vector<1x8x8xbf16> to vector<8x8xbf16>
    %cst_129 = arith.constant dense<0.000000e+00> : vector<8x512xf32>
    %189 = tpu.matmul %188, %186, %cst_129 {dimension_numbers = #tpu.dot_dimension_numbers<[1], [0], [0], [1], [0, 0, 1, 1], [], []>} : vector<8x8xbf16>, vector<8x512xbf16>, vector<8x512xf32> -> vector<8x512xf32>
    %190 = arith.addf %179, %189 : vector<8x512xf32>
    %c0_130 = arith.constant 0 : index
    %c0_131 = arith.constant 0 : index
    %c0_132 = arith.constant 0 : index
    %c183 = arith.constant 183 : index
    %191 = vector.load %arg2[%c0_130, %c0_131, %c0_132, %c183] : memref<1x1x8x768xbf16, #tpu.memory_space<vmem>>, vector<1x1x8x512xbf16>
    %192 = vector.shape_cast %191 : vector<1x1x8x512xbf16> to vector<8x512xbf16>
    %193 = arith.andi %7, %3 : vector<1x512xi1>
    %cst_133 = arith.constant 0.000000e+00 : bf16
    %194 = vector.broadcast %cst_133 : bf16 to vector<8x512xbf16>
    %195 = vector.shape_cast %193 : vector<1x512xi1> to vector<1x512xi1>
    %196 = vector.broadcast %195 : vector<1x512xi1> to vector<8x512xi1>
    %197 = arith.select %196, %192, %194 : vector<8x512xi1>, vector<8x512xbf16>
    %c18 = arith.constant 18 : index
    %c0_134 = arith.constant 0 : index
    %c0_135 = arith.constant 0 : index
    %198 = vector.load %arg3[%c18, %c0_134, %c0_135] : memref<27x8x8xbf16, #tpu.memory_space<vmem>>, vector<1x8x8xbf16>
    %199 = vector.shape_cast %198 : vector<1x8x8xbf16> to vector<8x8xbf16>
    %cst_136 = arith.constant dense<0.000000e+00> : vector<8x512xf32>
    %200 = tpu.matmul %199, %197, %cst_136 {dimension_numbers = #tpu.dot_dimension_numbers<[1], [0], [0], [1], [0, 0, 1, 1], [], []>} : vector<8x8xbf16>, vector<8x512xbf16>, vector<8x512xf32> -> vector<8x512xf32>
    %201 = arith.addf %190, %200 : vector<8x512xf32>
    %c0_137 = arith.constant 0 : index
    %c0_138 = arith.constant 0 : index
    %c0_139 = arith.constant 0 : index
    %c184 = arith.constant 184 : index
    %202 = vector.load %arg2[%c0_137, %c0_138, %c0_139, %c184] : memref<1x1x8x768xbf16, #tpu.memory_space<vmem>>, vector<1x1x8x512xbf16>
    %203 = vector.shape_cast %202 : vector<1x1x8x512xbf16> to vector<8x512xbf16>
    %cst_140 = arith.constant 0.000000e+00 : bf16
    %204 = vector.broadcast %cst_140 : bf16 to vector<8x512xbf16>
    %205 = vector.shape_cast %7 : vector<1x512xi1> to vector<1x512xi1>
    %206 = vector.broadcast %205 : vector<1x512xi1> to vector<8x512xi1>
    %207 = arith.select %206, %203, %204 : vector<8x512xi1>, vector<8x512xbf16>
    %c19 = arith.constant 19 : index
    %c0_141 = arith.constant 0 : index
    %c0_142 = arith.constant 0 : index
    %208 = vector.load %arg3[%c19, %c0_141, %c0_142] : memref<27x8x8xbf16, #tpu.memory_space<vmem>>, vector<1x8x8xbf16>
    %209 = vector.shape_cast %208 : vector<1x8x8xbf16> to vector<8x8xbf16>
    %cst_143 = arith.constant dense<0.000000e+00> : vector<8x512xf32>
    %210 = tpu.matmul %209, %207, %cst_143 {dimension_numbers = #tpu.dot_dimension_numbers<[1], [0], [0], [1], [0, 0, 1, 1], [], []>} : vector<8x8xbf16>, vector<8x512xbf16>, vector<8x512xf32> -> vector<8x512xf32>
    %211 = arith.addf %201, %210 : vector<8x512xf32>
    %c0_144 = arith.constant 0 : index
    %c0_145 = arith.constant 0 : index
    %c0_146 = arith.constant 0 : index
    %c185 = arith.constant 185 : index
    %212 = vector.load %arg2[%c0_144, %c0_145, %c0_146, %c185] : memref<1x1x8x768xbf16, #tpu.memory_space<vmem>>, vector<1x1x8x512xbf16>
    %213 = vector.shape_cast %212 : vector<1x1x8x512xbf16> to vector<8x512xbf16>
    %214 = arith.andi %7, %5 : vector<1x512xi1>
    %cst_147 = arith.constant 0.000000e+00 : bf16
    %215 = vector.broadcast %cst_147 : bf16 to vector<8x512xbf16>
    %216 = vector.shape_cast %214 : vector<1x512xi1> to vector<1x512xi1>
    %217 = vector.broadcast %216 : vector<1x512xi1> to vector<8x512xi1>
    %218 = arith.select %217, %213, %215 : vector<8x512xi1>, vector<8x512xbf16>
    %c20 = arith.constant 20 : index
    %c0_148 = arith.constant 0 : index
    %c0_149 = arith.constant 0 : index
    %219 = vector.load %arg3[%c20, %c0_148, %c0_149] : memref<27x8x8xbf16, #tpu.memory_space<vmem>>, vector<1x8x8xbf16>
    %220 = vector.shape_cast %219 : vector<1x8x8xbf16> to vector<8x8xbf16>
    %cst_150 = arith.constant dense<0.000000e+00> : vector<8x512xf32>
    %221 = tpu.matmul %220, %218, %cst_150 {dimension_numbers = #tpu.dot_dimension_numbers<[1], [0], [0], [1], [0, 0, 1, 1], [], []>} : vector<8x8xbf16>, vector<8x512xbf16>, vector<8x512xf32> -> vector<8x512xf32>
    %222 = arith.addf %211, %221 : vector<8x512xf32>
    %c0_151 = arith.constant 0 : index
    %c0_152 = arith.constant 0 : index
    %c0_153 = arith.constant 0 : index
    %c191 = arith.constant 191 : index
    %223 = vector.load %arg2[%c0_151, %c0_152, %c0_153, %c191] : memref<1x1x8x768xbf16, #tpu.memory_space<vmem>>, vector<1x1x8x512xbf16>
    %224 = vector.shape_cast %223 : vector<1x1x8x512xbf16> to vector<8x512xbf16>
    %cst_154 = arith.constant 0.000000e+00 : bf16
    %225 = vector.broadcast %cst_154 : bf16 to vector<8x512xbf16>
    %226 = vector.shape_cast %3 : vector<1x512xi1> to vector<1x512xi1>
    %227 = vector.broadcast %226 : vector<1x512xi1> to vector<8x512xi1>
    %228 = arith.select %227, %224, %225 : vector<8x512xi1>, vector<8x512xbf16>
    %c21 = arith.constant 21 : index
    %c0_155 = arith.constant 0 : index
    %c0_156 = arith.constant 0 : index
    %229 = vector.load %arg3[%c21, %c0_155, %c0_156] : memref<27x8x8xbf16, #tpu.memory_space<vmem>>, vector<1x8x8xbf16>
    %230 = vector.shape_cast %229 : vector<1x8x8xbf16> to vector<8x8xbf16>
    %cst_157 = arith.constant dense<0.000000e+00> : vector<8x512xf32>
    %231 = tpu.matmul %230, %228, %cst_157 {dimension_numbers = #tpu.dot_dimension_numbers<[1], [0], [0], [1], [0, 0, 1, 1], [], []>} : vector<8x8xbf16>, vector<8x512xbf16>, vector<8x512xf32> -> vector<8x512xf32>
    %232 = arith.addf %222, %231 : vector<8x512xf32>
    %c0_158 = arith.constant 0 : index
    %c0_159 = arith.constant 0 : index
    %c0_160 = arith.constant 0 : index
    %c192 = arith.constant 192 : index
    %233 = vector.load %arg2[%c0_158, %c0_159, %c0_160, %c192] : memref<1x1x8x768xbf16, #tpu.memory_space<vmem>>, vector<1x1x8x512xbf16>
    %234 = vector.shape_cast %233 : vector<1x1x8x512xbf16> to vector<8x512xbf16>
    %c22 = arith.constant 22 : index
    %c0_161 = arith.constant 0 : index
    %c0_162 = arith.constant 0 : index
    %235 = vector.load %arg3[%c22, %c0_161, %c0_162] : memref<27x8x8xbf16, #tpu.memory_space<vmem>>, vector<1x8x8xbf16>
    %236 = vector.shape_cast %235 : vector<1x8x8xbf16> to vector<8x8xbf16>
    %cst_163 = arith.constant dense<0.000000e+00> : vector<8x512xf32>
    %237 = tpu.matmul %236, %234, %cst_163 {dimension_numbers = #tpu.dot_dimension_numbers<[1], [0], [0], [1], [0, 0, 1, 1], [], []>} : vector<8x8xbf16>, vector<8x512xbf16>, vector<8x512xf32> -> vector<8x512xf32>
    %238 = arith.addf %232, %237 : vector<8x512xf32>
    %c0_164 = arith.constant 0 : index
    %c0_165 = arith.constant 0 : index
    %c0_166 = arith.constant 0 : index
    %c193 = arith.constant 193 : index
    %239 = vector.load %arg2[%c0_164, %c0_165, %c0_166, %c193] : memref<1x1x8x768xbf16, #tpu.memory_space<vmem>>, vector<1x1x8x512xbf16>
    %240 = vector.shape_cast %239 : vector<1x1x8x512xbf16> to vector<8x512xbf16>
    %cst_167 = arith.constant 0.000000e+00 : bf16
    %241 = vector.broadcast %cst_167 : bf16 to vector<8x512xbf16>
    %242 = vector.shape_cast %5 : vector<1x512xi1> to vector<1x512xi1>
    %243 = vector.broadcast %242 : vector<1x512xi1> to vector<8x512xi1>
    %244 = arith.select %243, %240, %241 : vector<8x512xi1>, vector<8x512xbf16>
    %c23 = arith.constant 23 : index
    %c0_168 = arith.constant 0 : index
    %c0_169 = arith.constant 0 : index
    %245 = vector.load %arg3[%c23, %c0_168, %c0_169] : memref<27x8x8xbf16, #tpu.memory_space<vmem>>, vector<1x8x8xbf16>
    %246 = vector.shape_cast %245 : vector<1x8x8xbf16> to vector<8x8xbf16>
    %cst_170 = arith.constant dense<0.000000e+00> : vector<8x512xf32>
    %247 = tpu.matmul %246, %244, %cst_170 {dimension_numbers = #tpu.dot_dimension_numbers<[1], [0], [0], [1], [0, 0, 1, 1], [], []>} : vector<8x8xbf16>, vector<8x512xbf16>, vector<8x512xf32> -> vector<8x512xf32>
    %248 = arith.addf %238, %247 : vector<8x512xf32>
    %c0_171 = arith.constant 0 : index
    %c0_172 = arith.constant 0 : index
    %c0_173 = arith.constant 0 : index
    %c199 = arith.constant 199 : index
    %249 = vector.load %arg2[%c0_171, %c0_172, %c0_173, %c199] : memref<1x1x8x768xbf16, #tpu.memory_space<vmem>>, vector<1x1x8x512xbf16>
    %250 = vector.shape_cast %249 : vector<1x1x8x512xbf16> to vector<8x512xbf16>
    %251 = arith.andi %9, %3 : vector<1x512xi1>
    %cst_174 = arith.constant 0.000000e+00 : bf16
    %252 = vector.broadcast %cst_174 : bf16 to vector<8x512xbf16>
    %253 = vector.shape_cast %251 : vector<1x512xi1> to vector<1x512xi1>
    %254 = vector.broadcast %253 : vector<1x512xi1> to vector<8x512xi1>
    %255 = arith.select %254, %250, %252 : vector<8x512xi1>, vector<8x512xbf16>
    %c24 = arith.constant 24 : index
    %c0_175 = arith.constant 0 : index
    %c0_176 = arith.constant 0 : index
    %256 = vector.load %arg3[%c24, %c0_175, %c0_176] : memref<27x8x8xbf16, #tpu.memory_space<vmem>>, vector<1x8x8xbf16>
    %257 = vector.shape_cast %256 : vector<1x8x8xbf16> to vector<8x8xbf16>
    %cst_177 = arith.constant dense<0.000000e+00> : vector<8x512xf32>
    %258 = tpu.matmul %257, %255, %cst_177 {dimension_numbers = #tpu.dot_dimension_numbers<[1], [0], [0], [1], [0, 0, 1, 1], [], []>} : vector<8x8xbf16>, vector<8x512xbf16>, vector<8x512xf32> -> vector<8x512xf32>
    %259 = arith.addf %248, %258 : vector<8x512xf32>
    %c0_178 = arith.constant 0 : index
    %c0_179 = arith.constant 0 : index
    %c0_180 = arith.constant 0 : index
    %c200 = arith.constant 200 : index
    %260 = vector.load %arg2[%c0_178, %c0_179, %c0_180, %c200] : memref<1x1x8x768xbf16, #tpu.memory_space<vmem>>, vector<1x1x8x512xbf16>
    %261 = vector.shape_cast %260 : vector<1x1x8x512xbf16> to vector<8x512xbf16>
    %cst_181 = arith.constant 0.000000e+00 : bf16
    %262 = vector.broadcast %cst_181 : bf16 to vector<8x512xbf16>
    %263 = vector.shape_cast %9 : vector<1x512xi1> to vector<1x512xi1>
    %264 = vector.broadcast %263 : vector<1x512xi1> to vector<8x512xi1>
    %265 = arith.select %264, %261, %262 : vector<8x512xi1>, vector<8x512xbf16>
    %c25 = arith.constant 25 : index
    %c0_182 = arith.constant 0 : index
    %c0_183 = arith.constant 0 : index
    %266 = vector.load %arg3[%c25, %c0_182, %c0_183] : memref<27x8x8xbf16, #tpu.memory_space<vmem>>, vector<1x8x8xbf16>
    %267 = vector.shape_cast %266 : vector<1x8x8xbf16> to vector<8x8xbf16>
    %cst_184 = arith.constant dense<0.000000e+00> : vector<8x512xf32>
    %268 = tpu.matmul %267, %265, %cst_184 {dimension_numbers = #tpu.dot_dimension_numbers<[1], [0], [0], [1], [0, 0, 1, 1], [], []>} : vector<8x8xbf16>, vector<8x512xbf16>, vector<8x512xf32> -> vector<8x512xf32>
    %269 = arith.addf %259, %268 : vector<8x512xf32>
    %c0_185 = arith.constant 0 : index
    %c0_186 = arith.constant 0 : index
    %c0_187 = arith.constant 0 : index
    %c201 = arith.constant 201 : index
    %270 = vector.load %arg2[%c0_185, %c0_186, %c0_187, %c201] : memref<1x1x8x768xbf16, #tpu.memory_space<vmem>>, vector<1x1x8x512xbf16>
    %271 = vector.shape_cast %270 : vector<1x1x8x512xbf16> to vector<8x512xbf16>
    %272 = arith.andi %9, %5 : vector<1x512xi1>
    %cst_188 = arith.constant 0.000000e+00 : bf16
    %273 = vector.broadcast %cst_188 : bf16 to vector<8x512xbf16>
    %274 = vector.shape_cast %272 : vector<1x512xi1> to vector<1x512xi1>
    %275 = vector.broadcast %274 : vector<1x512xi1> to vector<8x512xi1>
    %276 = arith.select %275, %271, %273 : vector<8x512xi1>, vector<8x512xbf16>
    %c26 = arith.constant 26 : index
    %c0_189 = arith.constant 0 : index
    %c0_190 = arith.constant 0 : index
    %277 = vector.load %arg3[%c26, %c0_189, %c0_190] : memref<27x8x8xbf16, #tpu.memory_space<vmem>>, vector<1x8x8xbf16>
    %278 = vector.shape_cast %277 : vector<1x8x8xbf16> to vector<8x8xbf16>
    %cst_191 = arith.constant dense<0.000000e+00> : vector<8x512xf32>
    %279 = tpu.matmul %278, %276, %cst_191 {dimension_numbers = #tpu.dot_dimension_numbers<[1], [0], [0], [1], [0, 0, 1, 1], [], []>} : vector<8x8xbf16>, vector<8x512xbf16>, vector<8x512xf32> -> vector<8x512xf32>
    %280 = arith.addf %269, %279 : vector<8x512xf32>
    %c0_192 = arith.constant 0 : index
    %c0_193 = arith.constant 0 : index
    %281 = vector.load %arg4[%c0_192, %c0_193] : memref<8x1xf32, #tpu.memory_space<vmem>>, vector<8x1xf32>
    %282 = vector.broadcast %281 : vector<8x1xf32> to vector<8x512xf32>
    %283 = arith.addf %280, %282 : vector<8x512xf32>
    %284 = arith.truncf %283 : vector<8x512xf32> to vector<8x512xbf16>
    %c0_194 = arith.constant 0 : index
    %c0_195 = arith.constant 0 : index
    %c0_196 = arith.constant 0 : index
    %285 = vector.load %arg6[%c0_194, %c0_195, %c0_196] : memref<1x8x512xbf16, #tpu.memory_space<vmem>>, vector<1x8x512xbf16>
    %286 = vector.shape_cast %285 : vector<1x8x512xbf16> to vector<8x512xbf16>
    %287 = vector.shape_cast %284 : vector<8x512xbf16> to vector<1x8x512xbf16>
    tpu.vector_store %arg6[%c0_194, %c0_195, %c0_196], %287 {strides = array<i32>} : memref<1x8x512xbf16, #tpu.memory_space<vmem>>, vector<1x8x512xbf16>,
    %cst_197 = arith.constant dense<0.000000e+00> : vector<8xf32>
    %288 = vector.multi_reduction <add>, %280, %cst_197 [1] : vector<8x512xf32> to vector<8xf32>
    %289 = vector.shape_cast %288 : vector<8xf32> to vector<8x1xf32>
    %c0_198 = arith.constant 0 : index
    %c0_199 = arith.constant 0 : index
    %c0_200 = arith.constant 0 : index
    %c0_201 = arith.constant 0 : index
    %290 = vector.load %arg7[%c0_198, %c0_199, %c0_200, %c0_201] : memref<1x1x8x2xf32, #tpu.memory_space<vmem>>, vector<1x1x8x1xf32>
    %291 = vector.shape_cast %290 : vector<1x1x8x1xf32> to vector<8x1xf32>
    %292 = vector.shape_cast %289 : vector<8x1xf32> to vector<1x1x8x1xf32>
    tpu.vector_store %arg7[%c0_198, %c0_199, %c0_200, %c0_201], %292 {strides = array<i32>} : memref<1x1x8x2xf32, #tpu.memory_space<vmem>>, vector<1x1x8x1xf32>,
    %293 = arith.mulf %280, %280 : vector<8x512xf32>
    %cst_202 = arith.constant dense<0.000000e+00> : vector<8xf32>
    %294 = vector.multi_reduction <add>, %293, %cst_202 [1] : vector<8x512xf32> to vector<8xf32>
    %295 = vector.shape_cast %294 : vector<8xf32> to vector<8x1xf32>
    %c0_203 = arith.constant 0 : index
    %c0_204 = arith.constant 0 : index
    %c0_205 = arith.constant 0 : index
    %c1_206 = arith.constant 1 : index
    %296 = vector.load %arg7[%c0_203, %c0_204, %c0_205, %c1_206] : memref<1x1x8x2xf32, #tpu.memory_space<vmem>>, vector<1x1x8x1xf32>
    %297 = vector.shape_cast %296 : vector<1x1x8x1xf32> to vector<8x1xf32>
    %298 = vector.shape_cast %295 : vector<8x1xf32> to vector<1x1x8x1xf32>
    tpu.vector_store %arg7[%c0_203, %c0_204, %c0_205, %c1_206], %298 {strides = array<i32>} : memref<1x1x8x2xf32, #tpu.memory_space<vmem>>, vector<1x1x8x1xf32>,
    return
  }
  func.func @transform_0(%arg0: i32, %arg1: i32) -> (i32, i32, i32, i32) {
    %c0_i32 = arith.constant 0 : i32
    %c0_i32_0 = arith.constant 0 : i32
    %c0_i32_1 = arith.constant 0 : i32
    return %arg0, %arg1, %c0_i32, %c0_i32_0 : i32, i32, i32, i32
  }
  func.func @transform_1(%arg0: i32, %arg1: i32) -> (i32, i32, i32) {
    %c0_i32 = arith.constant 0 : i32
    %c0_i32_0 = arith.constant 0 : i32
    %c0_i32_1 = arith.constant 0 : i32
    %c0_i32_2 = arith.constant 0 : i32
    return %c0_i32, %c0_i32_0, %c0_i32_1 : i32, i32, i32
  }
  func.func @transform_2(%arg0: i32, %arg1: i32) -> (i32, i32) {
    %c0_i32 = arith.constant 0 : i32
    %c0_i32_0 = arith.constant 0 : i32
    %c0_i32_1 = arith.constant 0 : i32
    return %c0_i32, %c0_i32_0 : i32, i32
  }
  func.func @transform_3(%arg0: i32, %arg1: i32) -> (i32, i32) {
    %c0_i32 = arith.constant 0 : i32
    %c0_i32_0 = arith.constant 0 : i32
    %c0_i32_1 = arith.constant 0 : i32
    return %c0_i32, %c0_i32_0 : i32, i32
  }
  func.func @transform_4(%arg0: i32, %arg1: i32) -> (i32, i32, i32) {
    %c0_i32 = arith.constant 0 : i32
    %c0_i32_0 = arith.constant 0 : i32
    return %arg0, %c0_i32, %arg1 : i32, i32, i32
  }
  func.func @transform_5(%arg0: i32, %arg1: i32) -> (i32, i32, i32, i32) {
    %c0_i32 = arith.constant 0 : i32
    %c0_i32_0 = arith.constant 0 : i32
    %c0_i32_1 = arith.constant 0 : i32
    return %arg0, %arg1, %c0_i32, %c0_i32_0 : i32, i32, i32, i32
  }
}

module attributes {stable_mosaic.version = 11 : i64} {
  func.func @_bn_lrelu_kernel(%arg0: i32, %arg1: i32, %arg2: memref<1x8x512xbf16, #tpu.memory_space<vmem>>, %arg3: memref<8x1xf32, #tpu.memory_space<vmem>>, %arg4: memref<8x1xf32, #tpu.memory_space<vmem>>, %arg5: memref<1x8x512xf32, #tpu.memory_space<vmem>>) attributes {dimension_semantics = [#tpu.dimension_semantics<parallel>, #tpu.dimension_semantics<parallel>], iteration_bounds = array<i64: 2, 1>, scalar_prefetch = 0 : i64, scratch_operands = 0 : i64, tpu.core_type = #tpu.core_type<tc>, window_params = [{transform_indices = @transform_0, window_bounds = array<i64: 1, 8, 512>}, {pipeline_mode = #tpu.pipeline_mode<synchronous>, transform_indices = @transform_1, window_bounds = array<i64: 8, 1>}, {pipeline_mode = #tpu.pipeline_mode<synchronous>, transform_indices = @transform_2, window_bounds = array<i64: 8, 1>}, {transform_indices = @transform_3, window_bounds = array<i64: 1, 8, 512>}]} {
    %c0 = arith.constant 0 : index
    %c0_0 = arith.constant 0 : index
    %c0_1 = arith.constant 0 : index
    %0 = vector.load %arg2[%c0, %c0_0, %c0_1] : memref<1x8x512xbf16, #tpu.memory_space<vmem>>, vector<1x8x512xbf16>
    %1 = arith.extf %0 : vector<1x8x512xbf16> to vector<1x8x512xf32>
    %c0_2 = arith.constant 0 : index
    %c0_3 = arith.constant 0 : index
    %2 = vector.load %arg3[%c0_2, %c0_3] : memref<8x1xf32, #tpu.memory_space<vmem>>, vector<8x1xf32>
    %3 = vector.shape_cast %2 : vector<8x1xf32> to vector<1x8x1xf32>
    %4 = vector.broadcast %3 : vector<1x8x1xf32> to vector<1x8x512xf32>
    %5 = arith.mulf %1, %4 : vector<1x8x512xf32>
    %c0_4 = arith.constant 0 : index
    %c0_5 = arith.constant 0 : index
    %6 = vector.load %arg4[%c0_4, %c0_5] : memref<8x1xf32, #tpu.memory_space<vmem>>, vector<8x1xf32>
    %7 = vector.shape_cast %6 : vector<8x1xf32> to vector<1x8x1xf32>
    %8 = vector.broadcast %7 : vector<1x8x1xf32> to vector<1x8x512xf32>
    %9 = arith.addf %5, %8 : vector<1x8x512xf32>
    %cst = arith.constant 0.00999999977 : f32
    %10 = vector.broadcast %cst : f32 to vector<1x8x512xf32>
    %11 = arith.mulf %10, %9 : vector<1x8x512xf32>
    %12 = arith.maximumf %9, %11 : vector<1x8x512xf32>
    %c0_6 = arith.constant 0 : index
    %c0_7 = arith.constant 0 : index
    %c0_8 = arith.constant 0 : index
    %13 = vector.load %arg5[%c0_6, %c0_7, %c0_8] : memref<1x8x512xf32, #tpu.memory_space<vmem>>, vector<1x8x512xf32>
    tpu.vector_store %arg5[%c0_6, %c0_7, %c0_8], %12 {strides = array<i32>} : memref<1x8x512xf32, #tpu.memory_space<vmem>>, vector<1x8x512xf32>,
    return
  }
  func.func @transform_0(%arg0: i32, %arg1: i32) -> (i32, i32, i32) {
    %c0_i32 = arith.constant 0 : i32
    %c0_i32_0 = arith.constant 0 : i32
    return %arg0, %c0_i32, %arg1 : i32, i32, i32
  }
  func.func @transform_1(%arg0: i32, %arg1: i32) -> (i32, i32) {
    %c0_i32 = arith.constant 0 : i32
    %c0_i32_0 = arith.constant 0 : i32
    %c0_i32_1 = arith.constant 0 : i32
    return %c0_i32, %c0_i32_0 : i32, i32
  }
  func.func @transform_2(%arg0: i32, %arg1: i32) -> (i32, i32) {
    %c0_i32 = arith.constant 0 : i32
    %c0_i32_0 = arith.constant 0 : i32
    %c0_i32_1 = arith.constant 0 : i32
    return %c0_i32, %c0_i32_0 : i32, i32
  }
  func.func @transform_3(%arg0: i32, %arg1: i32) -> (i32, i32, i32) {
    %c0_i32 = arith.constant 0 : i32
    %c0_i32_0 = arith.constant 0 : i32
    return %arg0, %c0_i32, %arg1 : i32, i32, i32
  }
}

</mosaic_0001>

<bundles_post_ra>
// kernel: conv3x3_forward.3
= control target key start
LH: loop header
LB: loop body
LE: loop exit
PB: predicated region body
PF: predicated region fallthrough
CT: control target
= control target key end

     0   :  { %s419_s12 = smov 0   ;;  %s421_s13 = smov 0   ;;  %s458_s0 = inlined_call_operand.vmem [shape: bf16[2,8,512], index: 0, kind: input, shape index: {}]   ;;  %s459_s1 = inlined_call_operand.vmem [shape: f32[8,1], index: 1, kind: input, shape index: {}]   ;;  %s460_s2 = inlined_call_operand.vmem [shape: f32[8,1], index: 2, kind: input, shape index: {}]   ;;  %s461_s3 = inlined_call_operand.vmem [shape: f32[2,8,512], index: 3, kind: output, shape index: {}]  }
   0x1   :  { %s423_s14 = smov 0  }
   0x2 LB: > { %s25_s15 = sadd.s32 1, %s392_s13  ;;  %p339_p0 = scmp.ge.s32.totalorder %s396_s14, 1  ;;  %s396_s14 = sphi %s423_s14, %s13_s14   ;;  %s392_s13 = sphi %s421_s13, %s463_s13   ;;  %s388_s12 = sphi %s419_s12, %s462_s12  }
   0x3   : > { %p27_p1 = scmp.ge.s32.totalorder %s25_s15, 2  ;;  %p158_p2 = scmp.lt.s32.totalorder %s396_s14, 3 }
   0x5   : > { %s465_s15 = smov (%p27_p1, %s25_s15), 0  ;;  %p159_p3 = pnand %p339_p0, %p158_p2 }
   0x6   : > { %p191_p4 = scmp.lt.s32.totalorder (!%p159_p3), %s388_s12, 1 }
   0x7   : > { %162 = sbr.rel (%p159_p3) target bundleno = 150 (0x96), region = 32 }
   0xc   : > { %v216_v0 = vld [vmem:[%s459_s1] sm:$0xff]  ;;  %v398_v1 = vmov 0   ;;  %s467_s12 = smov (!%p191_p4, %s388_s12), 1 }
   0xd   : > { %373 = vset.pattern.permute.xlu0 %v398_v1  ;;  %v226_v2 = vld [vmem:[%s460_s2] sm:$0xff]  ;;  %s346_s20 = sshll.u32 %s467_s12, 4  ;;  %s347_s24 = sshll.u32 %s467_s12, 5 }
   0xe   : > { %219 = vperm.xlu0 %373, %v216_v0   ;;  %s198_s23 = scalar_lea.vmem %s458_s0, %s346_s20  ;;  %s208_s27 = scalar_lea.vmem %s461_s3, %s347_s24 }
   0xf   : > { %v210_v3 = vld [vmem:[%s198_s23] sm:$0xff]  ;;  %v211_v4 = vld [vmem:[%s198_s23 + $0x8] sm:$0xff] }
  0x10   : > { %v212_v5 = vunpack.c.l.bf16 %v210_v3  ;;  %v213_v6 = vunpack.c.h.bf16 %v210_v3  ;;  %v214_v7 = vunpack.c.l.bf16 %v211_v4  ;;  %v215_v8 = vunpack.c.h.bf16 %v211_v4 }
  0x12   : > { %229 = vperm.xlu0 %373, %v226_v2  }
  0x89   : > { %v220_v9 = vpop.permute.xlu0 %219 }
  0x8a   : > { %v222_v10 = vmul.f32 %v220_v9, %v212_v5  ;;  %v223_v11 = vmul.f32 %v220_v9, %v213_v6  ;;  %v224_v12 = vmul.f32 %v220_v9, %v214_v7  ;;  %v225_v13 = vmul.f32 %v220_v9, %v215_v8 }
  0x8d   : > { %v230_v14 = vpop.permute.xlu0 %229 }
  0x8e   : > { %v232_v15 = vadd.f32 %v230_v14, %v222_v10  ;;  %v233_v16 = vadd.f32 %v230_v14, %v223_v11  ;;  %v234_v17 = vadd.f32 %v230_v14, %v224_v12  ;;  %v235_v18 = vadd.f32 %v230_v14, %v225_v13 }
  0x90   : > { %v236_v19 = vmul.f32 0.01, %v232_v15  ;;  %v237_v20 = vmul.f32 0.01, %v233_v16  ;;  %v238_v21 = vmul.f32 0.01, %v234_v17 }
  0x91   : > { %v239_v22 = vmul.f32 0.01, %v235_v18 }
  0x92   : > { %v240_v23 = vmax.f32 %v232_v15, %v236_v19  ;;  %v241_v24 = vmax.f32 %v233_v16, %v237_v20  ;;  %v242_v25 = vmax.f32 %v234_v17, %v238_v21 }
  0x93   : > { %v243_v26 = vmax.f32 %v235_v18, %v239_v22 }
  0x94   : > { %244 = vst [vmem:[%s208_s27] sm:$0xff] %v240_v23  ;;  %245 = vst [vmem:[%s208_s27 + $0x8] sm:$0xff] %v241_v24 }
  0x95   : > { %246 = vst [vmem:[%s208_s27 + $0x10] sm:$0xff] %v242_v25  ;;  %247 = vst [vmem:[%s208_s27 + $0x18] sm:$0xff] %v243_v26 }
  0x96 PF: > { %s13_s14 = sadd.s32 1, %s396_s14   ;;  %s462_s12 = smov %s392_s13 }
  0x97   : > { %p10_p5 = scmp.ge.s32.totalorder %s13_s14, 4   ;;  %s463_s13 = smov %s465_s15 }
  0x99   :  { %12 = sbr.rel (!%p10_p5) target bundleno = 2 (0x2), region = 62 }

// kernel: conv3x3_forward.2
= control target key start
LH: loop header
LB: loop body
LE: loop exit
PB: predicated region body
PF: predicated region fallthrough
CT: control target
= control target key end

     0   :  { %s4863_s18 = smov 0   ;;  %s4865_s19 = smov 0   ;;  %s6389_s0 = inlined_call_operand.vmem [shape: bf16[2,1,8,768], index: 0, kind: input, shape index: {}]   ;;  %s6390_s1 = inlined_call_operand.vmem [shape: bf16[27,8,8], index: 1, kind: input, shape index: {}]   ;;  %s6391_s2 = inlined_call_operand.vmem [shape: f32[8,1], index: 2, kind: input, shape index: {}]   ;;  %s6392_s3 = inlined_call_operand.vmem [shape: s32[2,512], index: 3, kind: input, shape index: {}]   ;;  %s6393_s4 = inlined_call_operand.vmem [shape: bf16[2,8,512], index: 4, kind: output, shape index: {0}]   ;;  %s6394_s5 = inlined_call_operand.vmem [shape: f32[2,1,8,2], index: 5, kind: output, shape index: {1}]  }
   0x1   :  { %s4867_s20 = smov 0  }
   0x2 LB: > { %s28_s21 = sadd.s32 1, %s4809_s19  ;;  %p4452_p0 = scmp.ge.s32.totalorder %s4813_s20, 1  ;;  %s4813_s20 = sphi %s4867_s20, %s16_s20   ;;  %s4809_s19 = sphi %s4865_s19, %s6586_s19   ;;  %s4805_s18 = sphi %s4863_s18, %s6585_s18  }
   0x3   : > { %p30_p1 = scmp.ge.s32.totalorder %s28_s21, 2  ;;  %p212_p2 = scmp.lt.s32.totalorder %s4813_s20, 3 }
   0x5   : > { %s6588_s21 = smov (%p30_p1, %s28_s21), 0  ;;  %p213_p3 = pnand %p4452_p0, %p212_p2 }
   0x6   : > { %s4816_s26 = smov (!%p213_p3), 56   ;;  %s4817_s27 = smov (!%p213_p3), 55  }
   0x7   : > { %216 = sbr.rel (%p213_p3) target bundleno = 930 (0x3a2), region = 36  ;;  %s4818_s28 = smov (!%p213_p3), 57  }
   0x8   : > { %s4819_s29 = smov (!%p213_p3), 63   ;;  %s4820_s30 = smov (!%p213_p3), 65  }
   0x9   : > { %s4821_s6 = smov (!%p213_p3), 71   ;;  %s4822_s7 = smov (!%p213_p3), 72  }
   0xa   : > { %p255_p4 = scmp.lt.s32.totalorder (!%p213_p3), %s4805_s18, 1  ;;  %s4823_s8 = smov (!%p213_p3), 73  }
   0xb   : > { %s4824_s9 = smov (!%p213_p3), 119   ;;  %s4825_s11 = smov (!%p213_p3), 120  }
   0xc   : > { %v4886_v0 = vld [vmem:[%s6392_s3 + $0x1] ss:$2 sm:$0xf]  ;;  %v296_v1 = vlaneseq  ;;  %v4892_v2 = vld [vmem:[%s6392_s3] ss:$2 sm:$0xf] }
   0xd   : > { %vm289_vm0 = vcmp.ge.s32.totalorder %v4886_v0, 1  ;;  %v4815_v3 = vmov 0   ;;  %vm287_vm1 = vcmp.ge.s32.totalorder %v4892_v2, 1  ;;  %vm288_vm2 = vcmp.le.s32.totalorder %v4892_v2, 6  ;;  %s6590_s18 = smov (!%p255_p4, %s4805_s18), 1  ;;  %s4826_s15 = smov 121  }
   0xe   : > { %458 = vmatprep.mubr.bf16.mxu0 %v4815_v3  ;;  %499 = vmatprep.mubr.bf16.mxu1 %v4815_v3  ;;  %v297_v4 = vshrl.u32 %v296_v1, 7  ;;  %vm290_vm3 = vcmp.le.s32.totalorder %v4886_v0, 6  ;;  %v338_v5 = vsel %vm289_vm0, 1, %v4815_v3  ;;  %vm294_vm4 = vmand %vm289_vm0, %vm287_vm1  ;;  %v806_v12 = vsel %vm287_vm1, 1, %v4815_v3  ;;  %s4733_s10 = smul.u32 24, %s6590_s18  ;;  %s4827_s16 = smov 127  }
   0xf   : > { %4776 = vset.pattern.permute.xlu0 %v4815_v3  ;;  %v295_v8 = vsel %vm294_vm4, 1, %v4815_v3  ;;  %vm633_vm5 = vmand %vm289_vm0, %vm288_vm2  ;;  %v4927_v13 = vsel %vm288_vm2, 1, %v4815_v3  ;;  %v1450_v56 = vsel %vm290_vm3, 1, %v4815_v3  ;;  %s4828_s17 = smov 64   ;;  %s4829_s22 = smov 1  }
  0x10   : > { %v4907_v6 = vsub.s32 0, %v297_v4  ;;  %v4909_v7 = vsub.s32 1, %v297_v4  ;;  %v4912_v9 = vsub.s32 2, %v297_v4  ;;  %v4918_v10 = vsub.s32 3, %v297_v4  ;;  %vm4945_vm10 = vmand %vm290_vm3, %vm287_vm1  ;;  %s5224_s14 = scalar_lea.vmem %s6389_s0, %s4733_s10  ;;  %s4830_s23 = smov 7  }
  0x11   : > { %v634_v11 = vsel %vm633_vm5, 1, %v4815_v3  ;;  %v1280_v55 = vsel %vm4945_vm10, 1, %v4815_v3  ;;  %s4831_s24 = smov 8   ;;  %s4832_s25 = smov 9  }
  0x12   : > { %v342_v14 = vrot.slane %v338_v5, %v4907_v6  ;;  %v346_v15 = vrot.slane %v338_v5, %v4909_v7  ;;  %v299_v16 = vrot.slane %v295_v8, %v4907_v6  ;;  %v303_v17 = vrot.slane %v295_v8, %v4909_v7 }
  0x13   : > { %v350_v18 = vrot.slane %v338_v5, %v4912_v9  ;;  %v354_v19 = vrot.slane %v338_v5, %v4918_v10  ;;  %v307_v20 = vrot.slane %v295_v8, %v4912_v9  ;;  %v311_v21 = vrot.slane %v295_v8, %v4918_v10 }
  0x14   : > { %vm355_vm6 = vcmp.eq.s32.totalorder %v342_v14, 1  ;;  %vm356_vm7 = vcmp.eq.s32.totalorder %v346_v15, 1  ;;  %vm4937_vm8 = vcmp.eq.s32.totalorder %v299_v16, 1  ;;  %vm313_vm9 = vcmp.eq.s32.totalorder %v303_v17, 1 }
  0x15   : > { %vm359_vm11 = vmpackc.low %vm356_vm7, %vm355_vm6  ;;  %vm4949_vm12 = vcmp.eq.s32.totalorder %v350_v18, 1  ;;  %vm4953_vm13 = vcmp.eq.s32.totalorder %v354_v19, 1  ;;  %vm4957_vm14 = vcmp.eq.s32.totalorder %v307_v20, 1  ;;  %vm4961_vm15 = vcmp.eq.s32.totalorder %v311_v21, 1 }
  0x16   : > { %v4966_v28 = vsel %vm359_vm11, 65537, %v4815_v3  ;;  %vm316_vm0 = vmpackc.low %vm313_vm9, %vm4937_vm8  ;;  %v638_v29 = vrot.slane %v634_v11, %v4907_v6  ;;  %v642_v30 = vrot.slane %v634_v11, %v4909_v7  ;;  %v646_v31 = vrot.slane %v634_v11, %v4912_v9 }
  0x17   : > { %363 = vrot.lane.b32.xlu0 %v4966_v28, %s4816_s26  ;;  %v4976_v32 = vsel %vm316_vm0, 65537, %v4815_v3  ;;  %vm360_vm1 = vmpackc.low %vm4953_vm13, %vm4949_vm12  ;;  %v650_v33 = vrot.slane %v634_v11, %v4918_v10  ;;  %v810_v34 = vrot.slane %v806_v12, %v4907_v6  ;;  %v814_v35 = vrot.slane %v806_v12, %v4909_v7 }
  0x18   : > { %320 = vrot.lane.b32.xlu1 %v4976_v32, %s4817_s27  ;;  %v4988_v36 = vsel %vm360_vm1, 65537, %v4815_v3  ;;  %vm317_vm4 = vmpackc.low %vm4961_vm15, %vm4957_vm14  ;;  %vm4994_vm5 = vcmp.eq.s32.totalorder %v638_v29, 1  ;;  %vm4998_vm6 = vcmp.eq.s32.totalorder %v642_v30, 1  ;;  %vm5002_vm7 = vcmp.eq.s32.totalorder %v646_v31, 1  ;;  %v5231_v29 = vld [vmem:[%s5224_s14] sm:$0xff]  ;;  %v5242_v31 = vld [vmem:[%s5224_s14 + $0x8] sm:$0xff] }
  0x19   : > { %v5007_v40 = vsel %vm317_vm4, 65537, %v4815_v3  ;;  %vm655_vm8 = vmpackc.low %vm4998_vm6, %vm4994_vm5  ;;  %vm5013_vm9 = vcmp.eq.s32.totalorder %v650_v33, 1  ;;  %vm5017_vm11 = vcmp.eq.s32.totalorder %v810_v34, 1  ;;  %vm5025_vm13 = vcmp.eq.s32.totalorder %v814_v35, 1  ;;  %v5251_v34 = vld [vmem:[%s5224_s14 + $0x10] sm:$0xf] }
  0x1a   : > { %vm656_vm12 = vmpackc.low %vm5013_vm9, %vm5002_vm7  ;;  %v818_v44 = vrot.slane %v806_v12, %v4912_v9  ;;  %v822_v45 = vrot.slane %v806_v12, %v4918_v10  ;;  %v1113_v46 = vrot.slane %v4927_v13, %v4907_v6  ;;  %v1117_v47 = vrot.slane %v4927_v13, %v4909_v7 }
  0x1b   : > { %365 = vrot.lane.b32.xlu0 %v4988_v36, %s4816_s26  ;;  %v1121_v48 = vrot.slane %v4927_v13, %v4912_v9  ;;  %v1125_v49 = vrot.slane %v4927_v13, %v4918_v10  ;;  %v5044_v50 = vsel %vm655_vm8, 65537, %v4815_v3  ;;  %v5055_v53 = vsel %vm656_vm12, 65537, %v4815_v3  ;;  %vm827_vm0 = vmpackc.low %vm5025_vm13, %vm5017_vm11 }
  0x1c   : > { %322 = vrot.lane.b32.xlu1 %v5007_v40, %s4817_s27  ;;  %vm5046_vm14 = vcmp.eq.s32.totalorder %v818_v44, 1  ;;  %vm5050_vm15 = vcmp.eq.s32.totalorder %v822_v45, 1  ;;  %vm5061_vm1 = vcmp.eq.s32.totalorder %v1113_v46, 1  ;;  %vm5075_vm5 = vcmp.eq.s32.totalorder %v1117_v47, 1  ;;  %vm1620_vm7 = vmand %vm290_vm3, %vm288_vm2 }
  0x1d   : > { %vm828_vm4 = vmpackc.low %vm5050_vm15, %vm5046_vm14  ;;  %v1284_v58 = vrot.slane %v1280_v55, %v4907_v6  ;;  %v1288_v59 = vrot.slane %v1280_v55, %v4909_v7  ;;  %v1292_v60 = vrot.slane %v1280_v55, %v4912_v9  ;;  %vm5084_vm10 = vcmp.eq.s32.totalorder %v1121_v48, 1 }
  0x1e   : > { %vm5088_vm6 = vcmp.eq.s32.totalorder %v1125_v49, 1  ;;  %v1296_v63 = vrot.slane %v1280_v55, %v4918_v10  ;;  %v5096_v1 = vsel %vm827_vm0, 65537, %v4815_v3  ;;  %v5103_v4 = vsel %vm828_vm4, 65537, %v4815_v3  ;;  %vm1130_vm8 = vmpackc.low %vm5075_vm5, %vm5061_vm1 }
  0x1f   : > { %659 = vrot.lane.b32.xlu0 %v5044_v50, %s4818_s28  ;;  %v1454_v5 = vrot.slane %v1450_v56, %v4907_v6  ;;  %vm1131_vm9 = vmpackc.low %vm5088_vm6, %vm5084_vm10  ;;  %vm5114_vm11 = vcmp.eq.s32.totalorder %v1284_v58, 1  ;;  %vm5118_vm2 = vcmp.eq.s32.totalorder %v1288_v59, 1  ;;  %vm5122_vm3 = vcmp.eq.s32.totalorder %v1292_v60, 1  ;;  %v4577_v59 = vld [vmem:[%s6390_s1 + $0x30] sm:$0xf] }
  0x20   : > { %661 = vrot.lane.b32.xlu1 %v5055_v53, %s4818_s28  ;;  %v1458_v11 = vrot.slane %v1450_v56, %v4909_v7  ;;  %vm5129_vm12 = vcmp.eq.s32.totalorder %v1296_v63, 1  ;;  %v1462_v13 = vrot.slane %v1450_v56, %v4912_v9  ;;  %v1466_v14 = vrot.slane %v1450_v56, %v4918_v10  ;;  %vm1301_vm13 = vmpackc.low %vm5118_vm2, %vm5114_vm11 }
  0x21   : > { %v1621_v15 = vsel %vm1620_vm7, 1, %v4815_v3  ;;  %v5139_v16 = vsel %vm1130_vm8, 65537, %v4815_v3  ;;  %v5142_v17 = vsel %vm1131_vm9, 65537, %v4815_v3  ;;  %vm1302_vm14 = vmpackc.low %vm5129_vm12, %vm5122_vm3  ;;  %vm5152_vm15 = vcmp.eq.s32.totalorder %v1454_v5, 1 }
  0x22   : > { %vm5156_vm0 = vcmp.eq.s32.totalorder %v1458_v11, 1  ;;  %v1625_v20 = vrot.slane %v1621_v15, %v4907_v6  ;;  %v1629_v21 = vrot.slane %v1621_v15, %v4909_v7  ;;  %vm5164_vm1 = vcmp.eq.s32.totalorder %v1462_v13, 1 }
  0x23   : > { %831 = vrot.lane.b32.xlu0 %v5096_v1, %s4819_s29  ;;  %vm5168_vm4 = vcmp.eq.s32.totalorder %v1466_v14, 1  ;;  %v1633_v24 = vrot.slane %v1621_v15, %v4912_v9  ;;  %v1637_v25 = vrot.slane %v1621_v15, %v4918_v10  ;;  %v1303_v6 = vsel %vm1301_vm13, 65537, %v4815_v3  ;;  %vm1471_vm5 = vmpackc.low %vm5156_vm0, %vm5152_vm15 }
  0x24   : > { %833 = vrot.lane.b32.xlu1 %v5103_v4, %s4819_s29  ;;  %v1304_v7 = vsel %vm1302_vm14, 65537, %v4815_v3  ;;  %vm1472_vm10 = vmpackc.low %vm5168_vm4, %vm5164_vm1  ;;  %vm1638_vm6 = vcmp.eq.s32.totalorder %v1625_v20, 1  ;;  %vm1639_vm7 = vcmp.eq.s32.totalorder %v1629_v21, 1  ;;  %v5189_v9 = vsel %vm1471_vm5, 65537, %v4815_v3 }
  0x25   : > { %vm1640_vm8 = vcmp.eq.s32.totalorder %v1633_v24, 1  ;;  %vm1641_vm9 = vcmp.eq.s32.totalorder %v1637_v25, 1  ;;  %v5192_v10 = vsel %vm1472_vm10, 65537, %v4815_v3  ;;  %vm1642_vm11 = vmpackc.low %vm1639_vm7, %vm1638_vm6  ;;  %v4499_v30 = vcombine.high %v5231_v29, %v5231_v29 }
  0x26   : > { %vm1643_vm2 = vmpackc.low %vm1641_vm9, %vm1640_vm8  ;;  %v5199_v26 = vsel %vm1642_vm11, 65537, %v4815_v3  ;;  %v4501_v33 = vcombine.high %v5242_v31, %v5242_v31  ;;  %v4502_v35 = vcombine.low %v5251_v34, %v5251_v34  ;;  %vm6412_vm15 = vcmask 457728  }
  0x27   : > { %1134 = vrot.lane.b32.xlu0 %v5139_v16, %s4820_s30  ;;  %v5202_v27 = vsel %vm1643_vm2, 65537, %v4815_v3  ;;  %vm6406_vm1 = vcmask 449536   ;;  %vm6414_vm10 = vcmask 465920   ;;  %vm6415_vm9 = vcmask 515072  }
  0x28   : > { %1136 = vrot.lane.b32.xlu1 %v5142_v17, %s4820_s30  ;;  %vm6417_vm2 = vcmask 531456  }
  0x2b   : > { %1305 = vrot.lane.b32.xlu0 %v1303_v6, %s4821_s6 }
  0x2c   : > { %1307 = vrot.lane.b32.xlu1 %v1304_v7, %s4821_s6 }
  0x2f   : > { %1475 = vrot.lane.b32.xlu0 %v5189_v9, %s4822_s7 }
  0x30   : > { %1477 = vrot.lane.b32.xlu1 %v5192_v10, %s4822_s7 }
  0x33   : > { %1646 = vrot.lane.b32.xlu0 %v5199_v26, %s4823_s8 }
  0x34   : > { %1648 = vrot.lane.b32.xlu1 %v5202_v27, %s4823_s8 }
  0x37   : > { %1793 = vrot.lane.b32.xlu0 %v5007_v40, %s4824_s9 }
  0x38   : > { %1791 = vrot.lane.b32.xlu1 %v4976_v32, %s4824_s9  ;;  %v4500_v32 = vcombine.low %v5242_v31, %v5242_v31 }
  0x3b   : > { %1938 = vrot.lane.b32.xlu0 %v4966_v28, %s4825_s11  ;;  %v4498_v28 = vcombine.low %v5231_v29, %v5231_v29 }
  0x3c   : > { %1940 = vrot.lane.b32.xlu1 %v4988_v36, %s4825_s11 }
  0x3f   : > { %2087 = vrot.lane.b32.xlu0 %v5055_v53, %s4826_s15 }
  0x40   : > { %2085 = vrot.lane.b32.xlu1 %v5044_v50, %s4826_s15 }
  0x43   : > { %2232 = vrot.lane.b32.xlu0 %v5096_v1, %s4827_s16 }
  0x44   : > { %2234 = vrot.lane.b32.xlu1 %v5103_v4, %s4827_s16 }
  0x47   : > { %993 = vrot.lane.b32.xlu0 %v4498_v28, %s4828_s17 }
  0x48   : > { %995 = vrot.lane.b32.xlu1 %v4499_v30, %s4828_s17 }
  0x4b   : > { %997 = vrot.lane.b32.xlu0 %v4500_v32, %s4828_s17 }
  0x4c   : > { %999 = vrot.lane.b32.xlu1 %v4501_v33, %s4828_s17 }
  0x4f   : > { %1001 = vrot.lane.b32.xlu0 %v4502_v35, %s4828_s17 }
  0x50   : > { %2499 = vrot.lane.b32.xlu1 %v5142_v17, %s4829_s22 }
  0x53   : > { %2497 = vrot.lane.b32.xlu0 %v5139_v16, %s4829_s22 }
  0x54   : > { %2642 = vrot.lane.b32.xlu1 %v1303_v6, %s4830_s23 }
  0x57   : > { %2644 = vrot.lane.b32.xlu0 %v1304_v7, %s4830_s23 }
  0x89   : > { %v5264_v36 = vpop.permute.xlu0 %363 }
  0x8a   : > { %v5266_v37 = vpop.permute.xlu1 %320  ;;  %v367_v60 = vrot.slane %v5264_v36, 4 }
  0x8b   : > { %v324_v2 = vrot.slane %v5266_v37, 4 }
  0x8c   : > { %v5341_v5 = vsel %vm6412_vm15, %v367_v60, %v5264_v36 }
  0x8d   : > { %v5268_v38 = vpop.permute.xlu0 %365  ;;  %vm6396_vm4 = vcmp.ne.s16.totalorder %v5341_v5, 0  ;;  %v5362_v14 = vsel %vm6406_vm1, %v324_v2, %v5266_v37 }
  0x8e   : > { %v5270_v39 = vpop.permute.xlu1 %322  ;;  %v368_v41 = vrot.slane %v5268_v38, 4  ;;  %v376_v19 = vsel %vm6396_vm4, %v5231_v29, 0  ;;  %vm6398_vm6 = vcmp.ne.s16.totalorder %v5362_v14, 0  ;;  %vm6399_vm4 = vcmask 580608  }
  0x8f   : > { %v325_v40 = vrot.slane %v5270_v39, 4  ;;  %v4459_v25 = vcombine.low %v376_v19, %v376_v19  ;;  %v334_v6 = vsel %vm6398_vm6, %v5231_v29, 0  ;;  %v4460_v33 = vcombine.high %v376_v19, %v376_v19 }
  0x90   : > { %vm5284_vm12 = vcmp.ne.s16.totalorder %v368_v41, 0  ;;  %v4469_v35 = vcombine.high %v334_v6, %v334_v6  ;;  %vm6423_vm6 = vcmask 588800  }
  0x91   : > { %vm5278_vm3 = vcmp.ne.s16.totalorder %v325_v40, 0  ;;  %v378_v49 = vsel %vm5284_vm12, %v5251_v34, 0  ;;  %v5312_v56 = vpop.permute.xlu0 %659 }
  0x92   : > { %v5274_v42 = vpop.permute.xlu1 %661  ;;  %v336_v47 = vsel %vm5278_vm3, %v5251_v34, 0  ;;  %v4463_v50 = vcombine.low %v378_v49, %v378_v49  ;;  %v663_v15 = vrot.slane %v5312_v56, 4 }
  0x93   : > { %v664_v46 = vrot.slane %v5274_v42, 4  ;;  %v4472_v48 = vcombine.low %v336_v47, %v336_v47 }
  0x94   : > { %402 = vrot.lane.b32.xlu0 %v4463_v50, %s4822_s7  ;;  %v5377_v20 = vsel %vm6414_vm10, %v663_v15, %v5312_v56 }
  0x95   : > { %529 = vrot.lane.b32.xlu1 %v4472_v48, %s4823_s8  ;;  %vm5301_vm13 = vcmp.ne.s16.totalorder %v664_v46, 0  ;;  %v5333_v1 = vpop.permute.xlu0 %831  ;;  %vm6395_vm8 = vcmp.ne.s16.totalorder %v5377_v20, 0 }
  0x96   : > { %v5288_v45 = vpop.permute.xlu1 %833  ;;  %v674_v53 = vsel %vm5301_vm13, %v5251_v34, 0  ;;  %v835_v22 = vrot.slane %v5333_v1, 4  ;;  %v672_v30 = vsel %vm6395_vm8, %v5231_v29, 0 }
  0x97   : > { %v4482_v54 = vcombine.low %v674_v53, %v674_v53  ;;  %v836_v55 = vrot.slane %v5288_v45, 4  ;;  %v4478_v48 = vcombine.low %v672_v30, %v672_v30 }
  0x98   : > { %v5399_v7 = vsel %vm6415_vm9, %v835_v22, %v5333_v1 }
  0x99   : > { %698 = vrot.lane.b32.xlu0 %v4482_v54, %s4821_s6  ;;  %vm5319_vm14 = vcmp.ne.s16.totalorder %v836_v55, 0  ;;  %v5368_v17 = vpop.permute.xlu0 %1134  ;;  %vm6397_vm11 = vcmp.ne.s16.totalorder %v5399_v7, 0  ;;  %v4468_v54 = vcombine.low %v334_v6, %v334_v6 }
  0x9a   : > { %v5305_v52 = vpop.permute.xlu1 %1136  ;;  %v846_v61 = vsel %vm5319_vm14, %v5251_v34, 0  ;;  %v1138_v32 = vrot.slane %v5368_v17, 4  ;;  %v844_v49 = vsel %vm6397_vm11, %v5231_v29, 0 }
  0x9b   : > { %v1139_v57 = vrot.slane %v5305_v52, 4  ;;  %v4492_v62 = vcombine.low %v846_v61, %v846_v61 }
  0x9c   : > { %v5412_v47 = vsel %vm6417_vm2, %v1138_v32, %v5368_v17 }
  0x9d   : > { %vm5329_vm0 = vcmp.ne.s16.totalorder %v1139_v57, 0  ;;  %870 = vrot.lane.b32.xlu1 %v4492_v62, %s4820_s30  ;;  %v5401_v28 = vpop.permute.xlu0 %1305  ;;  %vm6400_vm8 = vcmp.ne.s16.totalorder %v5412_v47, 0  ;;  %v4489_v62 = vcombine.high %v844_v49, %v844_v49 }
  0x9e   : > { %v5315_v58 = vpop.permute.xlu1 %1307  ;;  %v1148_v0 = vsel %vm5329_vm0, %v5251_v34, 0  ;;  %v1309_v50 = vrot.slane %v5401_v28, 4 }
  0x9f   : > { %v1310_v4 = vrot.slane %v5315_v58, 4  ;;  %v4512_v11 = vcombine.low %v1148_v0, %v1148_v0  ;;  %v1146_v0 = vsel %vm6400_vm8, %v5231_v29, 0 }
  0xa0   : > { %v5425_v61 = vsel %vm6399_vm4, %v1309_v50, %v5401_v28  ;;  %vm328_vm4 = vcmask 1043456  }
  0xa1   : > { %1172 = vrot.lane.b32.xlu1 %v4512_v11, %s4819_s29  ;;  %vm5354_vm5 = vcmp.ne.s16.totalorder %v1310_v4, 0  ;;  %v5421_v53 = vpop.permute.xlu0 %1475  ;;  %vm6401_vm11 = vcmp.ne.s16.totalorder %v5425_v61, 0  ;;  %v329_v36 = vsel %vm328_vm4, %v324_v2, %v325_v40  ;;  %v667_v37 = vsel %vm328_vm4, %v663_v15, %v664_v46 }
  0xa2   : > { %v5347_v8 = vpop.permute.xlu1 %1477  ;;  %v1319_v16 = vsel %vm5354_vm5, %v5251_v34, 0  ;;  %v1479_v11 = vrot.slane %v5421_v53, 4  ;;  %v1317_v19 = vsel %vm6401_vm11, %v5231_v29, 0  ;;  %v839_v46 = vsel %vm328_vm4, %v835_v22, %v836_v55 }
  0xa3   : > { %v1480_v12 = vrot.slane %v5347_v8, 4  ;;  %v4522_v18 = vcombine.low %v1319_v16, %v1319_v16  ;;  %v4479_v16 = vcombine.high %v672_v30, %v672_v30  ;;  %v4519_v30 = vcombine.high %v1317_v19, %v1317_v19 }
  0xa4   : > { %v5436_v17 = vsel %vm6423_vm6, %v1479_v11, %v5421_v53  ;;  %v1141_v55 = vsel %vm328_vm4, %v1138_v32, %v1139_v57  ;;  %v1312_v57 = vsel %vm328_vm4, %v1309_v50, %v1310_v4 }
  0xa5   : > { %1343 = vrot.lane.b32.xlu0 %v4522_v18, %s4818_s28  ;;  %vm5383_vm7 = vcmp.ne.s16.totalorder %v1480_v12, 0  ;;  %v4509_v18 = vcombine.high %v1146_v0, %v1146_v0  ;;  %vm6402_vm8 = vcmp.ne.s16.totalorder %v5436_v17, 0  ;;  %v1482_v4 = vsel %vm328_vm4, %v1479_v11, %v1480_v12 }
  0xa6   : > { %v1489_v23 = vsel %vm5383_vm7, %v5251_v34, 0  ;;  %v1487_v28 = vsel %vm6402_vm8, %v5231_v29, 0 }
  0xa7   : > { %v4532_v24 = vcombine.low %v1489_v23, %v1489_v23  ;;  %v371_v23 = vsel %vm328_vm4, %v367_v60, %v368_v41  ;;  %v4508_v41 = vcombine.low %v1146_v0, %v1146_v0  ;;  %v4529_v60 = vcombine.high %v1487_v28, %v1487_v28 }
  0xa8   : > { %v5453_v6 = vsel %vm6412_vm15, %v371_v23, %v5268_v38  ;;  %v5468_v38 = vsel %vm6406_vm1, %v329_v36, %v5270_v39  ;;  %v5483_v39 = vsel %vm6414_vm10, %v667_v37, %v5274_v42  ;;  %v4528_v2 = vcombine.low %v1487_v28, %v1487_v28 }
  0xa9   : > { %1513 = vrot.lane.b32.xlu1 %v4532_v24, %s4816_s26  ;;  %394 = vrot.lane.b32.xlu0 %v4459_v25, %s4822_s7  ;;  %v4488_v24 = vcombine.low %v844_v49, %v844_v49  ;;  %v4518_v25 = vcombine.low %v1317_v19, %v1317_v19  ;;  %vm6403_vm11 = vcmp.ne.s16.totalorder %v5453_v6, 0  ;;  %vm6404_vm8 = vcmp.ne.s16.totalorder %v5468_v38, 0 }
  0xaa   : > { %v377_v40 = vsel %vm6403_vm11, %v5242_v31, 0  ;;  %v335_v15 = vsel %vm6404_vm8, %v5242_v31, 0  ;;  %vm6405_vm11 = vcmp.ne.s16.totalorder %v5483_v39, 0  ;;  %v5498_v42 = vsel %vm6415_vm9, %v839_v46, %v5288_v45 }
  0xab   : > { %v4461_v56 = vcombine.low %v377_v40, %v377_v40  ;;  %v4471_v1 = vcombine.high %v335_v15, %v335_v15  ;;  %v4462_v22 = vcombine.high %v377_v40, %v377_v40  ;;  %vm6407_vm8 = vcmp.ne.s16.totalorder %v5498_v42, 0 }
  0xac   : > { %v5511_v45 = vsel %vm6417_vm2, %v1141_v55, %v5305_v52  ;;  %vm6491_vm1 = vcmask 580608   ;;  %vm6418_vm10 = vcmask 982016  }
  0xad   : > { %396 = vrot.lane.b32.xlu1 %v4460_v33, %s4822_s7  ;;  %523 = vrot.lane.b32.xlu0 %v4469_v35, %s4823_s8  ;;  %v673_v33 = vsel %vm6405_vm11, %v5242_v31, 0  ;;  %v4470_v35 = vcombine.low %v335_v15, %v335_v15  ;;  %vm6408_vm11 = vcmp.ne.s16.totalorder %v5511_v45, 0  ;;  %v5524_v52 = vsel %vm6491_vm1, %v1312_v57, %v5315_v58 }
  0xae   : > { %v4480_v32 = vcombine.low %v673_v33, %v673_v33  ;;  %v4481_v50 = vcombine.high %v673_v33, %v673_v33  ;;  %v1147_v53 = vsel %vm6408_vm11, %v5242_v31, 0  ;;  %v5537_v58 = vsel %vm6423_vm6, %v1482_v4, %v5347_v8 }
  0xaf   : > { %v4511_v0 = vcombine.high %v1147_v53, %v1147_v53  ;;  %vm6410_vm1 = vcmp.ne.s16.totalorder %v5537_v58, 0  ;;  %vm6424_vm11 = vcmask 596992   ;;  %v4510_v23 = vcombine.low %v1147_v53, %v1147_v53 }
  0xb1   : > { %690 = vrot.lane.b32.xlu0 %v4478_v48, %s4821_s6  ;;  %521 = vrot.lane.b32.xlu1 %v4468_v54, %s4823_s8  ;;  %v845_v48 = vsel %vm6407_vm8, %v5242_v31, 0  ;;  %vm6409_vm8 = vcmp.ne.s16.totalorder %v5524_v52, 0  ;;  %v1647_v54 = vpop.permute.xlu0 %1646 }
  0xb2   : > { %v4491_v49 = vcombine.high %v845_v48, %v845_v48  ;;  %v4490_v12 = vcombine.low %v845_v48, %v845_v48  ;;  %v1318_v11 = vsel %vm6409_vm8, %v5242_v31, 0 }
  0xb3   : > { %v4520_v19 = vcombine.low %v1318_v11, %v1318_v11 }
  0xb5   : > { %864 = vrot.lane.b32.xlu0 %v4489_v62, %s4820_s30  ;;  %692 = vrot.lane.b32.xlu1 %v4479_v16, %s4821_s6  ;;  %v1649_v62 = vpop.permute.xlu1 %1648  ;;  %v1650_v16 = vrot.slane %v1647_v54, 4  ;;  %v5545_v8 = vpop.permute.xlu0 %1793 }
  0xb6   : > { %v1796_v33 = vrot.slane %v5545_v8, 4 }
  0xb9   : > { %1166 = vrot.lane.b32.xlu0 %v4509_v18, %s4819_s29  ;;  %862 = vrot.lane.b32.xlu1 %v4488_v24, %s4820_s30  ;;  %v1651_v18 = vrot.slane %v1649_v62, 4  ;;  %v1488_v24 = vsel %vm6410_vm1, %v5242_v31, 0  ;;  %v1939_v37 = vpop.permute.xlu0 %1938 }
  0xba   : > { %v4531_v36 = vcombine.high %v1488_v24, %v1488_v24  ;;  %v4530_v46 = vcombine.low %v1488_v24, %v1488_v24  ;;  %v1942_v53 = vrot.slane %v1939_v37, 4 }
  0xbb   : > { %v1653_v28 = vsel %vm328_vm4, %v1650_v16, %v1651_v18  ;;  %vm5577_vm15 = vcmp.ne.s16.totalorder %v1651_v18, 0 }
  0xbd   : > { %1335 = vrot.lane.b32.xlu0 %v4518_v25, %s4818_s28  ;;  %1164 = vrot.lane.b32.xlu1 %v4508_v41, %s4819_s29  ;;  %v5551_v25 = vsel %vm6424_vm11, %v1650_v16, %v1647_v54  ;;  %v4521_v41 = vcombine.high %v1318_v11, %v1318_v11  ;;  %v5572_v15 = vpop.permute.xlu0 %2087 }
  0xbe   : > { %vm6411_vm8 = vcmp.ne.s16.totalorder %v5551_v25, 0 }
  0xbf   : > { %v1658_v40 = vsel %vm6411_vm8, %v5231_v29, 0  ;;  %vm6416_vm8 = vcmask 973824  }
  0xc0   : > { %v4539_v57 = vcombine.high %v1658_v40, %v1658_v40 }
  0xc1   : > { %1507 = vrot.lane.b32.xlu0 %v4529_v60, %s4816_s26  ;;  %1337 = vrot.lane.b32.xlu1 %v4519_v30, %s4818_s28  ;;  %v5558_v60 = vsel %vm6424_vm11, %v1653_v28, %v1649_v62  ;;  %v1792_v30 = vpop.permute.xlu1 %1791 }
  0xc2   : > { %vm6413_vm1 = vcmp.ne.s16.totalorder %v5558_v60, 0 }
  0xc5   : > { %398 = vrot.lane.b32.xlu0 %v4461_v56, %s4822_s7  ;;  %1505 = vrot.lane.b32.xlu1 %v4528_v2, %s4816_s26  ;;  %v4538_v56 = vcombine.low %v1658_v40, %v1658_v40  ;;  %v1659_v2 = vsel %vm6413_vm1, %v5242_v31, 0  ;;  %v1941_v55 = vpop.permute.xlu1 %1940 }
  0xc9   : > { %527 = vrot.lane.b32.xlu0 %v4471_v1, %s4823_s8  ;;  %400 = vrot.lane.b32.xlu1 %v4462_v22, %s4822_s7  ;;  %v4540_v1 = vcombine.low %v1659_v2, %v1659_v2  ;;  %v2086_v48 = vpop.permute.xlu1 %2085 }
  0xca   : > { %v2089_v40 = vrot.slane %v2086_v48, 4 }
  0xcd   : > { %694 = vrot.lane.b32.xlu0 %v4480_v32, %s4821_s6  ;;  %525 = vrot.lane.b32.xlu1 %v4470_v35, %s4823_s8  ;;  %v1660_v35 = vsel %vm5577_vm15, %v5251_v34, 0 }
  0xd1   : > { %868 = vrot.lane.b32.xlu0 %v4491_v49, %s4820_s30  ;;  %696 = vrot.lane.b32.xlu1 %v4481_v50, %s4821_s6  ;;  %v4542_v49 = vcombine.low %v1660_v35, %v1660_v35  ;;  %v4541_v50 = vcombine.high %v1659_v2, %v1659_v2 }
  0xd5   : > { %1170 = vrot.lane.b32.xlu0 %v4511_v0, %s4819_s29  ;;  %866 = vrot.lane.b32.xlu1 %v4490_v12, %s4820_s30  ;;  %v1943_v0 = vrot.slane %v1941_v55, 4  ;;  %v5596_v12 = vpop.permute.xlu1 %2234 }
  0xd9   : > { %1339 = vrot.lane.b32.xlu0 %v4520_v19, %s4818_s28  ;;  %1168 = vrot.lane.b32.xlu1 %v4510_v23, %s4819_s29  ;;  %v1945_v19 = vsel %vm6418_vm10, %v1942_v53, %v1939_v37  ;;  %v1946_v23 = vsel %vm328_vm4, %v1942_v53, %v1943_v0  ;;  %v5609_v24 = vpop.permute.xlu1 %995 }
  0xdd   : > { %1511 = vrot.lane.b32.xlu0 %v4531_v36, %s4816_s26  ;;  %1341 = vrot.lane.b32.xlu1 %v4521_v41, %s4818_s28 }
  0xe1   : > { %2787 = vrot.lane.b32.xlu0 %v5189_v9, %s4831_s24  ;;  %1509 = vrot.lane.b32.xlu1 %v4530_v46, %s4816_s26  ;;  %v1795_v9 = vrot.slane %v1792_v30, 4  ;;  %v5619_v46 = vpop.permute.xlu1 %999 }
  0xe3   : > { %v1798_v32 = vsel %vm6416_vm8, %v1795_v9, %v1792_v30  ;;  %v1799_v4 = vsel %vm328_vm4, %v1795_v9, %v1796_v33  ;;  %v2090_v30 = vrot.slane %v5572_v15, 4 }
  0xe4   : > { %vm1801_vm1 = vcmp.ne.s16.totalorder %v1798_v32, 0  ;;  %v1800_v62 = vsel %vm6416_vm8, %v1799_v4, %v5545_v8  ;;  %vm1803_vm8 = vcmp.ne.s16.totalorder %v1796_v33, 0 }
  0xe5   : > { %1676 = vrot.lane.b32.xlu0 %v4538_v56, %s4817_s27  ;;  %2789 = vrot.lane.b32.xlu1 %v5192_v10, %s4831_s24  ;;  %v5588_v10 = vpop.permute.xlu0 %2232  ;;  %v1804_v54 = vsel %vm1801_vm1, %v5231_v29, 0  ;;  %vm1802_vm9 = vcmp.ne.s16.totalorder %v1800_v62, 0  ;;  %vm1948_vm1 = vcmp.ne.s16.totalorder %v1945_v19, 0  ;;  %v1806_v37 = vsel %vm1803_vm8, %v5251_v34, 0  ;;  %v5629_v4 = vpop.permute.xlu1 %2499 }
  0xe6   : > { %v4549_v16 = vcombine.high %v1804_v54, %v1804_v54  ;;  %v4548_v18 = vcombine.low %v1804_v54, %v1804_v54  ;;  %v1805_v8 = vsel %vm1802_vm9, %v5242_v31, 0  ;;  %v1951_v41 = vsel %vm1948_vm1, %v5231_v29, 0 }
  0xe7   : > { %v4551_v28 = vcombine.high %v1805_v8, %v1805_v8  ;;  %v4550_v36 = vcombine.low %v1805_v8, %v1805_v8  ;;  %vm6419_vm9 = vcmask 990208   ;;  %v4558_v2 = vcombine.low %v1951_v41, %v1951_v41 }
  0xe8   : > { %vm1950_vm8 = vcmp.ne.s16.totalorder %v1943_v0, 0  ;;  %v2092_v9 = vsel %vm6419_vm9, %v2089_v40, %v2086_v48  ;;  %v2093_v33 = vsel %vm328_vm4, %v2089_v40, %v2090_v30  ;;  %v4559_v32 = vcombine.high %v1951_v41, %v1951_v41 }
  0xe9   : > { %1680 = vrot.lane.b32.xlu0 %v4540_v1, %s4817_s27  ;;  %1678 = vrot.lane.b32.xlu1 %v4539_v57, %s4817_s27  ;;  %v5598_v11 = vpop.permute.xlu0 %993  ;;  %v1953_v35 = vsel %vm1950_vm8, %v5251_v34, 0  ;;  %vm2095_vm1 = vcmp.ne.s16.totalorder %v2092_v9, 0  ;;  %v2094_v53 = vsel %vm6419_vm9, %v2093_v33, %v5572_v15  ;;  %v2237_v48 = vrot.slane %v5596_v12, 4  ;;  %v2643_v19 = vpop.permute.xlu1 %2642 }
  0xea   : > { %v4562_v54 = vcombine.low %v1953_v35, %v1953_v35  ;;  %v2098_v0 = vsel %vm2095_vm1, %v5231_v29, 0  ;;  %vm2096_vm8 = vcmp.ne.s16.totalorder %v2094_v53, 0  ;;  %vm2097_vm1 = vcmp.ne.s16.totalorder %v2090_v30, 0 }
  0xeb   : > { %v4569_v15 = vcombine.high %v2098_v0, %v2098_v0  ;;  %v4568_v8 = vcombine.low %v2098_v0, %v2098_v0  ;;  %v2502_v30 = vrot.slane %v5629_v4, 4 }
  0xed   : > { %1684 = vrot.lane.b32.xlu0 %v4542_v49, %s4817_s27  ;;  %1682 = vrot.lane.b32.xlu1 %v4541_v50, %s4817_s27  ;;  %v2236_v50 = vrot.slane %v5588_v10, 4 }
  0xf1   : > { %2934 = vrot.lane.b32.xlu0 %v5202_v27, %s4832_s25  ;;  %2932 = vrot.lane.b32.xlu1 %v5199_v26, %s4832_s25  ;;  %v5611_v27 = vpop.permute.xlu0 %997  ;;  %v1947_v26 = vsel %vm6418_vm10, %v1946_v23, %v1941_v55  ;;  %v4552_v55 = vcombine.low %v1806_v37, %v1806_v37  ;;  %v2100_v37 = vsel %vm2097_vm1, %v5251_v34, 0  ;;  %vm2126_vm1 = vcmask 56320  }
  0xf2   : > { %vm1949_vm2 = vcmp.ne.s16.totalorder %v1947_v26, 0  ;;  %v2099_v26 = vsel %vm2096_vm8, %v5242_v31, 0  ;;  %vm6421_vm8 = vcmask 7168  }
  0xf3   : > { %v1952_v1 = vsel %vm1949_vm2, %v5242_v31, 0  ;;  %vm6420_vm2 = vcmask 1039360  }
  0xf4   : > { %v4560_v57 = vcombine.low %v1952_v1, %v1952_v1  ;;  %v4561_v62 = vcombine.high %v1952_v1, %v1952_v1 }
  0xf5   : > { %1824 = vrot.lane.b32.xlu0 %v4549_v16, %s4832_s25  ;;  %1822 = vrot.lane.b32.xlu1 %v4548_v18, %s4832_s25  ;;  %v5621_v56 = vpop.permute.xlu0 %1001  ;;  %v2239_v16 = vsel %vm6420_vm2, %v2236_v50, %v5588_v10  ;;  %v2240_v18 = vsel %vm328_vm4, %v2236_v50, %v2237_v48  ;;  %v4570_v10 = vcombine.low %v2099_v26, %v2099_v26 }
  0xf6   : > { %vm2242_vm10 = vcmp.ne.s16.totalorder %v2239_v16, 0 }
  0xf7   : > { %v2245_v41 = vsel %vm2242_vm10, %v5231_v29, 0  ;;  %vm2244_vm10 = vcmp.ne.s16.totalorder %v2237_v48, 0 }
  0xf8   : > { %v4578_v1 = vcombine.low %v2245_v41, %v2245_v41  ;;  %v4579_v50 = vcombine.high %v2245_v41, %v2245_v41  ;;  %v2247_v53 = vsel %vm2244_vm10, %v5251_v34, 0 }
  0xf9   : > { %1828 = vrot.lane.b32.xlu0 %v4551_v28, %s4832_s25  ;;  %1826 = vrot.lane.b32.xlu1 %v4550_v36, %s4832_s25  ;;  %v2498_v49 = vpop.permute.xlu0 %2497  ;;  %v2241_v28 = vsel %vm6420_vm2, %v2240_v18, %v5596_v12  ;;  %v4571_v36 = vcombine.high %v2099_v26, %v2099_v26  ;;  %v4572_v12 = vcombine.low %v2100_v37, %v2100_v37  ;;  %v5697_v37 = vld [vmem:[%s5224_s14 + $0x14] sm:$0xf] }
  0xfa   : > { %vm2243_vm9 = vcmp.ne.s16.totalorder %v2241_v28, 0  ;;  %v4582_v34 = vcombine.low %v2247_v53, %v2247_v53  ;;  %v4140_v21 = vsel %vm5577_vm15, %v5697_v37, 0 }
  0xfb   : > { %v2246_v9 = vsel %vm2243_vm9, %v5242_v31, 0  ;;  %v2646_v31 = vrot.slane %v2643_v19, 4 }
  0xfc   : > { %v4580_v35 = vcombine.low %v2246_v9, %v2246_v9  ;;  %v4581_v16 = vcombine.high %v2246_v9, %v2246_v9 }
  0xfd   : > { %1969 = vrot.lane.b32.xlu0 %v4558_v2, %s4831_s24  ;;  %1830 = vrot.lane.b32.xlu1 %v4552_v55, %s4832_s25  ;;  %v5643_v23 = vpop.permute.xlu0 %2644  ;;  %v2501_v55 = vrot.slane %v2498_v49, 4 }
  0xff   : > { %v2503_v33 = vsel %vm6421_vm8, %v2501_v55, %v2498_v49  ;;  %v2647_v49 = vrot.slane %v5643_v23, 4 }
 0x100   : > { %vm2506_vm9 = vcmp.ne.s16.totalorder %v2503_v33, 0 }
 0x101   : > { %1973 = vrot.lane.b32.xlu0 %v4560_v57, %s4831_s24  ;;  %1971 = vrot.lane.b32.xlu1 %v4559_v32, %s4831_s24  ;;  %v2504_v57 = vsel %vm328_vm4, %v2501_v55, %v2502_v30  ;;  %v2649_v26 = vsel %vm328_vm4, %v2646_v31, %v2647_v49 }
 0x102   : > { %v2505_v48 = vsel %vm6421_vm8, %v2504_v57, %v5629_v4  ;;  %v2648_v4 = vsel %vm2126_vm1, %v2646_v31, %v2643_v19  ;;  %v2650_v19 = vsel %vm2126_vm1, %v2649_v26, %v5643_v23  ;;  %vm2653_vm8 = vcmp.ne.s16.totalorder %v2647_v49, 0 }
 0x103   : > { %vm2507_vm10 = vcmp.ne.s16.totalorder %v2505_v48, 0  ;;  %vm2651_vm2 = vcmp.ne.s16.totalorder %v2648_v4, 0 }
 0x105   : > { %1977 = vrot.lane.b32.xlu0 %v4562_v54, %s4831_s24  ;;  %1975 = vrot.lane.b32.xlu1 %v4561_v62, %s4831_s24  ;;  %v5674_v54 = vld [vmem:[%s5224_s14 + $0x4] sm:$0xff] }
 0x106   : > { %v5654_v2 = vpop.permute.xlu0 %402  ;;  %v2509_v18 = vsel %vm2506_vm9, %v5674_v54, 0  ;;  %vm2508_vm9 = vcmp.ne.s16.totalorder %v2502_v30, 0  ;;  %v2654_v57 = vsel %vm2651_vm2, %v5674_v54, 0  ;;  %vm409_vm2 = vcmask 64512  }
 0x107   : > { %v5652_v40 = vpop.permute.xlu1 %529  ;;  %v2511_v33 = vsel %vm2508_vm9, %v5697_v37, 0  ;;  %v4608_v31 = vcombine.high %v2654_v57, %v2654_v57 }
 0x108   : > { %v4601_v30 = vcombine.low %v2511_v33, %v2511_v33 }
 0x109   : > { %2118 = vrot.lane.b32.xlu0 %v4569_v15, %s4830_s23  ;;  %2116 = vrot.lane.b32.xlu1 %v4568_v8, %s4830_s23  ;;  %v5686_v15 = vld [vmem:[%s5224_s14 + $0xc] sm:$0xff]  ;;  %v4598_v8 = vcombine.high %v2509_v18, %v2509_v18 }
 0x10a   : > { %v2510_v41 = vsel %vm2507_vm10, %v5686_v15, 0  ;;  %vm2652_vm10 = vcmp.ne.s16.totalorder %v2650_v19, 0 }
 0x10b   : > { %v5666_v32 = vpop.permute.xlu0 %698  ;;  %v4599_v9 = vcombine.low %v2510_v41, %v2510_v41  ;;  %v2655_v23 = vsel %vm2652_vm10, %v5686_v15, 0 }
 0x10c   : > { %v4609_v48 = vcombine.low %v2655_v23, %v2655_v23  ;;  %v4610_v4 = vcombine.high %v2655_v23, %v2655_v23  ;;  %v4458_v23 = vld [vmem:[%s6390_s1 + $0x4] sm:$0xf] }
 0x10d   : > { %2122 = vrot.lane.b32.xlu0 %v4571_v36, %s4830_s23  ;;  %2120 = vrot.lane.b32.xlu1 %v4570_v10, %s4830_s23  ;;  %v4597_v10 = vcombine.low %v2509_v18, %v2509_v18  ;;  %v2656_v18 = vsel %vm2653_vm8, %v5697_v37, 0  ;;  %vm6494_vm8 = vcmask 580608  }
 0x10e   : > { %vm6495_vm9 = vmmov %vm6494_vm8 }
 0x10f   : > { %v5660_v29 = vpop.permute.xlu1 %870  ;;  %vm6496_vm10 = vmmov %vm6494_vm8 }
 0x111   : > { %2263 = vrot.lane.b32.xlu0 %v4578_v1, %s4829_s22  ;;  %2124 = vrot.lane.b32.xlu1 %v4572_v12, %s4830_s23  ;;  %v4600_v12 = vcombine.high %v2510_v41, %v2510_v41 }
 0x113   : > { %v5677_v62 = vpop.permute.xlu1 %1172 }
 0x115   : > { %2267 = vrot.lane.b32.xlu0 %v4580_v35, %s4829_s22  ;;  %2265 = vrot.lane.b32.xlu1 %v4579_v50, %s4829_s22  ;;  %v4607_v35 = vcombine.low %v2654_v57, %v2654_v57 }
 0x117   : > { %v5679_v0 = vpop.permute.xlu0 %1343 }
 0x119   : > { %2271 = vrot.lane.b32.xlu0 %v4582_v34, %s4829_s22  ;;  %2269 = vrot.lane.b32.xlu1 %v4581_v16, %s4829_s22 }
 0x11b   : > { %v5689_v28 = vpop.permute.xlu1 %1513  ;;  %v395_v36 = vpop.permute.xlu0 %394 }
 0x11d   : > { %2529 = vrot.lane.b32.xlu0 %v4598_v8, %s4827_s16  ;;  %2527 = vrot.lane.b32.xlu1 %v4597_v10, %s4827_s16  ;;  %v4611_v8 = vcombine.low %v2656_v18, %v2656_v18 }
 0x11f   : > { %v397_v55 = vpop.permute.xlu1 %396  ;;  %v524_v1 = vpop.permute.xlu0 %523 }
 0x121   : > { %2533 = vrot.lane.b32.xlu0 %v4600_v12, %s4827_s16  ;;  %2531 = vrot.lane.b32.xlu1 %v4599_v9, %s4827_s16  ;;  %v405_v9 = vsel %vm6423_vm6, %v395_v36, %v397_v55 }
 0x123   : > { %v691_v50 = vpop.permute.xlu0 %690  ;;  %v522_v53 = vpop.permute.xlu1 %521 }
 0x125   : > { %2672 = vrot.lane.b32.xlu0 %v4607_v35, %s4826_s15  ;;  %2535 = vrot.lane.b32.xlu1 %v4601_v30, %s4827_s16  ;;  %v415_v35 = vsel %vm328_vm4, %v405_v9, 0 }
 0x127   : > { %v5706_v34 = vpop.permute.xlu0 %864  ;;  %v693_v16 = vpop.permute.xlu1 %692 }
 0x129   : > { %2676 = vrot.lane.b32.xlu0 %v4609_v48, %s4826_s15  ;;  %2674 = vrot.lane.b32.xlu1 %v4608_v31, %s4826_s15 }
 0x12b   : > { %v5711_v26 = vpop.permute.xlu0 %1166  ;;  %v863_v49 = vpop.permute.xlu1 %862 }
 0x12d   : > { %2680 = vrot.lane.b32.xlu0 %v4611_v8, %s4826_s15  ;;  %2678 = vrot.lane.b32.xlu1 %v4610_v4, %s4826_s15  ;;  %v532_v4 = vsel %vm6424_vm11, %v522_v53, %v524_v1 }
 0x12f   : > { %v5715_v10 = vpop.permute.xlu0 %1335  ;;  %v5717_v41 = vpop.permute.xlu1 %1164 }
 0x133   : > { %v5719_v19 = vpop.permute.xlu0 %1507  ;;  %v5721_v12 = vpop.permute.xlu1 %1337 }
 0x137   : > { %v399_v33 = vpop.permute.xlu0 %398  ;;  %v5724_v57 = vpop.permute.xlu1 %1505 }
 0x138   : > { %v406_v30 = vsel %vm6423_vm6, %v397_v55, %v399_v33 }
 0x139   : > { %4464 = vmatprep.subr.msk.bf16.mxu0 %vm328_vm4, %v406_v30 }
 0x13a   : > { %441 = vmatpush1.bf16.msra.mxu0 %v415_v35  ;;  %v540_v35 = vsel %vm328_vm4, %v532_v4, 0 }
 0x13b   : > { %v528_v31 = vpop.permute.xlu0 %527  ;;  %v401_v48 = vpop.permute.xlu1 %400 }
 0x13c   : > { %v408_v36 = vsel %vm6423_vm6, %v401_v48, %v5654_v2  ;;  %v407_v18 = vsel %vm6423_vm6, %v399_v33, %v401_v48  ;;  %v535_v8 = vsel %vm6424_vm11, %v528_v31, %v5652_v40  ;;  %v701_v40 = vsel %vm6494_vm8, %v691_v50, %v693_v16 }
 0x13d   : > { %4465 = vmatmul.mubr.msk.bf16.vlgmr.msra.gmra.mxu0 %vm409_vm2, %v4458_v23  ;;  %4466 = vmatprep.subr.msk.bf16.mxu1 %vm328_vm4, %v408_v36  ;;  %v421_v55 = vsel %vm328_vm4, %v407_v18, 0  ;;  %v709_v50 = vsel %vm328_vm4, %v701_v40, 0  ;;  %vm6503_vm6 = vcmask 465920  }
 0x13e   : > { %482 = vmatpush1.bf16.msra.mxu1 %v421_v55  ;;  %583 = vmatprep.mubr.bf16.mxu0 %v4815_v3 }
 0x13f   : > { %v695_v9 = vpop.permute.xlu0 %694  ;;  %4475 = vmatprep.subr.msk.bf16.mxu1 %vm328_vm4, %v535_v8  ;;  %v526_v2 = vpop.permute.xlu1 %525 }
 0x140   : > { %v534_v33 = vsel %vm6424_vm11, %v526_v2, %v528_v31  ;;  %v533_v30 = vsel %vm6424_vm11, %v524_v1, %v526_v2  ;;  %v702_v48 = vsel %vm6495_vm9, %v693_v16, %v695_v9  ;;  %v337_v31 = vld [vmem:[%s6390_s1] sm:$0xf]  ;;  %vm6497_vm9 = vcmask 531456   ;;  %v4477_v2 = vld [vmem:[%s6390_s1 + $0x8] sm:$0xf] }
 0x141   : > { %4467 = vmatmul.mubr.msk.bf16.vlgmr.msra.gmra.mxu1 %vm409_vm2, %v4458_v23  ;;  %4473 = vmatprep.subr.msk.bf16.mxu0 %vm328_vm4, %v533_v30  ;;  %v546_v53 = vsel %vm328_vm4, %v534_v33, 0 }
 0x142   : > { %566 = vmatpush1.bf16.msra.mxu0 %v540_v35  ;;  %607 = vmatpush1.bf16.msra.mxu1 %v546_v53 }
 0x143   : > { %v869_v36 = vpop.permute.xlu0 %868  ;;  %4483 = vmatprep.subr.msk.bf16.mxu0 %vm328_vm4, %v702_v48  ;;  %v697_v1 = vpop.permute.xlu1 %696  ;;  %624 = vmatprep.mubr.bf16.mxu1 %v4815_v3 }
 0x144   : > { %v704_v23 = vsel %vm6496_vm10, %v697_v1, %v5666_v32  ;;  %v703_v16 = vsel %vm6494_vm8, %v695_v9, %v697_v1  ;;  %vm6498_vm10 = vmmov %vm6497_vm9 }
 0x145   : > { %4474 = vmatmul.mubr.msk.bf16.vlgmr.msra.gmra.mxu0 %vm409_vm2, %v337_v31  ;;  %4485 = vmatprep.subr.msk.bf16.mxu1 %vm328_vm4, %v704_v23  ;;  %v715_v32 = vsel %vm328_vm4, %v703_v16, 0  ;;  %v873_v8 = vsel %vm6498_vm10, %v863_v49, %v5706_v34  ;;  %vm6499_vm8 = vmmov %vm6497_vm9 }
 0x146   : > { %735 = vmatpush1.bf16.msra.mxu0 %v709_v50  ;;  %752 = vmatprep.mubr.bf16.mxu0 %v4815_v3  ;;  %v876_v9 = vsel %vm6499_vm8, %v869_v36, %v5660_v29  ;;  %v881_v35 = vsel %vm328_vm4, %v873_v8, 0  ;;  %vm6500_vm10 = vmmov %vm6499_vm8  ;;  %vm6501_vm8 = vcmask 515072  }
 0x147   : > { %v5763_v18 = vpop.permute.xlu0 %1170  ;;  %v867_v55 = vpop.permute.xlu1 %866 }
 0x148   : > { %v874_v4 = vsel %vm6497_vm9, %v5706_v34, %v867_v55  ;;  %vm6422_vm9 = vcmask 523264   ;;  %v875_v34 = vsel %vm6500_vm10, %v867_v55, %v869_v36  ;;  %v4487_v36 = vld [vmem:[%s6390_s1 + $0xc] sm:$0xf] }
 0x149   : > { %4476 = vmatmul.mubr.msk.bf16.vlgmr.msra.gmra.mxu1 %vm409_vm2, %v337_v31  ;;  %4493 = vmatprep.subr.msk.bf16.mxu0 %vm328_vm4, %v874_v4  ;;  %v1005_v29 = vsel %vm6422_vm9, %v5609_v24, %v5611_v27  ;;  %v887_v40 = vsel %vm328_vm4, %v875_v34, 0  ;;  %v1004_v48 = vsel %vm6422_vm9, %v5598_v11, %v5609_v24  ;;  %v1007_v31 = vsel %vm6422_vm9, %v5619_v46, %v5621_v56 }
 0x14a   : > { %776 = vmatpush1.bf16.msra.mxu1 %v715_v32  ;;  %793 = vmatprep.mubr.bf16.mxu1 %v4815_v3  ;;  %v1012_v11 = vsel %vm328_vm4, %v1004_v48, 0  ;;  %v1006_v24 = vsel %vm6422_vm9, %v5611_v27, %v5619_v46  ;;  %v1174_v46 = vsel %vm6501_vm8, %v5717_v41, %v5711_v26  ;;  %vm6502_vm9 = vmmov %vm6501_vm8 }
 0x14b   : > { %4495 = vmatprep.subr.msk.bf16.mxu1 %vm328_vm4, %v876_v9  ;;  %v5779_v33 = vpop.permute.xlu0 %1339  ;;  %v1169_v30 = vpop.permute.xlu1 %1168  ;;  %v1018_v27 = vsel %vm328_vm4, %v1006_v24, 0  ;;  %v1177_v34 = vsel %vm6502_vm9, %v5763_v18, %v5677_v62  ;;  %v1182_v62 = vsel %vm328_vm4, %v1174_v46, 0 }
 0x14c   : > { %v1175_v16 = vsel %vm6501_vm8, %v5711_v26, %v1169_v30  ;;  %v1176_v41 = vsel %vm6502_vm9, %v1169_v30, %v5763_v18  ;;  %vm6505_vm9 = vmmov %vm6503_vm6 }
 0x14d   : > { %4484 = vmatmul.mubr.msk.bf16.vlgmr.msra.gmra.mxu0 %vm409_vm2, %v4477_v2  ;;  %v1188_v30 = vsel %vm328_vm4, %v1176_v41, 0 }
 0x14e   : > { %907 = vmatpush1.bf16.msra.mxu0 %v881_v35  ;;  %924 = vmatprep.mubr.bf16.mxu0 %v4815_v3 }
 0x14f   : > { %4503 = vmatprep.subr.msk.bf16.mxu0 %vm328_vm4, %v1005_v29  ;;  %v5789_v49 = vpop.permute.xlu0 %1511  ;;  %v5791_v53 = vpop.permute.xlu1 %1341  ;;  %v4497_v29 = vld [vmem:[%s6390_s1 + $0x10] sm:$0xf] }
 0x151   : > { %4486 = vmatmul.mubr.msk.bf16.vlgmr.msra.gmra.mxu1 %vm409_vm2, %v4477_v2 }
 0x152   : > { %948 = vmatpush1.bf16.msra.mxu1 %v887_v40  ;;  %965 = vmatprep.mubr.bf16.mxu1 %v4815_v3 }
 0x153   : > { %4505 = vmatprep.subr.msk.bf16.mxu1 %vm328_vm4, %v1007_v31  ;;  %v2788_v1 = vpop.permute.xlu0 %2787  ;;  %v5806_v23 = vpop.permute.xlu1 %1509 }
 0x154   : > { %v2791_v50 = vrot.slane %v2788_v1, 4 }
 0x155   : > { %4494 = vmatmul.mubr.msk.bf16.vlgmr.msra.gmra.mxu0 %vm409_vm2, %v4487_v36 }
 0x156   : > { %v2793_v56 = vsel %vm409_vm2, %v2791_v50, %v2788_v1  ;;  %1038 = vmatpush1.bf16.msra.mxu0 %v1012_v11  ;;  %1055 = vmatprep.mubr.bf16.mxu0 %v4815_v3 }
 0x157   : > { %vm2796_vm10 = vcmp.ne.s16.totalorder %v2793_v56, 0  ;;  %4513 = vmatprep.subr.msk.bf16.mxu0 %vm328_vm4, %v1175_v16  ;;  %v5818_v55 = vpop.permute.xlu0 %1676  ;;  %v2790_v4 = vpop.permute.xlu1 %2789  ;;  %v1345_v56 = vsel %vm6503_vm6, %v5715_v10, %v5721_v12  ;;  %v1347_v10 = vsel %vm6505_vm9, %v5779_v33, %v5791_v53 }
 0x158   : > { %v2799_v32 = vsel %vm2796_vm10, %v5674_v54, 0  ;;  %v2792_v8 = vrot.slane %v2790_v4, 4  ;;  %v1359_v41 = vsel %vm328_vm4, %v1347_v10, 0 }
 0x159   : > { %v4617_v9 = vcombine.low %v2799_v32, %v2799_v32  ;;  %v4618_v2 = vcombine.high %v2799_v32, %v2799_v32  ;;  %4496 = vmatmul.mubr.msk.bf16.vlgmr.msra.gmra.mxu1 %vm409_vm2, %v4487_v36  ;;  %v4507_v32 = vld [vmem:[%s6390_s1 + $0x14] sm:$0xf] }
 0x15a   : > { %v2794_v35 = vsel %vm328_vm4, %v2791_v50, %v2792_v8  ;;  %1079 = vmatpush1.bf16.msra.mxu1 %v1018_v27  ;;  %1096 = vmatprep.mubr.bf16.mxu1 %v4815_v3  ;;  %vm2798_vm8 = vcmp.ne.s16.totalorder %v2792_v8, 0  ;;  %v1346_v50 = vsel %vm6503_vm6, %v5721_v12, %v5779_v33 }
 0x15b   : > { %v2795_v40 = vsel %vm409_vm2, %v2794_v35, %v2790_v4  ;;  %4515 = vmatprep.subr.msk.bf16.mxu1 %vm328_vm4, %v1177_v34  ;;  %v5836_v48 = vpop.permute.xlu0 %1680  ;;  %v5838_v26 = vpop.permute.xlu1 %1678  ;;  %2819 = vrot.lane.b32.xlu0 %v4618_v2, %s4825_s11  ;;  %v2801_v11 = vsel %vm2798_vm8, %v5697_v37, 0  ;;  %vm1832_vm8 = vcmask 72704  }
 0x15c   : > { %vm2797_vm10 = vcmp.ne.s16.totalorder %v2795_v40, 0  ;;  %2817 = vrot.lane.b32.xlu1 %v4617_v9, %s4825_s11  ;;  %v4621_v16 = vcombine.low %v2801_v11, %v2801_v11 }
 0x15d   : > { %v2800_v31 = vsel %vm2797_vm10, %v5686_v15, 0  ;;  %4504 = vmatmul.mubr.msk.bf16.vlgmr.msra.gmra.mxu0 %vm409_vm2, %v4497_v29  ;;  %vm6504_vm10 = vmmov %vm6503_vm6  ;;  %vm6506_vm6 = vcmask 457728  }
 0x15e   : > { %v4619_v36 = vcombine.low %v2800_v31, %v2800_v31  ;;  %v4620_v1 = vcombine.high %v2800_v31, %v2800_v31  ;;  %1208 = vmatpush1.bf16.msra.mxu0 %v1182_v62  ;;  %1225 = vmatprep.mubr.bf16.mxu0 %v4815_v3  ;;  %v1348_v4 = vsel %vm6504_vm10, %v5791_v53, %v5679_v0  ;;  %v1353_v0 = vsel %vm328_vm4, %v1345_v56, 0  ;;  %vm6507_vm11 = vmmov %vm6506_vm6 }
 0x15f   : > { %4523 = vmatprep.subr.msk.bf16.mxu0 %vm328_vm4, %v1346_v50  ;;  %v5853_v24 = vpop.permute.xlu0 %1684  ;;  %v5855_v18 = vpop.permute.xlu1 %1682  ;;  %v1516_v12 = vsel %vm6506_vm6, %v5719_v19, %v5806_v23  ;;  %v1515_v31 = vsel %vm6506_vm6, %v5724_v57, %v5719_v19 }
 0x160   : > { %2823 = vrot.lane.b32.xlu0 %v4620_v1, %s4825_s11  ;;  %2821 = vrot.lane.b32.xlu1 %v4619_v36, %s4825_s11  ;;  %v1518_v36 = vsel %vm6507_vm11, %v5789_v49, %v5689_v28  ;;  %v4517_v1 = vld [vmem:[%s6390_s1 + $0x18] sm:$0xf]  ;;  %v1523_v28 = vsel %vm328_vm4, %v1515_v31, 0  ;;  %vm6508_vm11 = vcmp.ne.s16.totalorder %v5362_v14, 0 }
 0x161   : > { %4506 = vmatmul.mubr.msk.bf16.vlgmr.msra.gmra.mxu1 %vm409_vm2, %v4497_v29 }
 0x162   : > { %1249 = vmatpush1.bf16.msra.mxu1 %v1188_v30  ;;  %1266 = vmatprep.mubr.bf16.mxu1 %v4815_v3  ;;  %v3077_v30 = vsel %vm6508_vm11, %v5674_v54, 0  ;;  %vm6511_vm11 = vcmp.ne.s16.totalorder %v5468_v38, 0 }
 0x163   : > { %4525 = vmatprep.subr.msk.bf16.mxu1 %vm328_vm4, %v1348_v4  ;;  %v2935_v8 = vpop.permute.xlu0 %2934  ;;  %v2933_v9 = vpop.permute.xlu1 %2932 }
 0x164   : > { %v2937_v2 = vrot.slane %v2935_v8, 4  ;;  %v2936_v27 = vrot.slane %v2933_v9, 4  ;;  %2825 = vrot.lane.b32.xlu1 %v4621_v16, %s4825_s11 }
 0x165   : > { %4514 = vmatmul.mubr.msk.bf16.vlgmr.msra.gmra.mxu0 %vm409_vm2, %v4507_v32 }
 0x166   : > { %v2938_v46 = vsel %vm1832_vm8, %v2936_v27, %v2933_v9  ;;  %v2939_v35 = vsel %vm328_vm4, %v2936_v27, %v2937_v2  ;;  %1379 = vmatpush1.bf16.msra.mxu0 %v1353_v0  ;;  %1396 = vmatprep.mubr.bf16.mxu0 %v4815_v3  ;;  %v3078_v9 = vsel %vm6511_vm11, %v5686_v15, 0  ;;  %v4527_v0 = vld [vmem:[%s6390_s1 + $0x1c] sm:$0xf]  ;;  %vm6515_vm11 = vcmp.ne.s16.totalorder %v5453_v6, 0 }
 0x167   : > { %v2940_v34 = vsel %vm1832_vm8, %v2939_v35, %v2935_v8  ;;  %vm2941_vm10 = vcmp.ne.s16.totalorder %v2938_v46, 0  ;;  %4533 = vmatprep.subr.msk.bf16.mxu0 %vm328_vm4, %v1516_v12  ;;  %v5886_v33 = vpop.permute.xlu0 %1824  ;;  %v5888_v53 = vpop.permute.xlu1 %1822  ;;  %v3079_v46 = vsel %vm5278_vm3, %v5697_v37, 0  ;;  %vm6514_vm3 = vcmp.ne.s16.totalorder %v5341_v5, 0 }
 0x168   : > { %vm2942_vm9 = vcmp.ne.s16.totalorder %v2940_v34, 0  ;;  %v2944_v29 = vsel %vm2941_vm10, %v5674_v54, 0  ;;  %vm2943_vm10 = vcmp.ne.s16.totalorder %v2937_v2, 0  ;;  %v4641_v43 = vcombine.low %v3079_v46, %v3079_v46 }
 0x169   : > { %v4627_v40 = vcombine.low %v2944_v29, %v2944_v29  ;;  %v4628_v62 = vcombine.high %v2944_v29, %v2944_v29  ;;  %4516 = vmatmul.mubr.msk.bf16.vlgmr.msra.gmra.mxu1 %vm409_vm2, %v4507_v32  ;;  %v2945_v50 = vsel %vm2942_vm9, %v5686_v15, 0  ;;  %vm6509_vm9 = vmmov %vm6506_vm6  ;;  %vm6510_vm6 = vcmask 449536  }
 0x16a   : > { %1420 = vmatpush1.bf16.msra.mxu1 %v1359_v41  ;;  %1437 = vmatprep.mubr.bf16.mxu1 %v4815_v3  ;;  %v4630_v57 = vcombine.high %v2945_v50, %v2945_v50  ;;  %v1517_v56 = vsel %vm6509_vm9, %v5806_v23, %v5789_v49  ;;  %v1687_v16 = vsel %vm6510_vm6, %v5838_v26, %v5836_v48  ;;  %v2946_v32 = vsel %vm2943_vm10, %v5697_v37, 0  ;;  %vm6512_vm10 = vmmov %vm6510_vm6 }
 0x16b   : > { %4535 = vmatprep.subr.msk.bf16.mxu1 %vm328_vm4, %v1518_v36  ;;  %v5905_v11 = vpop.permute.xlu0 %1828  ;;  %2964 = vrot.lane.b32.xlu1 %v4628_v62, %s4824_s9  ;;  %v5908_v19 = vpop.permute.xlu1 %1826  ;;  %v4629_v4 = vcombine.low %v2945_v50, %v2945_v50  ;;  %v4637_v49 = vcombine.low %v3077_v30, %v3077_v30  ;;  %v1529_v23 = vsel %vm328_vm4, %v1517_v56, 0  ;;  %v1686_v2 = vsel %vm6512_vm10, %v5818_v55, %v5838_v26  ;;  %vm6513_vm9 = vmmov %vm6510_vm6  ;;  %v4537_v36 = vld [vmem:[%s6390_s1 + $0x20] sm:$0xf] }
 0x16c   : > { %2962 = vrot.lane.b32.xlu0 %v4627_v40, %s4824_s9  ;;  %v1689_v27 = vsel %vm6513_vm9, %v5855_v18, %v5853_v24  ;;  %v4631_v10 = vcombine.low %v2946_v32, %v2946_v32  ;;  %v4639_v55 = vcombine.low %v3078_v9, %v3078_v9  ;;  %v1694_v26 = vsel %vm328_vm4, %v1686_v2, 0 }
 0x16d   : > { %4524 = vmatmul.mubr.msk.bf16.vlgmr.msra.gmra.mxu0 %vm409_vm2, %v4517_v1  ;;  %v4638_v24 = vcombine.high %v3077_v30, %v3077_v30  ;;  %v1688_v35 = vsel %vm6510_vm6, %v5836_v48, %v5855_v18  ;;  %v1834_v34 = vsel %vm1832_vm8, %v5886_v33, %v5908_v19  ;;  %v3210_v48 = vsel %vm6514_vm3, %v5674_v54, 0 }
 0x16e   : > { %1549 = vmatpush1.bf16.msra.mxu0 %v1523_v28  ;;  %1566 = vmatprep.mubr.bf16.mxu0 %v4815_v3  ;;  %v1700_v62 = vsel %vm328_vm4, %v1688_v35, 0  ;;  %v4640_v18 = vcombine.high %v3078_v9, %v3078_v9  ;;  %v1833_v41 = vsel %vm1832_vm8, %v5888_v53, %v5886_v33  ;;  %v4648_v50 = vcombine.high %v3210_v48, %v3210_v48 }
 0x16f   : > { %4543 = vmatprep.subr.msk.bf16.mxu0 %vm328_vm4, %v1687_v16  ;;  %v5925_v8 = vpop.permute.xlu0 %1969  ;;  %2968 = vrot.lane.b32.xlu1 %v4630_v57, %s4824_s9  ;;  %v1831_v14 = vpop.permute.xlu1 %1830  ;;  %v1841_v33 = vsel %vm328_vm4, %v1833_v41, 0  ;;  %v4647_v53 = vcombine.low %v3210_v48, %v3210_v48  ;;  %v3211_v28 = vsel %vm6515_vm11, %v5686_v15, 0  ;;  %v1835_v57 = vsel %vm1832_vm8, %v5908_v19, %v5905_v11 }
 0x170   : > { %2966 = vrot.lane.b32.xlu0 %v4629_v4, %s4824_s9  ;;  %v1836_v31 = vsel %vm1832_vm8, %v5905_v11, %v1831_v14  ;;  %v4650_v6 = vcombine.high %v3211_v28, %v3211_v28  ;;  %v1847_v4 = vsel %vm328_vm4, %v1835_v57, 0  ;;  %v4649_v11 = vcombine.low %v3211_v28, %v3211_v28  ;;  %v4567_v57 = vld [vmem:[%s6390_s1 + $0x2c] sm:$0xf] }
 0x171   : > { %4526 = vmatmul.mubr.msk.bf16.vlgmr.msra.gmra.mxu1 %vm409_vm2, %v4517_v1  ;;  %vm6516_vm8 = vcmp.ne.s16.totalorder %v5377_v20, 0  ;;  %vm6517_vm10 = vcmp.ne.s16.totalorder %v5483_v39, 0  ;;  %vm6525_vm11 = vcmp.ne.s16.totalorder %v5412_v47, 0 }
 0x172   : > { %1590 = vmatpush1.bf16.msra.mxu1 %v1529_v23  ;;  %1607 = vmatprep.mubr.bf16.mxu1 %v4815_v3  ;;  %v3343_v19 = vsel %vm6516_vm8, %v5674_v54, 0  ;;  %v3212_v23 = vsel %vm5284_vm12, %v5697_v37, 0  ;;  %vm6518_vm12 = vcmp.ne.s16.totalorder %v5399_v7, 0  ;;  %v2379_v7 = vld [vmem:[%s5224_s14 + $0x4] sm:$0xff] }
 0x173   : > { %4545 = vmatprep.subr.msk.bf16.mxu1 %vm328_vm4, %v1689_v27  ;;  %v5945_v38 = vpop.permute.xlu0 %1973  ;;  %3095 = vrot.lane.b32.xlu1 %v4637_v49, %s4823_s8  ;;  %v1972_v12 = vpop.permute.xlu1 %1971  ;;  %v4547_v49 = vld [vmem:[%s6390_s1 + $0x24] sm:$0xf]  ;;  %v3344_v27 = vsel %vm6517_vm10, %v5686_v15, 0  ;;  %v3476_v48 = vsel %vm6518_vm12, %v5674_v54, 0  ;;  %vm6528_vm12 = vcmp.ne.s16.totalorder %v5511_v45, 0 }
 0x174   : > { %2970 = vrot.lane.b32.xlu0 %v4631_v10, %s4824_s9  ;;  %v1981_v30 = vsel %vm409_vm2, %v1972_v12, %v5945_v38  ;;  %v1980_v32 = vsel %vm409_vm2, %v5925_v8, %v1972_v12  ;;  %v4657_v8 = vcombine.low %v3343_v19, %v3343_v19  ;;  %v4651_v10 = vcombine.low %v3212_v23, %v3212_v23 }
 0x175   : > { %4534 = vmatmul.mubr.msk.bf16.vlgmr.msra.gmra.mxu0 %vm409_vm2, %v4527_v0  ;;  %v1988_v2 = vsel %vm328_vm4, %v1980_v32, 0  ;;  %v3478_v32 = vsel %vm5319_vm14, %v5697_v37, 0  ;;  %vm6524_vm14 = vcmask 1039360  }
 0x176   : > { %1720 = vmatpush1.bf16.msra.mxu0 %v1694_v26  ;;  %1737 = vmatprep.mubr.bf16.mxu0 %v4815_v3  ;;  %v4659_v26 = vcombine.low %v3344_v27, %v3344_v27  ;;  %vm6526_vm8 = vmmov %vm6524_vm14 }
 0x177   : > { %4553 = vmatprep.subr.msk.bf16.mxu0 %vm328_vm4, %v1834_v34  ;;  %v1978_v29 = vpop.permute.xlu0 %1977  ;;  %3099 = vrot.lane.b32.xlu1 %v4639_v55, %s4823_s8  ;;  %v1976_v40 = vpop.permute.xlu1 %1975  ;;  %v4557_v34 = vld [vmem:[%s6390_s1 + $0x28] sm:$0xf]  ;;  %vm6527_vm10 = vmmov %vm6526_vm8 }
 0x178   : > { %3097 = vrot.lane.b32.xlu0 %v4638_v24, %s4823_s8  ;;  %v1983_v14 = vsel %vm409_vm2, %v1976_v40, %v1978_v29  ;;  %v1982_v44 = vsel %vm409_vm2, %v5945_v38, %v1976_v40  ;;  %v4658_v24 = vcombine.high %v3343_v19, %v3343_v19  ;;  %v3345_v38 = vsel %vm5301_vm13, %v5697_v37, 0 }
 0x179   : > { %4536 = vmatmul.mubr.msk.bf16.vlgmr.msra.gmra.mxu1 %vm409_vm2, %v4527_v0  ;;  %v1994_v39 = vsel %vm328_vm4, %v1982_v44, 0  ;;  %v4661_v51 = vcombine.low %v3345_v38, %v3345_v38  ;;  %vm6519_vm13 = vcmask 7168  }
 0x17a   : > { %1761 = vmatpush1.bf16.msra.mxu1 %v1700_v62  ;;  %1778 = vmatprep.mubr.bf16.mxu1 %v4815_v3  ;;  %v4660_v62 = vcombine.high %v3344_v27, %v3344_v27  ;;  %vm6521_vm9 = vmmov %vm6519_vm13 }
 0x17b   : > { %4555 = vmatprep.subr.msk.bf16.mxu1 %vm328_vm4, %v1836_v31  ;;  %v2119_v1 = vpop.permute.xlu0 %2118  ;;  %3103 = vrot.lane.b32.xlu1 %v4641_v43, %s4823_s8  ;;  %v2117_v5 = vpop.permute.xlu1 %2116  ;;  %vm6522_vm6 = vmmov %vm6521_vm9 }
 0x17c   : > { %3101 = vrot.lane.b32.xlu0 %v4640_v18, %s4823_s8  ;;  %v2127_v46 = vsel %vm2126_vm1, %v2117_v5, %v2119_v1  ;;  %vm6523_vm3 = vmmov %vm6522_vm6  ;;  %s4730_s8 = sshll.u32 %s6590_s18, 4 }
 0x17d   : > { %4544 = vmatmul.mubr.msk.bf16.vlgmr.msra.gmra.mxu0 %vm409_vm2, %v4537_v36  ;;  %v2135_v43 = vsel %vm328_vm4, %v2127_v46, 0  ;;  %v3739_v46 = vsel %vm6525_vm11, %v5674_v54, 0  ;;  %s272_s10 = scalar_lea.vmem %s6393_s4, %s4730_s8 }
 0x17e   : > { %1867 = vmatpush1.bf16.msra.mxu0 %v1841_v33  ;;  %1884 = vmatprep.mubr.bf16.mxu0 %v4815_v3  ;;  %v4688_v47 = vcombine.high %v3739_v46, %v3739_v46 }
 0x17f   : > { %4563 = vmatprep.subr.msk.bf16.mxu0 %vm328_vm4, %v1981_v30  ;;  %v2123_v56 = vpop.permute.xlu0 %2122  ;;  %3230 = vrot.lane.b32.xlu1 %v4648_v50, %s4822_s7  ;;  %v2121_v16 = vpop.permute.xlu1 %2120  ;;  %v4667_v50 = vcombine.low %v3476_v48, %v3476_v48  ;;  %v4589_v30 = vcombine.high %v2379_v7, %v2379_v7 }
 0x180   : > { %3228 = vrot.lane.b32.xlu0 %v4647_v53, %s4822_s7  ;;  %v2128_v0 = vsel %vm2126_vm1, %v2119_v1, %v2121_v16  ;;  %v2129_v18 = vsel %vm2126_vm1, %v2121_v16, %v2123_v56  ;;  %v4668_v1 = vcombine.high %v3476_v48, %v3476_v48 }
 0x181   : > { %4546 = vmatmul.mubr.msk.bf16.vlgmr.msra.gmra.mxu1 %vm409_vm2, %v4537_v36  ;;  %v2141_v5 = vsel %vm328_vm4, %v2129_v18, 0 }
 0x182   : > { %1908 = vmatpush1.bf16.msra.mxu1 %v1847_v4  ;;  %1925 = vmatprep.mubr.bf16.mxu1 %v4815_v3 }
 0x183   : > { %4565 = vmatprep.subr.msk.bf16.mxu1 %vm328_vm4, %v1983_v14  ;;  %v2264_v20 = vpop.permute.xlu0 %2263  ;;  %3234 = vrot.lane.b32.xlu1 %v4650_v6, %s4822_s7  ;;  %v2125_v9 = vpop.permute.xlu1 %2124  ;;  %v4677_v14 = vcombine.low %v5674_v54, %v5674_v54 }
 0x184   : > { %3232 = vrot.lane.b32.xlu0 %v4649_v11, %s4822_s7  ;;  %v2130_v35 = vsel %vm2126_vm1, %v2123_v56, %v2125_v9  ;;  %vm6520_vm1 = vcmp.ne.s16.totalorder %v5498_v42, 0  ;;  %v2380_v42 = vld [vmem:[%s5224_s14 + $0xc] sm:$0xff]  ;;  %v4671_v9 = vcombine.low %v3478_v32, %v3478_v32 }
 0x185   : > { %4554 = vmatmul.mubr.msk.bf16.vlgmr.msra.gmra.mxu0 %vm409_vm2, %v4547_v49  ;;  %v3477_v33 = vsel %vm6520_vm1, %v5686_v15, 0  ;;  %v4591_v23 = vcombine.high %v2380_v42, %v2380_v42  ;;  %v4590_v44 = vcombine.low %v2380_v42, %v2380_v42  ;;  %vm6530_vm1 = vcmask 990208  }
 0x186   : > { %2014 = vmatpush1.bf16.msra.mxu0 %v1988_v2  ;;  %2031 = vmatprep.mubr.bf16.mxu0 %v4815_v3  ;;  %v4670_v56 = vcombine.high %v3477_v33, %v3477_v33  ;;  %v4669_v11 = vcombine.low %v3477_v33, %v3477_v33  ;;  %v3741_v33 = vsel %vm5329_vm0, %v5697_v37, 0  ;;  %vm6535_vm11 = vmmov %vm6530_vm1  ;;  %vm6536_vm0 = vcmp.ne.s16.totalorder %v5436_v17, 0 }
 0x187   : > { %4573 = vmatprep.subr.msk.bf16.mxu0 %vm328_vm4, %v2128_v0  ;;  %v2268_v12 = vpop.permute.xlu0 %2267  ;;  %3361 = vrot.lane.b32.xlu1 %v4657_v8, %s4821_s6  ;;  %v2266_v55 = vpop.permute.xlu1 %2265  ;;  %v4678_v0 = vcombine.high %v5674_v54, %v5674_v54  ;;  %v4005_v13 = vsel %vm6536_vm0, %v5674_v54, 0 }
 0x188   : > { %3236 = vrot.lane.b32.xlu0 %v4651_v10, %s4822_s7  ;;  %v2275_v41 = vsel %vm6519_vm13, %v2266_v55, %v2268_v12  ;;  %v2274_v53 = vsel %vm6521_vm9, %v2264_v20, %v2266_v55  ;;  %v4679_v10 = vcombine.low %v5686_v15, %v5686_v15  ;;  %v2403_v55 = vsel %vm328_vm4, %v4590_v44, 0  ;;  %vm6529_vm13 = vmmov %vm6526_vm8 }
 0x189   : > { %4556 = vmatmul.mubr.msk.bf16.vlgmr.msra.gmra.mxu1 %vm409_vm2, %v4547_v49  ;;  %v2282_v16 = vsel %vm328_vm4, %v2274_v53, 0  ;;  %v4588_v49 = vcombine.low %v2379_v7, %v2379_v7  ;;  %vm6531_vm9 = vcmp.ne.s16.totalorder %v5425_v61, 0 }
 0x18a   : > { %2055 = vmatpush1.bf16.msra.mxu1 %v1994_v39  ;;  %2072 = vmatprep.mubr.bf16.mxu1 %v4815_v3  ;;  %v4680_v39 = vcombine.high %v5686_v15, %v5686_v15  ;;  %v3872_v7 = vsel %vm6531_vm9, %v5674_v54, 0 }
 0x18b   : > { %4575 = vmatprep.subr.msk.bf16.mxu1 %vm328_vm4, %v2130_v35  ;;  %v2272_v29 = vpop.permute.xlu0 %2271  ;;  %3365 = vrot.lane.b32.xlu1 %v4659_v26, %s4821_s6  ;;  %v2270_v40 = vpop.permute.xlu1 %2269  ;;  %v2397_v27 = vsel %vm328_vm4, %v4588_v49, 0  ;;  %v4681_v26 = vcombine.low %v5697_v37, %v5697_v37  ;;  %v4697_v61 = vcombine.low %v3872_v7, %v3872_v7 }
 0x18c   : > { %3363 = vrot.lane.b32.xlu0 %v4658_v24, %s4821_s6  ;;  %v2277_v28 = vsel %vm6522_vm6, %v2270_v40, %v2272_v29  ;;  %v2276_v19 = vsel %vm6523_vm3, %v2268_v12, %v2270_v40  ;;  %v4587_v29 = vld [vmem:[%s6390_s1 + $0x34] sm:$0xf]  ;;  %vm6532_vm6 = vmmov %vm6530_vm1 }
 0x18d   : > { %4564 = vmatmul.mubr.msk.bf16.vlgmr.msra.gmra.mxu0 %vm409_vm2, %v4557_v34  ;;  %v2288_v20 = vsel %vm328_vm4, %v2276_v19, 0  ;;  %vm6533_vm3 = vmmov %vm6530_vm1  ;;  %v4707_v19 = vcombine.low %v4005_v13, %v4005_v13 }
 0x18e   : > { %2161 = vmatpush1.bf16.msra.mxu0 %v2135_v43  ;;  %2178 = vmatprep.mubr.bf16.mxu0 %v4815_v3  ;;  %v3740_v43 = vsel %vm6528_vm12, %v5686_v15, 0 }
 0x18f   : > { %4583 = vmatprep.subr.msk.bf16.mxu0 %vm328_vm4, %v2275_v41  ;;  %v6048_v31 = vpop.permute.xlu0 %2529  ;;  %3369 = vrot.lane.b32.xlu1 %v4661_v51, %s4821_s6  ;;  %v6051_v36 = vpop.permute.xlu1 %2527  ;;  %v4687_v51 = vcombine.low %v3739_v46, %v3739_v46  ;;  %v4689_v45 = vcombine.low %v3740_v43, %v3740_v43 }
 0x190   : > { %3367 = vrot.lane.b32.xlu0 %v4660_v62, %s4821_s6  ;;  %v2537_v35 = vsel %vm6526_vm8, %v6051_v36, %v6048_v31  ;;  %vm6538_vm8 = vcmp.ne.s16.totalorder %v5551_v25, 0 }
 0x191   : > { %4566 = vmatmul.mubr.msk.bf16.vlgmr.msra.gmra.mxu1 %vm409_vm2, %v4557_v34  ;;  %v2545_v40 = vsel %vm328_vm4, %v2537_v35, 0  ;;  %v4138_v49 = vsel %vm6538_vm8, %v5674_v54, 0  ;;  %vm6552_vm8 = vcmask 588800  }
 0x192   : > { %2202 = vmatpush1.bf16.msra.mxu1 %v2141_v5  ;;  %2219 = vmatprep.mubr.bf16.mxu1 %v4815_v3  ;;  %v4718_v54 = vcombine.high %v4138_v49, %v4138_v49 }
 0x193   : > { %4585 = vmatprep.subr.msk.bf16.mxu1 %vm328_vm4, %v2277_v28  ;;  %3496 = vrot.lane.b32.xlu1 %v4668_v1, %s4820_s30  ;;  %v2534_v6 = vpop.permute.xlu0 %2533  ;;  %v2532_v4 = vpop.permute.xlu1 %2531 }
 0x194   : > { %3494 = vrot.lane.b32.xlu0 %v4667_v50, %s4820_s30  ;;  %v2538_v12 = vsel %vm6524_vm14, %v6048_v31, %v2532_v4  ;;  %v2539_v62 = vsel %vm6529_vm13, %v2532_v4, %v2534_v6  ;;  %v4690_v31 = vcombine.high %v3740_v43, %v3740_v43  ;;  %v4596_v50 = vld [vmem:[%s6390_s1 + $0x38] sm:$0xf]  ;;  %vm6534_vm14 = vcmp.ne.s16.totalorder %v5524_v52, 0 }
 0x195   : > { %4574 = vmatmul.mubr.msk.bf16.vlgmr.msra.gmra.mxu0 %vm409_vm2, %v4567_v57  ;;  %v2551_v36 = vsel %vm328_vm4, %v2539_v62, 0  ;;  %v3873_v28 = vsel %vm6534_vm14, %v5686_v15, 0  ;;  %v3874_v52 = vsel %vm5354_vm5, %v5697_v37, 0  ;;  %vm6537_vm5 = vcmp.ne.s16.totalorder %v5537_v58, 0 }
 0x196   : > { %2308 = vmatpush1.bf16.msra.mxu0 %v2282_v16  ;;  %2325 = vmatprep.mubr.bf16.mxu0 %v4815_v3  ;;  %v4699_v63 = vcombine.low %v3873_v28, %v3873_v28  ;;  %v4606_v16 = vld [vmem:[%s6390_s1 + $0x3c] sm:$0xf]  ;;  %v4700_v4 = vcombine.high %v3873_v28, %v3873_v28  ;;  %v4006_v32 = vsel %vm6537_vm5, %v5686_v15, 0  ;;  %v4717_v58 = vcombine.low %v4138_v49, %v4138_v49 }
 0x197   : > { %3500 = vrot.lane.b32.xlu1 %v4670_v56, %s4820_s30  ;;  %4592 = vmatprep.subr.msk.bf16.mxu0 %vm328_vm4, %v4589_v30  ;;  %v2673_v8 = vpop.permute.xlu0 %2672  ;;  %v2536_v2 = vpop.permute.xlu1 %2535  ;;  %v4698_v56 = vcombine.high %v3872_v7, %v3872_v7  ;;  %v4710_v17 = vcombine.high %v4006_v32, %v4006_v32  ;;  %vm6548_vm14 = vcmask 596992  }
 0x198   : > { %3498 = vrot.lane.b32.xlu0 %v4669_v11, %s4820_s30  ;;  %v2540_v34 = vsel %vm6527_vm10, %v2534_v6, %v2536_v2  ;;  %v4701_v6 = vcombine.low %v3874_v52, %v3874_v52  ;;  %v4708_v11 = vcombine.high %v4005_v13, %v4005_v13  ;;  %vm6539_vm10 = vcmp.ne.s16.totalorder %v5558_v60, 0 }
 0x199   : > { %4576 = vmatmul.mubr.msk.bf16.vlgmr.msra.gmra.mxu1 %vm409_vm2, %v4567_v57  ;;  %v4691_v57 = vcombine.low %v3741_v33, %v3741_v33 }
 0x19a   : > { %2349 = vmatpush1.bf16.msra.mxu1 %v2288_v20  ;;  %2366 = vmatprep.mubr.bf16.mxu1 %v4815_v3 }
 0x19b   : > { %3624 = vrot.lane.b32.xlu1 %v4677_v14, %s4828_s17  ;;  %4594 = vmatprep.subr.msk.bf16.mxu1 %vm328_vm4, %v4591_v23  ;;  %v2677_v24 = vpop.permute.xlu0 %2676  ;;  %v2675_v38 = vpop.permute.xlu1 %2674  ;;  %v4709_v14 = vcombine.low %v4006_v32, %v4006_v32  ;;  %v4007_v23 = vsel %vm5383_vm7, %v5697_v37, 0  ;;  %vm6540_vm7 = vcmask 982016  }
 0x19c   : > { %3502 = vrot.lane.b32.xlu0 %v4671_v9, %s4820_s30  ;;  %v2683_v48 = vsel %vm6530_vm1, %v2675_v38, %v2677_v24  ;;  %v2682_v1 = vsel %vm6532_vm6, %v2673_v8, %v2675_v38  ;;  %v4711_v20 = vcombine.low %v4007_v23, %v4007_v23  ;;  %v4139_v9 = vsel %vm6539_vm10, %v5686_v15, 0  ;;  %vm6541_vm12 = vmmov %vm6540_vm7 }
 0x19d   : > { %4584 = vmatmul.mubr.msk.bf16.vlgmr.msra.gmra.mxu0 %vm409_vm2, %v4577_v59  ;;  %v2690_v53 = vsel %vm328_vm4, %v2682_v1, 0  ;;  %v4719_v25 = vcombine.low %v4139_v9, %v4139_v9  ;;  %v4720_v8 = vcombine.high %v4139_v9, %v4139_v9  ;;  %vm6542_vm15 = vmmov %vm6540_vm7  ;;  %vm6544_vm1 = vcmask 973824   ;;  %v4636_v1 = vld [vmem:[%s6390_s1 + $0x48] sm:$0xf] }
 0x19e   : > { %2423 = vmatpush1.bf16.msra.mxu0 %v2397_v27  ;;  %2440 = vmatprep.mubr.bf16.mxu0 %v4815_v3  ;;  %vm6543_vm13 = vmmov %vm6540_vm7 }
 0x19f   : > { %4602 = vmatprep.subr.msk.bf16.mxu0 %vm328_vm4, %v2538_v12  ;;  %3628 = vrot.lane.b32.xlu1 %v4679_v10, %s4828_s17  ;;  %v2681_v18 = vpop.permute.xlu0 %2680  ;;  %v2679_v41 = vpop.permute.xlu1 %2678  ;;  %vm6545_vm9 = vmmov %vm6544_vm1 }
 0x1a0   : > { %3626 = vrot.lane.b32.xlu0 %v4678_v0, %s4828_s17  ;;  %v2685_v5 = vsel %vm6533_vm3, %v2679_v41, %v2681_v18  ;;  %v2684_v30 = vsel %vm6535_vm11, %v2677_v24, %v2679_v41  ;;  %v4616_v0 = vld [vmem:[%s6390_s1 + $0x40] sm:$0xf]  ;;  %vm6546_vm6 = vmmov %vm6544_vm1 }
 0x1a1   : > { %4586 = vmatmul.mubr.msk.bf16.vlgmr.msra.gmra.mxu1 %vm409_vm2, %v4577_v59  ;;  %v2696_v42 = vsel %vm328_vm4, %v2684_v30, 0  ;;  %v4721_v59 = vcombine.low %v4140_v21, %v4140_v21  ;;  %vm6547_vm3 = vmmov %vm6544_vm1 }
 0x1a2   : > { %2464 = vmatpush1.bf16.msra.mxu1 %v2403_v55  ;;  %2481 = vmatprep.mubr.bf16.mxu1 %v4815_v3  ;;  %vm6549_vm11 = vmmov %vm6548_vm14 }
 0x1a3   : > { %4604 = vmatprep.subr.msk.bf16.mxu1 %vm328_vm4, %v2540_v34  ;;  %3632 = vrot.lane.b32.xlu1 %v4681_v26, %s4828_s17  ;;  %vm6550_vm0 = vmmov %vm6549_vm11 }
 0x1a4   : > { %3630 = vrot.lane.b32.xlu0 %v4680_v39, %s4828_s17  ;;  %vm6551_vm5 = vmmov %vm6550_vm0 }
 0x1a5   : > { %4593 = vmatmul.mubr.msk.bf16.vlgmr.msra.gmra.mxu0 %vm409_vm2, %v4587_v29  ;;  %vm6553_vm10 = vmmov %vm6552_vm8 }
 0x1a6   : > { %2571 = vmatpush1.bf16.msra.mxu0 %v2545_v40  ;;  %2588 = vmatprep.mubr.bf16.mxu0 %v4815_v3 }
 0x1a7   : > { %4612 = vmatprep.subr.msk.bf16.mxu0 %vm328_vm4, %v2683_v48  ;;  %3759 = vrot.lane.b32.xlu1 %v4688_v47, %s4819_s29 }
 0x1a8   : > { %3757 = vrot.lane.b32.xlu0 %v4687_v51, %s4819_s29  ;;  %v4626_v51 = vld [vmem:[%s6390_s1 + $0x44] sm:$0xf] }
 0x1a9   : > { %4595 = vmatmul.mubr.msk.bf16.vlgmr.msra.gmra.mxu1 %vm409_vm2, %v4587_v29 }
 0x1aa   : > { %2612 = vmatpush1.bf16.msra.mxu1 %v2551_v36  ;;  %2629 = vmatprep.mubr.bf16.mxu1 %v4815_v3 }
 0x1ab   : > { %4614 = vmatprep.subr.msk.bf16.mxu1 %vm328_vm4, %v2685_v5  ;;  %3763 = vrot.lane.b32.xlu1 %v4690_v31, %s4819_s29 }
 0x1ac   : > { %3761 = vrot.lane.b32.xlu0 %v4689_v45, %s4819_s29 }
 0x1ad   : > { %4603 = vmatmul.mubr.msk.bf16.vlgmr.msra.gmra.mxu0 %vm409_vm2, %v4596_v50 }
 0x1ae   : > { %2716 = vmatpush1.bf16.msra.mxu0 %v2690_v53  ;;  %2733 = vmatprep.mubr.bf16.mxu0 %v4815_v3 }
 0x1af   : > { %3890 = vrot.lane.b32.xlu1 %v4697_v61, %s4818_s28 }
 0x1b0   : > { %3765 = vrot.lane.b32.xlu0 %v4691_v57, %s4819_s29  ;;  %s4456_s29 = sshll.u32 %s6590_s18, 3 }
 0x1b1   : > { %4605 = vmatmul.mubr.msk.bf16.vlgmr.msra.gmra.mxu1 %vm409_vm2, %v4596_v50  ;;  %s280_s23 = scalar_lea.vmem %s6394_s5, %s4456_s29 }
 0x1b2   : > { %2757 = vmatpush1.bf16.msra.mxu1 %v2696_v42  ;;  %2774 = vmatprep.mubr.bf16.mxu1 %v4815_v3 }
 0x1b3   : > { %3894 = vrot.lane.b32.xlu1 %v4699_v63, %s4818_s28 }
 0x1b4   : > { %3892 = vrot.lane.b32.xlu0 %v4698_v56, %s4818_s28 }
 0x1b5   : > { %4613 = vmatmul.mubr.msk.bf16.vlgmr.msra.gmra.mxu0 %vm409_vm2, %v4606_v16 }
 0x1b6   : > { %2878 = vmatprep.mubr.bf16.mxu0 %v4815_v3 }
 0x1b7   : > { %3898 = vrot.lane.b32.xlu1 %v4701_v6, %s4818_s28  ;;  %v4646_v6 = vld [vmem:[%s6390_s1 + $0x4c] sm:$0xf] }
 0x1b8   : > { %3896 = vrot.lane.b32.xlu0 %v4700_v4, %s4818_s28 }
 0x1b9   : > { %4615 = vmatmul.mubr.msk.bf16.vlgmr.msra.gmra.mxu1 %vm409_vm2, %v4606_v16 }
 0x1ba   : > { %2919 = vmatprep.mubr.bf16.mxu1 %v4815_v3 }
 0x1bb   : > { %4025 = vrot.lane.b32.xlu1 %v4708_v11, %s4816_s26 }
 0x1bc   : > { %4023 = vrot.lane.b32.xlu0 %v4707_v19, %s4816_s26 }
 0x1bf   : > { %4029 = vrot.lane.b32.xlu1 %v4710_v17, %s4816_s26 }
 0x1c0   : > { %4027 = vrot.lane.b32.xlu0 %v4709_v14, %s4816_s26 }
 0x1c3   : > { %4156 = vrot.lane.b32.xlu1 %v4717_v58, %s4817_s27 }
 0x1c4   : > { %4031 = vrot.lane.b32.xlu0 %v4711_v20, %s4816_s26 }
 0x1c7   : > { %4160 = vrot.lane.b32.xlu1 %v4719_v25, %s4817_s27  ;;  %v4656_v25 = vld [vmem:[%s6390_s1 + $0x50] sm:$0xf] }
 0x1c8   : > { %4158 = vrot.lane.b32.xlu0 %v4718_v54, %s4817_s27 }
 0x1cb   : > { %4164 = vrot.lane.b32.xlu1 %v4721_v59, %s4817_s27 }
 0x1cc   : > { %4162 = vrot.lane.b32.xlu0 %v4720_v8, %s4817_s27 }
 0x1cd   : > { %v2820_v60 = vpop.permute.xlu0 %2819 }
 0x1ce   : > { %v2818_v15 = vpop.permute.xlu1 %2817 }
 0x1cf   : > { %v2827_v2 = vsel %vm6540_vm7, %v2818_v15, %v2820_v60  ;;  %vm6554_vm7 = vmmov %vm6552_vm8 }
 0x1d0   : > { %v2835_v22 = vsel %vm328_vm4, %v2827_v2, 0 }
 0x1d2   : > { %v2824_v27 = vpop.permute.xlu0 %2823  ;;  %v2822_v10 = vpop.permute.xlu1 %2821 }
 0x1d3   : > { %v2828_v44 = vsel %vm6541_vm12, %v2820_v60, %v2822_v10  ;;  %v2829_v37 = vsel %vm6542_vm15, %v2822_v10, %v2824_v27  ;;  %vm6555_vm12 = vmmov %vm6554_vm7  ;;  %vm6556_vm15 = vcmask 580608  }
 0x1d4   : > { %4622 = vmatprep.subr.msk.bf16.mxu0 %vm328_vm4, %v2828_v44  ;;  %v2841_v26 = vsel %vm328_vm4, %v2829_v37, 0 }
 0x1d5   : > { %2861 = vmatpush1.bf16.msra.mxu0 %v2835_v22 }
 0x1d6   : > { %v2826_v12 = vpop.permute.xlu1 %2825 }
 0x1d7   : > { %v2830_v55 = vsel %vm6543_vm13, %v2824_v27, %v2826_v12  ;;  %vm6557_vm13 = vmmov %vm6556_vm15 }
 0x1d8   : > { %4623 = vmatmul.mubr.msk.bf16.vlgmr.msra.gmra.mxu0 %vm409_vm2, %v4616_v0  ;;  %4624 = vmatprep.subr.msk.bf16.mxu1 %vm328_vm4, %v2830_v55 }
 0x1d9   : > { %2902 = vmatpush1.bf16.msra.mxu1 %v2841_v26  ;;  %3023 = vmatprep.mubr.bf16.mxu0 %v4815_v3 }
 0x1dc   : > { %4625 = vmatmul.mubr.msk.bf16.vlgmr.msra.gmra.mxu1 %vm409_vm2, %v4616_v0 }
 0x1dd   : > { %v2965_v39 = vpop.permute.xlu1 %2964  ;;  %3064 = vmatprep.mubr.bf16.mxu1 %v4815_v3 }
 0x1de   : > { %v2963_v24 = vpop.permute.xlu0 %2962 }
 0x1df   : > { %v2972_v38 = vsel %vm6544_vm1, %v2963_v24, %v2965_v39  ;;  %vm6558_vm1 = vmmov %vm6557_vm13 }
 0x1e0   : > { %v2980_v29 = vsel %vm328_vm4, %v2972_v38, 0 }
 0x1e1   : > { %v2969_v46 = vpop.permute.xlu1 %2968 }
 0x1e2   : > { %v2967_v35 = vpop.permute.xlu0 %2966 }
 0x1e3   : > { %v2973_v34 = vsel %vm6545_vm9, %v2965_v39, %v2967_v35  ;;  %v2974_v47 = vsel %vm6546_vm6, %v2967_v35, %v2969_v46  ;;  %vm6559_vm9 = vmmov %vm6558_vm1  ;;  %vm6560_vm6 = vcmask 531456  }
 0x1e4   : > { %4632 = vmatprep.subr.msk.bf16.mxu0 %vm328_vm4, %v2973_v34  ;;  %v2986_v48 = vsel %vm328_vm4, %v2974_v47, 0 }
 0x1e5   : > { %3006 = vmatpush1.bf16.msra.mxu0 %v2980_v29  ;;  %v3096_v40 = vpop.permute.xlu1 %3095 }
 0x1e6   : > { %v2971_v43 = vpop.permute.xlu0 %2970 }
 0x1e7   : > { %v2975_v62 = vsel %vm6547_vm3, %v2969_v46, %v2971_v43  ;;  %vm6561_vm3 = vmmov %vm6560_vm6 }
 0x1e8   : > { %4633 = vmatmul.mubr.msk.bf16.vlgmr.msra.gmra.mxu0 %vm409_vm2, %v4626_v51  ;;  %4634 = vmatprep.subr.msk.bf16.mxu1 %vm328_vm4, %v2975_v62 }
 0x1e9   : > { %3047 = vmatpush1.bf16.msra.mxu1 %v2986_v48  ;;  %v3100_v18 = vpop.permute.xlu1 %3099  ;;  %3156 = vmatprep.mubr.bf16.mxu0 %v4815_v3 }
 0x1ea   : > { %v3098_v41 = vpop.permute.xlu0 %3097 }
 0x1eb   : > { %v3105_v31 = vsel %vm6548_vm14, %v3096_v40, %v3098_v41  ;;  %v3106_v36 = vsel %vm6549_vm11, %v3098_v41, %v3100_v18  ;;  %vm6562_vm14 = vmmov %vm6561_vm3 }
 0x1ec   : > { %v3113_v45 = vsel %vm328_vm4, %v3105_v31, 0  ;;  %4635 = vmatmul.mubr.msk.bf16.vlgmr.msra.gmra.mxu1 %vm409_vm2, %v4626_v51  ;;  %4642 = vmatprep.subr.msk.bf16.mxu0 %vm328_vm4, %v3106_v36  ;;  %vm6563_vm11 = vmmov %vm6561_vm3 }
 0x1ed   : > { %3139 = vmatpush1.bf16.msra.mxu0 %v3113_v45  ;;  %v3104_v7 = vpop.permute.xlu1 %3103  ;;  %3197 = vmatprep.mubr.bf16.mxu1 %v4815_v3 }
 0x1ee   : > { %v3102_v5 = vpop.permute.xlu0 %3101 }
 0x1ef   : > { %v3107_v50 = vsel %vm6550_vm0, %v3100_v18, %v3102_v5  ;;  %v3108_v33 = vsel %vm6551_vm5, %v3102_v5, %v3104_v7  ;;  %v4666_v18 = vld [vmem:[%s6390_s1 + $0x54] sm:$0xf]  ;;  %vm6564_vm0 = vcmask 523264  }
 0x1f0   : > { %v3119_v61 = vsel %vm328_vm4, %v3107_v50, 0  ;;  %4643 = vmatmul.mubr.msk.bf16.vlgmr.msra.gmra.mxu0 %vm409_vm2, %v4636_v1  ;;  %4644 = vmatprep.subr.msk.bf16.mxu1 %vm328_vm4, %v3108_v33  ;;  %vm6565_vm5 = vmmov %vm6564_vm0 }
 0x1f1   : > { %3180 = vmatpush1.bf16.msra.mxu1 %v3119_v61  ;;  %v3231_v53 = vpop.permute.xlu1 %3230  ;;  %3289 = vmatprep.mubr.bf16.mxu0 %v4815_v3 }
 0x1f2   : > { %v3229_v28 = vpop.permute.xlu0 %3228 }
 0x1f3   : > { %v3238_v57 = vsel %vm6552_vm8, %v3229_v28, %v3231_v53  ;;  %vm6566_vm8 = vmmov %vm6564_vm0 }
 0x1f4   : > { %4645 = vmatmul.mubr.msk.bf16.vlgmr.msra.gmra.mxu1 %vm409_vm2, %v4636_v1  ;;  %v3246_v56 = vsel %vm328_vm4, %v3238_v57, 0 }
 0x1f5   : > { %v3235_v30 = vpop.permute.xlu1 %3234  ;;  %3330 = vmatprep.mubr.bf16.mxu1 %v4815_v3 }
 0x1f6   : > { %v3233_v63 = vpop.permute.xlu0 %3232 }
 0x1f7   : > { %v3239_v42 = vsel %vm6553_vm10, %v3231_v53, %v3233_v63  ;;  %v3240_v52 = vsel %vm6554_vm7, %v3233_v63, %v3235_v30  ;;  %vm6567_vm10 = vmmov %vm6564_vm0  ;;  %vm6568_vm7 = vcmask 515072  }
 0x1f8   : > { %4652 = vmatprep.subr.msk.bf16.mxu0 %vm328_vm4, %v3239_v42  ;;  %v3252_v11 = vsel %vm328_vm4, %v3240_v52, 0 }
 0x1f9   : > { %3272 = vmatpush1.bf16.msra.mxu0 %v3246_v56  ;;  %v3362_v16 = vpop.permute.xlu1 %3361 }
 0x1fa   : > { %v3237_v4 = vpop.permute.xlu0 %3236 }
 0x1fb   : > { %v3241_v13 = vsel %vm6555_vm12, %v3235_v30, %v3237_v4  ;;  %vm6569_vm12 = vmmov %vm6568_vm7 }
 0x1fc   : > { %4653 = vmatmul.mubr.msk.bf16.vlgmr.msra.gmra.mxu0 %vm409_vm2, %v4646_v6  ;;  %4654 = vmatprep.subr.msk.bf16.mxu1 %vm328_vm4, %v3241_v13  ;;  %v4676_v13 = vld [vmem:[%s6390_s1 + $0x58] sm:$0xf] }
 0x1fd   : > { %3313 = vmatpush1.bf16.msra.mxu1 %v3252_v11  ;;  %v460_v19 = vpop.f32.mrf.mxu0  ;;  %v3366_v32 = vpop.permute.xlu1 %3365  ;;  %3422 = vmatprep.mubr.bf16.mxu0 %v4815_v3 }
 0x1fe   : > { %v3364_v17 = vpop.permute.xlu0 %3363 }
 0x1ff   : > { %v3371_v14 = vsel %vm6556_vm15, %v3362_v16, %v3364_v17  ;;  %v3372_v49 = vsel %vm6557_vm13, %v3364_v17, %v3366_v32  ;;  %v462_v23 = vpop.f32.mrf.mxu0  ;;  %vm6570_vm15 = vmmov %vm6568_vm7 }
 0x200   : > { %v3379_v58 = vsel %vm328_vm4, %v3371_v14, 0  ;;  %4655 = vmatmul.mubr.msk.bf16.vlgmr.msra.gmra.mxu1 %vm409_vm2, %v4646_v6  ;;  %4662 = vmatprep.subr.msk.bf16.mxu0 %vm328_vm4, %v3372_v49  ;;  %vm6571_vm13 = vmmov %vm6568_vm7 }
 0x201   : > { %3405 = vmatpush1.bf16.msra.mxu0 %v3379_v58  ;;  %v464_v20 = vpop.f32.mrf.mxu0  ;;  %v501_v9 = vpop.f32.mrf.mxu1  ;;  %3463 = vmatprep.mubr.bf16.mxu1 %v4815_v3 }
 0x202   : > { %v3368_v54 = vpop.permute.xlu0 %3367  ;;  %v3370_v21 = vpop.permute.xlu1 %3369 }
 0x203   : > { %v3373_v59 = vsel %vm6558_vm1, %v3366_v32, %v3368_v54  ;;  %v3374_v8 = vsel %vm6559_vm9, %v3368_v54, %v3370_v21  ;;  %v465_v60 = vpop.f32.mrf.mxu0  ;;  %v503_v15 = vpop.f32.mrf.mxu1  ;;  %vm6572_vm1 = vcmask 465920  }
 0x204   : > { %v3385_v2 = vsel %vm328_vm4, %v3373_v59, 0  ;;  %4663 = vmatmul.mubr.msk.bf16.vlgmr.msra.gmra.mxu0 %vm409_vm2, %v4656_v25  ;;  %4664 = vmatprep.subr.msk.bf16.mxu1 %vm328_vm4, %v3374_v8  ;;  %vm6573_vm9 = vmmov %vm6572_vm1 }
 0x205   : > { %3446 = vmatpush1.bf16.msra.mxu1 %v3385_v2  ;;  %v505_v27 = vpop.f32.mrf.mxu1  ;;  %v585_v10 = vpop.f32.mrf.mxu0  ;;  %3555 = vmatprep.mubr.bf16.mxu0 %v4815_v3 }
 0x206   : > { %v586_v44 = vadd.f32 %v585_v10, %v460_v19  ;;  %v3495_v22 = vpop.permute.xlu0 %3494  ;;  %v3497_v37 = vpop.permute.xlu1 %3496 }
 0x207   : > { %v506_v0 = vpop.f32.mrf.mxu1  ;;  %v587_v12 = vpop.f32.mrf.mxu0  ;;  %v3504_v26 = vsel %vm6560_vm6, %v3495_v22, %v3497_v37  ;;  %vm6574_vm6 = vmmov %vm6572_vm1 }
 0x208   : > { %v588_v55 = vadd.f32 %v587_v12, %v462_v23  ;;  %4665 = vmatmul.mubr.msk.bf16.vlgmr.msra.gmra.mxu1 %vm409_vm2, %v4656_v25  ;;  %v3512_v40 = vsel %vm328_vm4, %v3504_v26, 0 }
 0x209   : > { %v589_v39 = vpop.f32.mrf.mxu0  ;;  %v626_v24 = vpop.f32.mrf.mxu1  ;;  %3596 = vmatprep.mubr.bf16.mxu1 %v4815_v3 }
 0x20a   : > { %v627_v38 = vadd.f32 %v626_v24, %v501_v9  ;;  %v3499_v46 = vpop.permute.xlu0 %3498  ;;  %v3501_v35 = vpop.permute.xlu1 %3500 }
 0x20b   : > { %v3505_v34 = vsel %vm6561_vm3, %v3497_v37, %v3499_v46  ;;  %v590_v29 = vpop.f32.mrf.mxu0  ;;  %v628_v47 = vpop.f32.mrf.mxu1  ;;  %v3506_v43 = vsel %vm6562_vm14, %v3499_v46, %v3501_v35  ;;  %vm6575_vm3 = vmmov %vm6572_vm1  ;;  %vm6576_vm14 = vcmask 457728  }
 0x20c   : > { %v629_v51 = vadd.f32 %v628_v47, %v503_v15  ;;  %4672 = vmatprep.subr.msk.bf16.mxu0 %vm328_vm4, %v3505_v34  ;;  %v3518_v5 = vsel %vm328_vm4, %v3506_v43, 0 }
 0x20d   : > { %3538 = vmatpush1.bf16.msra.mxu0 %v3512_v40  ;;  %v630_v62 = vpop.f32.mrf.mxu1  ;;  %v754_v48 = vpop.f32.mrf.mxu0 }
 0x20e   : > { %v802_v41 = vadd.f32 %v754_v48, %v586_v44  ;;  %v3503_v31 = vpop.permute.xlu0 %3502  ;;  %v3625_v36 = vpop.permute.xlu1 %3624 }
 0x20f   : > { %v3507_v45 = vsel %vm6563_vm11, %v3501_v35, %v3503_v31  ;;  %v631_v7 = vpop.f32.mrf.mxu1  ;;  %v756_v1 = vpop.f32.mrf.mxu0  ;;  %v4686_v35 = vld [vmem:[%s6390_s1 + $0x5c] sm:$0xf]  ;;  %vm6577_vm11 = vmmov %vm6576_vm14 }
 0x210   : > { %v803_v50 = vadd.f32 %v756_v1, %v588_v55  ;;  %4673 = vmatmul.mubr.msk.bf16.vlgmr.msra.gmra.mxu0 %vm409_vm2, %v4666_v18  ;;  %4674 = vmatprep.subr.msk.bf16.mxu1 %vm328_vm4, %v3507_v45 }
 0x211   : > { %3579 = vmatpush1.bf16.msra.mxu1 %v3518_v5  ;;  %v758_v33 = vpop.f32.mrf.mxu0  ;;  %v795_v61 = vpop.f32.mrf.mxu1  ;;  %3685 = vmatprep.mubr.bf16.mxu0 %v4815_v3 }
 0x212   : > { %v804_v53 = vadd.f32 %v795_v61, %v627_v38  ;;  %v3627_v28 = vpop.permute.xlu0 %3626  ;;  %v3629_v57 = vpop.permute.xlu1 %3628 }
 0x213   : > { %v3634_v30 = vsel %vm6564_vm0, %v3625_v36, %v3627_v28  ;;  %v3635_v63 = vsel %vm6565_vm5, %v3627_v28, %v3629_v57  ;;  %v759_v42 = vpop.f32.mrf.mxu0  ;;  %v797_v56 = vpop.f32.mrf.mxu1  ;;  %vm6578_vm0 = vmmov %vm6577_vm11 }
 0x214   : > { %v3642_v52 = vsel %vm328_vm4, %v3634_v30, 0  ;;  %v805_v16 = vadd.f32 %v797_v56, %v629_v51  ;;  %4675 = vmatmul.mubr.msk.bf16.vlgmr.msra.gmra.mxu1 %vm409_vm2, %v4666_v18  ;;  %4682 = vmatprep.subr.msk.bf16.mxu0 %vm328_vm4, %v3635_v63  ;;  %vm6579_vm5 = vmmov %vm6578_vm0 }
 0x215   : > { %3668 = vmatpush1.bf16.msra.mxu0 %v3642_v52  ;;  %v799_v6 = vpop.f32.mrf.mxu1  ;;  %v926_v4 = vpop.f32.mrf.mxu0  ;;  %3726 = vmatprep.mubr.bf16.mxu1 %v4815_v3 }
 0x216   : > { %v974_v11 = vadd.f32 %v926_v4, %v802_v41  ;;  %v3631_v19 = vpop.permute.xlu0 %3630  ;;  %v3633_v32 = vpop.permute.xlu1 %3632 }
 0x217   : > { %v3636_v17 = vsel %vm6566_vm8, %v3629_v57, %v3631_v19  ;;  %v3637_v14 = vsel %vm6567_vm10, %v3631_v19, %v3633_v32  ;;  %v800_v49 = vpop.f32.mrf.mxu1  ;;  %v928_v23 = vpop.f32.mrf.mxu0  ;;  %v4696_v57 = vld [vmem:[%s6390_s1 + $0x60] sm:$0xf]  ;;  %vm6580_vm8 = vcmask 449536  }
 0x218   : > { %v3648_v58 = vsel %vm328_vm4, %v3636_v17, 0  ;;  %v975_v20 = vadd.f32 %v928_v23, %v803_v50  ;;  %4683 = vmatmul.mubr.msk.bf16.vlgmr.msra.gmra.mxu0 %vm409_vm2, %v4676_v13  ;;  %4684 = vmatprep.subr.msk.bf16.mxu1 %vm328_vm4, %v3637_v14  ;;  %vm6581_vm10 = vmmov %vm6580_vm8 }
 0x219   : > { %3709 = vmatpush1.bf16.msra.mxu1 %v3648_v58  ;;  %v930_v9 = vpop.f32.mrf.mxu0  ;;  %v967_v25 = vpop.f32.mrf.mxu1  ;;  %3818 = vmatprep.mubr.bf16.mxu0 %v4815_v3 }
 0x21a   : > { %v976_v54 = vadd.f32 %v967_v25, %v804_v53  ;;  %v3758_v21 = vpop.permute.xlu0 %3757  ;;  %v3760_v59 = vpop.permute.xlu1 %3759 }
 0x21b   : > { %v931_v8 = vpop.f32.mrf.mxu0  ;;  %v969_v60 = vpop.f32.mrf.mxu1  ;;  %v3767_v2 = vsel %vm6568_vm7, %v3758_v21, %v3760_v59  ;;  %vm6582_vm7 = vmmov %vm6580_vm8 }
 0x21c   : > { %v977_v15 = vadd.f32 %v969_v60, %v805_v16  ;;  %4685 = vmatmul.mubr.msk.bf16.vlgmr.msra.gmra.mxu1 %vm409_vm2, %v4676_v13  ;;  %v3775_v26 = vsel %vm328_vm4, %v3767_v2, 0 }
 0x21d   : > { %v971_v27 = vpop.f32.mrf.mxu1  ;;  %v1057_v10 = vpop.f32.mrf.mxu0  ;;  %3859 = vmatprep.mubr.bf16.mxu1 %v4815_v3 }
 0x21e   : > { %v1105_v44 = vadd.f32 %v1057_v10, %v974_v11  ;;  %v3762_v22 = vpop.permute.xlu0 %3761  ;;  %v3764_v37 = vpop.permute.xlu1 %3763 }
 0x21f   : > { %v3768_v0 = vsel %vm6569_vm12, %v3760_v59, %v3762_v22  ;;  %v972_v12 = vpop.f32.mrf.mxu1  ;;  %v1059_v55 = vpop.f32.mrf.mxu0  ;;  %v3769_v24 = vsel %vm6570_vm15, %v3762_v22, %v3764_v37  ;;  %vm6583_vm12 = vmmov %vm6582_vm7 }
 0x220   : > { %v1106_v39 = vadd.f32 %v1059_v55, %v975_v20  ;;  %4692 = vmatprep.subr.msk.bf16.mxu0 %vm328_vm4, %v3768_v0  ;;  %v3781_v62 = vsel %vm328_vm4, %v3769_v24, 0 }
 0x221   : > { %3801 = vmatpush1.bf16.msra.mxu0 %v3775_v26  ;;  %v1061_v38 = vpop.f32.mrf.mxu0  ;;  %v1098_v46 = vpop.f32.mrf.mxu1 }
 0x222   : > { %v1107_v34 = vadd.f32 %v1098_v46, %v976_v54  ;;  %v3766_v29 = vpop.permute.xlu0 %3765  ;;  %v3891_v47 = vpop.permute.xlu1 %3890 }
 0x223   : > { %v3770_v40 = vsel %vm6571_vm13, %v3764_v37, %v3766_v29  ;;  %v1062_v51 = vpop.f32.mrf.mxu0  ;;  %v1100_v43 = vpop.f32.mrf.mxu1  ;;  %v4706_v37 = vld [vmem:[%s6390_s1 + $0x64] sm:$0xf] }
 0x224   : > { %v1108_v48 = vadd.f32 %v1100_v43, %v977_v15  ;;  %4693 = vmatmul.mubr.msk.bf16.vlgmr.msra.gmra.mxu0 %vm409_vm2, %v4686_v35  ;;  %4694 = vmatprep.subr.msk.bf16.mxu1 %vm328_vm4, %v3770_v40 }
 0x225   : > { %3842 = vmatpush1.bf16.msra.mxu1 %v3781_v62  ;;  %v1102_v18 = vpop.f32.mrf.mxu1  ;;  %v1227_v41 = vpop.f32.mrf.mxu0  ;;  %3951 = vmatprep.mubr.bf16.mxu0 %v4815_v3 }
 0x226   : > { %v1275_v31 = vadd.f32 %v1227_v41, %v1105_v44  ;;  %v3893_v36 = vpop.permute.xlu0 %3892  ;;  %v3895_v45 = vpop.permute.xlu1 %3894 }
 0x227   : > { %v3900_v7 = vsel %vm6572_vm1, %v3891_v47, %v3893_v36  ;;  %v3901_v1 = vsel %vm6573_vm9, %v3893_v36, %v3895_v45  ;;  %v1103_v5 = vpop.f32.mrf.mxu1  ;;  %v1229_v50 = vpop.f32.mrf.mxu0 }
 0x228   : > { %v3908_v33 = vsel %vm328_vm4, %v3900_v7, 0  ;;  %v1276_v61 = vadd.f32 %v1229_v50, %v1106_v39  ;;  %4695 = vmatmul.mubr.msk.bf16.vlgmr.msra.gmra.mxu1 %vm409_vm2, %v4686_v35  ;;  %4702 = vmatprep.subr.msk.bf16.mxu0 %vm328_vm4, %v3901_v1 }
 0x229   : > { %3934 = vmatpush1.bf16.msra.mxu0 %v3908_v33  ;;  %v1231_v53 = vpop.f32.mrf.mxu0  ;;  %v1268_v28 = vpop.f32.mrf.mxu1  ;;  %3992 = vmatprep.mubr.bf16.mxu1 %v4815_v3 }
 0x22a   : > { %v1277_v30 = vadd.f32 %v1268_v28, %v1107_v34  ;;  %v3897_v63 = vpop.permute.xlu0 %3896  ;;  %v3899_v42 = vpop.permute.xlu1 %3898 }
 0x22b   : > { %v3902_v56 = vsel %vm6574_vm6, %v3895_v45, %v3897_v63  ;;  %v3903_v52 = vsel %vm6575_vm3, %v3897_v63, %v3899_v42  ;;  %v1232_v16 = vpop.f32.mrf.mxu0  ;;  %v1270_v6 = vpop.f32.mrf.mxu1  ;;  %v4716_v45 = vld [vmem:[%s6390_s1 + $0x68] sm:$0xf] }
 0x22c   : > { %v3914_v4 = vsel %vm328_vm4, %v3902_v56, 0  ;;  %v1278_v13 = vadd.f32 %v1270_v6, %v1108_v48  ;;  %4703 = vmatmul.mubr.msk.bf16.vlgmr.msra.gmra.mxu0 %vm409_vm2, %v4696_v57  ;;  %4704 = vmatprep.subr.msk.bf16.mxu1 %vm328_vm4, %v3903_v52 }
 0x22d   : > { %3975 = vmatpush1.bf16.msra.mxu1 %v3914_v4  ;;  %v1272_v11 = vpop.f32.mrf.mxu1  ;;  %v1398_v19 = vpop.f32.mrf.mxu0  ;;  %4084 = vmatprep.mubr.bf16.mxu0 %v4815_v3 }
 0x22e   : > { %v1446_v32 = vadd.f32 %v1398_v19, %v1275_v31  ;;  %v4024_v17 = vpop.permute.xlu0 %4023  ;;  %v4026_v14 = vpop.permute.xlu1 %4025 }
 0x22f   : > { %v1273_v49 = vpop.f32.mrf.mxu1  ;;  %v1400_v23 = vpop.f32.mrf.mxu0  ;;  %v4033_v20 = vsel %vm6576_vm14, %v4024_v17, %v4026_v14 }
 0x230   : > { %v1447_v58 = vadd.f32 %v1400_v23, %v1276_v61  ;;  %4705 = vmatmul.mubr.msk.bf16.vlgmr.msra.gmra.mxu1 %vm409_vm2, %v4696_v57  ;;  %v4041_v2 = vsel %vm328_vm4, %v4033_v20, 0 }
 0x231   : > { %v1402_v9 = vpop.f32.mrf.mxu0  ;;  %v1439_v25 = vpop.f32.mrf.mxu1  ;;  %4125 = vmatprep.mubr.bf16.mxu1 %v4815_v3 }
 0x232   : > { %v1448_v54 = vadd.f32 %v1439_v25, %v1277_v30  ;;  %v4028_v21 = vpop.permute.xlu0 %4027  ;;  %v4030_v59 = vpop.permute.xlu1 %4029 }
 0x233   : > { %v4034_v8 = vsel %vm6577_vm11, %v4026_v14, %v4028_v21  ;;  %v1403_v60 = vpop.f32.mrf.mxu0  ;;  %v1441_v15 = vpop.f32.mrf.mxu1  ;;  %v4035_v10 = vsel %vm6578_vm0, %v4028_v21, %v4030_v59 }
 0x234   : > { %v1449_v27 = vadd.f32 %v1441_v15, %v1278_v13  ;;  %4712 = vmatprep.subr.msk.bf16.mxu0 %vm328_vm4, %v4034_v8  ;;  %v4047_v38 = vsel %vm328_vm4, %v4035_v10, 0 }
 0x235   : > { %4067 = vmatpush1.bf16.msra.mxu0 %v4041_v2  ;;  %v1443_v44 = vpop.f32.mrf.mxu1  ;;  %v1568_v22 = vpop.f32.mrf.mxu0 }
 0x236   : > { %v1616_v0 = vadd.f32 %v1568_v22, %v1446_v32  ;;  %v4032_v12 = vpop.permute.xlu0 %4031  ;;  %v4157_v55 = vpop.permute.xlu1 %4156 }
 0x237   : > { %v4036_v26 = vsel %vm6579_vm5, %v4030_v59, %v4032_v12  ;;  %v1444_v39 = vpop.f32.mrf.mxu1  ;;  %v1570_v24 = vpop.f32.mrf.mxu0 }
 0x238   : > { %v1617_v46 = vadd.f32 %v1570_v24, %v1447_v58  ;;  %4713 = vmatmul.mubr.msk.bf16.vlgmr.msra.gmra.mxu0 %vm409_vm2, %v4706_v37  ;;  %4714 = vmatprep.subr.msk.bf16.mxu1 %vm328_vm4, %v4036_v26 }
 0x239   : > { %4108 = vmatpush1.bf16.msra.mxu1 %v4047_v38  ;;  %v1572_v35 = vpop.f32.mrf.mxu0  ;;  %v1609_v34 = vpop.f32.mrf.mxu1  ;;  %4217 = vmatprep.mubr.bf16.mxu0 %v4815_v3 }
 0x23a   : > { %v1618_v29 = vadd.f32 %v1609_v34, %v1448_v54  ;;  %v4159_v47 = vpop.permute.xlu0 %4158  ;;  %v4161_v40 = vpop.permute.xlu1 %4160 }
 0x23b   : > { %v4166_v51 = vsel %vm6580_vm8, %v4157_v55, %v4159_v47  ;;  %v4167_v43 = vsel %vm6581_vm10, %v4159_v47, %v4161_v40  ;;  %v1573_v62 = vpop.f32.mrf.mxu0  ;;  %v1611_v48 = vpop.f32.mrf.mxu1 }
 0x23c   : > { %v4174_v18 = vsel %vm328_vm4, %v4166_v51, 0  ;;  %v1619_v41 = vadd.f32 %v1611_v48, %v1449_v27  ;;  %4715 = vmatmul.mubr.msk.bf16.vlgmr.msra.gmra.mxu1 %vm409_vm2, %v4706_v37  ;;  %4722 = vmatprep.subr.msk.bf16.mxu0 %vm328_vm4, %v4167_v43 }
 0x23d   : > { %4200 = vmatpush1.bf16.msra.mxu0 %v4174_v18  ;;  %v1613_v31 = vpop.f32.mrf.mxu1  ;;  %v1739_v36 = vpop.f32.mrf.mxu0  ;;  %4258 = vmatprep.mubr.bf16.mxu1 %v4815_v3 }
 0x23e   : > { %v1787_v7 = vadd.f32 %v1739_v36, %v1616_v0  ;;  %v4163_v1 = vpop.permute.xlu0 %4162  ;;  %v4165_v5 = vpop.permute.xlu1 %4164 }
 0x23f   : > { %v4168_v50 = vsel %vm6582_vm7, %v4161_v40, %v4163_v1  ;;  %v4169_v33 = vsel %vm6583_vm12, %v4163_v1, %v4165_v5  ;;  %v1614_v61 = vpop.f32.mrf.mxu1  ;;  %v1741_v53 = vpop.f32.mrf.mxu0 }
 0x240   : > { %v4180_v28 = vsel %vm328_vm4, %v4168_v50, 0  ;;  %v1788_v57 = vadd.f32 %v1741_v53, %v1617_v46  ;;  %4723 = vmatmul.mubr.msk.bf16.vlgmr.msra.gmra.mxu0 %vm409_vm2, %v4716_v45  ;;  %4724 = vmatprep.subr.msk.bf16.mxu1 %vm328_vm4, %v4169_v33  ;;  %vm4315_vm4 = vcmask 15368  }
 0x241   : > { %4241 = vmatpush1.bf16.msra.mxu1 %v4180_v28  ;;  %v1743_v30 = vpop.f32.mrf.mxu0  ;;  %v1780_v63 = vpop.f32.mrf.mxu1 }
 0x242   : > { %v1789_v3 = vadd.f32 %v1780_v63, %v1618_v29 }
 0x243   : > { %v1744_v42 = vpop.f32.mrf.mxu0  ;;  %v1782_v56 = vpop.f32.mrf.mxu1 }
 0x244   : > { %v1790_v52 = vadd.f32 %v1782_v56, %v1619_v41  ;;  %4725 = vmatmul.mubr.msk.bf16.vlgmr.msra.gmra.mxu1 %vm409_vm2, %v4716_v45  ;;  %vm6584_vm2 = vcmask 7168  }
 0x245   : > { %v1784_v16 = vpop.f32.mrf.mxu1  ;;  %v1886_v6 = vpop.f32.mrf.mxu0 }
 0x246   : > { %v1934_v4 = vadd.f32 %v1886_v6, %v1787_v7 }
 0x247   : > { %v1785_v13 = vpop.f32.mrf.mxu1  ;;  %v1888_v11 = vpop.f32.mrf.mxu0 }
 0x248   : > { %v1935_v19 = vadd.f32 %v1888_v11, %v1788_v57 }
 0x249   : > { %v1890_v32 = vpop.f32.mrf.mxu0  ;;  %v1927_v17 = vpop.f32.mrf.mxu1 }
 0x24a   : > { %v1936_v14 = vadd.f32 %v1927_v17, %v1789_v3 }
 0x24b   : > { %v1891_v49 = vpop.f32.mrf.mxu0  ;;  %v1929_v23 = vpop.f32.mrf.mxu1 }
 0x24c   : > { %v1937_v58 = vadd.f32 %v1929_v23, %v1790_v52 }
 0x24d   : > { %v1931_v20 = vpop.f32.mrf.mxu1  ;;  %v2033_v9 = vpop.f32.mrf.mxu0 }
 0x24e   : > { %v2081_v25 = vadd.f32 %v2033_v9, %v1934_v4 }
 0x24f   : > { %v1932_v54 = vpop.f32.mrf.mxu1  ;;  %v2035_v21 = vpop.f32.mrf.mxu0 }
 0x250   : > { %v2082_v59 = vadd.f32 %v2035_v21, %v1935_v19 }
 0x251   : > { %v2037_v8 = vpop.f32.mrf.mxu0  ;;  %v2074_v60 = vpop.f32.mrf.mxu1 }
 0x252   : > { %v2083_v15 = vadd.f32 %v2074_v60, %v1936_v14 }
 0x253   : > { %v2038_v2 = vpop.f32.mrf.mxu0  ;;  %v2076_v27 = vpop.f32.mrf.mxu1 }
 0x254   : > { %v2084_v10 = vadd.f32 %v2076_v27, %v1937_v58 }
 0x255   : > { %v2078_v44 = vpop.f32.mrf.mxu1  ;;  %v2180_v22 = vpop.f32.mrf.mxu0 }
 0x256   : > { %v2228_v37 = vadd.f32 %v2180_v22, %v2081_v25 }
 0x257   : > { %v2079_v0 = vpop.f32.mrf.mxu1  ;;  %v2182_v12 = vpop.f32.mrf.mxu0 }
 0x258   : > { %v2229_v55 = vadd.f32 %v2182_v12, %v2082_v59 }
 0x259   : > { %v2184_v26 = vpop.f32.mrf.mxu0  ;;  %v2221_v39 = vpop.f32.mrf.mxu1 }
 0x25a   : > { %v2230_v24 = vadd.f32 %v2221_v39, %v2083_v15 }
 0x25b   : > { %v2185_v38 = vpop.f32.mrf.mxu0  ;;  %v2223_v46 = vpop.f32.mrf.mxu1 }
 0x25c   : > { %v2231_v35 = vadd.f32 %v2223_v46, %v2084_v10 }
 0x25d   : > { %v2225_v34 = vpop.f32.mrf.mxu1  ;;  %v2327_v29 = vpop.f32.mrf.mxu0 }
 0x25e   : > { %v2375_v47 = vadd.f32 %v2327_v29, %v2228_v37 }
 0x25f   : > { %v2226_v40 = vpop.f32.mrf.mxu1  ;;  %v2329_v51 = vpop.f32.mrf.mxu0 }
 0x260   : > { %v2376_v43 = vadd.f32 %v2329_v51, %v2229_v55 }
 0x261   : > { %v2331_v62 = vpop.f32.mrf.mxu0  ;;  %v2368_v48 = vpop.f32.mrf.mxu1 }
 0x262   : > { %v2377_v18 = vadd.f32 %v2368_v48, %v2230_v24 }
 0x263   : > { %v2332_v41 = vpop.f32.mrf.mxu0  ;;  %v2370_v31 = vpop.f32.mrf.mxu1 }
 0x264   : > { %v2378_v36 = vadd.f32 %v2370_v31, %v2231_v35 }
 0x265   : > { %v2372_v45 = vpop.f32.mrf.mxu1  ;;  %v2442_v7 = vpop.f32.mrf.mxu0 }
 0x266   : > { %v2490_v1 = vadd.f32 %v2442_v7, %v2375_v47 }
 0x267   : > { %v2373_v5 = vpop.f32.mrf.mxu1  ;;  %v2444_v50 = vpop.f32.mrf.mxu0 }
 0x268   : > { %v2491_v33 = vadd.f32 %v2444_v50, %v2376_v43 }
 0x269   : > { %v2446_v61 = vpop.f32.mrf.mxu0  ;;  %v2483_v53 = vpop.f32.mrf.mxu1 }
 0x26a   : > { %v2492_v28 = vadd.f32 %v2483_v53, %v2377_v18 }
 0x26b   : > { %v2447_v57 = vpop.f32.mrf.mxu0  ;;  %v2485_v30 = vpop.f32.mrf.mxu1 }
 0x26c   : > { %v2493_v63 = vadd.f32 %v2485_v30, %v2378_v36 }
 0x26d   : > { %v2487_v3 = vpop.f32.mrf.mxu1  ;;  %v2590_v42 = vpop.f32.mrf.mxu0 }
 0x26e   : > { %v2638_v56 = vadd.f32 %v2590_v42, %v2490_v1 }
 0x26f   : > { %v2488_v52 = vpop.f32.mrf.mxu1  ;;  %v2592_v16 = vpop.f32.mrf.mxu0 }
 0x270   : > { %v2639_v6 = vadd.f32 %v2592_v16, %v2491_v33 }
 0x271   : > { %v2594_v4 = vpop.f32.mrf.mxu0  ;;  %v2631_v13 = vpop.f32.mrf.mxu1 }
 0x272   : > { %v2640_v11 = vadd.f32 %v2631_v13, %v2492_v28 }
 0x273   : > { %v2595_v19 = vpop.f32.mrf.mxu0  ;;  %v2633_v32 = vpop.f32.mrf.mxu1 }
 0x274   : > { %v2641_v17 = vadd.f32 %v2633_v32, %v2493_v63 }
 0x275   : > { %v2635_v14 = vpop.f32.mrf.mxu1  ;;  %v2735_v49 = vpop.f32.mrf.mxu0 }
 0x276   : > { %v2783_v23 = vadd.f32 %v2735_v49, %v2638_v56 }
 0x277   : > { %v2636_v58 = vpop.f32.mrf.mxu1  ;;  %v2737_v20 = vpop.f32.mrf.mxu0 }
 0x278   : > { %v2784_v9 = vadd.f32 %v2737_v20, %v2639_v6 }
 0x279   : > { %v2776_v25 = vpop.f32.mrf.mxu1  ;;  %v2739_v54 = vpop.f32.mrf.mxu0 }
 0x27a   : > { %v2785_v21 = vadd.f32 %v2776_v25, %v2640_v11 }
 0x27b   : > { %v2778_v59 = vpop.f32.mrf.mxu1  ;;  %v2740_v8 = vpop.f32.mrf.mxu0 }
 0x27c   : > { %v2786_v60 = vadd.f32 %v2778_v59, %v2641_v17 }
 0x27d   : > { %v2780_v15 = vpop.f32.mrf.mxu1 }
 0x27f   : > { %v2781_v2 = vpop.f32.mrf.mxu1 }
 0x298   : > { %v2880_v27 = vpop.f32.mrf.mxu0 }
 0x299   : > { %v2928_v10 = vadd.f32 %v2880_v27, %v2783_v23 }
 0x29a   : > { %v2882_v44 = vpop.f32.mrf.mxu0 }
 0x29b   : > { %v2929_v22 = vadd.f32 %v2882_v44, %v2784_v9 }
 0x29c   : > { %v2921_v37 = vpop.f32.mrf.mxu1  ;;  %v2884_v0 = vpop.f32.mrf.mxu0 }
 0x29d   : > { %v2930_v12 = vadd.f32 %v2921_v37, %v2785_v21 }
 0x29e   : > { %v2923_v55 = vpop.f32.mrf.mxu1  ;;  %v2885_v26 = vpop.f32.mrf.mxu0 }
 0x29f   : > { %v2931_v39 = vadd.f32 %v2923_v55, %v2786_v60 }
 0x2a0   : > { %v2925_v24 = vpop.f32.mrf.mxu1 }
 0x2a2   : > { %v2926_v38 = vpop.f32.mrf.mxu1 }
 0x2a8   : > { %v3025_v46 = vpop.f32.mrf.mxu0 }
 0x2a9   : > { %v3073_v35 = vadd.f32 %v3025_v46, %v2928_v10 }
 0x2aa   : > { %v3027_v34 = vpop.f32.mrf.mxu0 }
 0x2ab   : > { %v3074_v29 = vadd.f32 %v3027_v34, %v2929_v22 }
 0x2ac   : > { %v3029_v47 = vpop.f32.mrf.mxu0  ;;  %v3066_v40 = vpop.f32.mrf.mxu1 }
 0x2ad   : > { %v3075_v51 = vadd.f32 %v3066_v40, %v2930_v12 }
 0x2ae   : > { %v3030_v43 = vpop.f32.mrf.mxu0  ;;  %v3068_v62 = vpop.f32.mrf.mxu1 }
 0x2af   : > { %v3076_v48 = vadd.f32 %v3068_v62, %v2931_v39 }
 0x2b0   : > { %v3070_v18 = vpop.f32.mrf.mxu1  ;;  %v3158_v41 = vpop.f32.mrf.mxu0 }
 0x2b1   : > { %v3206_v31 = vadd.f32 %v3158_v41, %v3073_v35 }
 0x2b2   : > { %v3071_v36 = vpop.f32.mrf.mxu1  ;;  %v3160_v45 = vpop.f32.mrf.mxu0 }
 0x2b3   : > { %v3207_v7 = vadd.f32 %v3160_v45, %v3074_v29 }
 0x2b4   : > { %v3199_v1 = vpop.f32.mrf.mxu1  ;;  %v3162_v5 = vpop.f32.mrf.mxu0 }
 0x2b5   : > { %v3208_v50 = vadd.f32 %v3199_v1, %v3075_v51 }
 0x2b6   : > { %v3201_v33 = vpop.f32.mrf.mxu1  ;;  %v3163_v61 = vpop.f32.mrf.mxu0 }
 0x2b7   : > { %v3209_v53 = vadd.f32 %v3201_v33, %v3076_v48 }
 0x2b8   : > { %v3203_v28 = vpop.f32.mrf.mxu1 }
 0x2ba   : > { %v3204_v57 = vpop.f32.mrf.mxu1 }
 0x2bc   : > { %v3291_v30 = vpop.f32.mrf.mxu0 }
 0x2bd   : > { %v3339_v51 = vadd.f32 %v3291_v30, %v3206_v31 }
 0x2be   : > { %v3293_v63 = vpop.f32.mrf.mxu0 }
 0x2bf   : > { %v3340_v62 = vadd.f32 %v3293_v63, %v3207_v7 }
 0x2c0   : > { %v3295_v3 = vpop.f32.mrf.mxu0  ;;  %v3332_v42 = vpop.f32.mrf.mxu1 }
 0x2c1   : > { %v3341_v41 = vadd.f32 %v3332_v42, %v3208_v50 }
 0x2c2   : > { %v3296_v56 = vpop.f32.mrf.mxu0  ;;  %v3334_v52 = vpop.f32.mrf.mxu1 }
 0x2c3   : > { %v3342_v1 = vadd.f32 %v3334_v52, %v3209_v53 }
 0x2c4   : > { %v3336_v16 = vpop.f32.mrf.mxu1  ;;  %v3424_v6 = vpop.f32.mrf.mxu0 }
 0x2c5   : > { %v3472_v48 = vadd.f32 %v3424_v6, %v3339_v51 }
 0x2c6   : > { %v3337_v4 = vpop.f32.mrf.mxu1  ;;  %v3426_v13 = vpop.f32.mrf.mxu0 }
 0x2c7   : > { %v3473_v36 = vadd.f32 %v3426_v13, %v3340_v62 }
 0x2c8   : > { %v3465_v11 = vpop.f32.mrf.mxu1  ;;  %v3428_v19 = vpop.f32.mrf.mxu0 }
 0x2c9   : > { %v3474_v33 = vadd.f32 %v3465_v11, %v3341_v41 }
 0x2ca   : > { %v3467_v32 = vpop.f32.mrf.mxu1  ;;  %v3429_v17 = vpop.f32.mrf.mxu0 }
 0x2cb   : > { %v3475_v57 = vadd.f32 %v3467_v32, %v3342_v1 }
 0x2cc   : > { %v3469_v14 = vpop.f32.mrf.mxu1 }
 0x2ce   : > { %v3470_v49 = vpop.f32.mrf.mxu1 }
 0x2d0   : > { %v3557_v23 = vpop.f32.mrf.mxu0 }
 0x2d1   : > { %v3605_v45 = vadd.f32 %v3557_v23, %v3472_v48 }
 0x2d2   : > { %v3559_v58 = vpop.f32.mrf.mxu0 }
 0x2d3   : > { %v3606_v61 = vadd.f32 %v3559_v58, %v3473_v36 }
 0x2d4   : > { %v3561_v20 = vpop.f32.mrf.mxu0  ;;  %v3598_v9 = vpop.f32.mrf.mxu1 }
 0x2d5   : > { %v3607_v56 = vadd.f32 %v3598_v9, %v3474_v33 }
 0x2d6   : > { %v3562_v25 = vpop.f32.mrf.mxu0  ;;  %v3600_v54 = vpop.f32.mrf.mxu1 }
 0x2d7   : > { %v3608_v19 = vadd.f32 %v3600_v54, %v3475_v57 }
 0x2d8   : > { %v3602_v21 = vpop.f32.mrf.mxu1  ;;  %v3687_v59 = vpop.f32.mrf.mxu0 }
 0x2d9   : > { %v3735_v28 = vadd.f32 %v3687_v59, %v3605_v45 }
 0x2da   : > { %v3603_v8 = vpop.f32.mrf.mxu1  ;;  %v3689_v60 = vpop.f32.mrf.mxu0 }
 0x2db   : > { %v3736_v16 = vadd.f32 %v3689_v60, %v3606_v61 }
 0x2dc   : > { %v3728_v15 = vpop.f32.mrf.mxu1  ;;  %v3691_v2 = vpop.f32.mrf.mxu0 }
 0x2dd   : > { %v3737_v30 = vadd.f32 %v3728_v15, %v3607_v56 }
 0x2de   : > { %v3730_v27 = vpop.f32.mrf.mxu1  ;;  %v3692_v10 = vpop.f32.mrf.mxu0 }
 0x2df   : > { %v3738_v6 = vadd.f32 %v3730_v27, %v3608_v19 }
 0x2e0   : > { %v3732_v44 = vpop.f32.mrf.mxu1 }
 0x2e2   : > { %v3733_v22 = vpop.f32.mrf.mxu1 }
 0x2e4   : > { %v3820_v37 = vpop.f32.mrf.mxu0 }
 0x2e5   : > { %v3868_v4 = vadd.f32 %v3820_v37, %v3735_v28 }
 0x2e6   : > { %v3822_v0 = vpop.f32.mrf.mxu0 }
 0x2e7   : > { %v3869_v7 = vadd.f32 %v3822_v0, %v3736_v16 }
 0x2e8   : > { %v3824_v12 = vpop.f32.mrf.mxu0  ;;  %v3861_v55 = vpop.f32.mrf.mxu1 }
 0x2e9   : > { %v3870_v13 = vadd.f32 %v3861_v55, %v3737_v30 }
 0x2ea   : > { %v3825_v26 = vpop.f32.mrf.mxu0  ;;  %v3863_v39 = vpop.f32.mrf.mxu1 }
 0x2eb   : > { %v3871_v11 = vadd.f32 %v3863_v39, %v3738_v6 }
 0x2ec   : > { %v3865_v24 = vpop.f32.mrf.mxu1  ;;  %v3953_v38 = vpop.f32.mrf.mxu0 }
 0x2ed   : > { %v4001_v63 = vadd.f32 %v3953_v38, %v3868_v4 }
 0x2ee   : > { %v3866_v46 = vpop.f32.mrf.mxu1  ;;  %v3955_v35 = vpop.f32.mrf.mxu0 }
 0x2ef   : > { %v4002_v53 = vadd.f32 %v3955_v35, %v3869_v7 }
 0x2f0   : > { %v3994_v34 = vpop.f32.mrf.mxu1  ;;  %v3957_v29 = vpop.f32.mrf.mxu0 }
 0x2f1   : > { %v4003_v32 = vadd.f32 %v3994_v34, %v3870_v13  ;;  %v4271_v34 = vld [vmem:[%s6391_s2] sm:$0xff] }
 0x2f2   : > { %v3996_v47 = vpop.f32.mrf.mxu1  ;;  %v3958_v40 = vpop.f32.mrf.mxu0 }
 0x2f3   : > { %v4004_v20 = vadd.f32 %v3996_v47, %v3871_v11 }
 0x2f4   : > { %v3998_v43 = vpop.f32.mrf.mxu1 }
 0x2f6   : > { %v3999_v18 = vpop.f32.mrf.mxu1 }
 0x2f8   : > { %v4086_v5 = vpop.f32.mrf.mxu0 }
 0x2f9   : > { %v4134_v52 = vadd.f32 %v4086_v5, %v4001_v63 }
 0x2fa   : > { %v4088_v3 = vpop.f32.mrf.mxu0 }
 0x2fb   : > { %v4135_v23 = vadd.f32 %v4088_v3, %v4002_v53 }
 0x2fc   : > { %v4090_v17 = vpop.f32.mrf.mxu0  ;;  %v4127_v31 = vpop.f32.mrf.mxu1 }
 0x2fd   : > { %v4136_v54 = vadd.f32 %v4127_v31, %v4003_v32 }
 0x2fe   : > { %v4091_v50 = vpop.f32.mrf.mxu0  ;;  %v4129_v42 = vpop.f32.mrf.mxu1 }
 0x2ff   : > { %v4137_v59 = vadd.f32 %v4129_v42, %v4004_v20 }
 0x300   : > { %v4131_v14 = vpop.f32.mrf.mxu1  ;;  %v4219_v49 = vpop.f32.mrf.mxu0 }
 0x301   : > { %v4267_v58 = vadd.f32 %v4219_v49, %v4134_v52 }
 0x302   : > { %v4132_v9 = vpop.f32.mrf.mxu1  ;;  %v4221_v25 = vpop.f32.mrf.mxu0 }
 0x303   : > { %v4268_v21 = vadd.f32 %v4221_v25, %v4135_v23  ;;  %v4306_v15 = vmul.f32 %v4267_v58, %v4267_v58 }
 0x304   : > { %v4223_v8 = vpop.f32.mrf.mxu0  ;;  %v4260_v60 = vpop.f32.mrf.mxu1 }
 0x305   : > { %v4299_v2 = vadd.f32 %v4268_v21, %v4267_v58  ;;  %v4307_v27 = vmul.f32 %v4268_v21, %v4268_v21  ;;  %v4269_v10 = vadd.f32 %v4260_v60, %v4136_v54 }
 0x306   : > { %v4224_v44 = vpop.f32.mrf.mxu0  ;;  %v4262_v22 = vpop.f32.mrf.mxu1 }
 0x307   : > { %v4310_v37 = vadd.f32 %v4307_v27, %v4306_v15  ;;  %v4300_v0 = vadd.f32 %v4299_v2, %v4269_v10  ;;  %v4308_v12 = vmul.f32 %v4269_v10, %v4269_v10  ;;  %v4270_v55 = vadd.f32 %v4262_v22, %v4137_v59 }
 0x308   : > { %v4264_v26 = vpop.f32.mrf.mxu1 }
 0x309   : > { %v4309_v39 = vmul.f32 %v4270_v55, %v4270_v55  ;;  %v4301_v24 = vadd.f32 %v4300_v0, %v4270_v55  ;;  %v4311_v38 = vadd.f32 %v4310_v37, %v4308_v12 }
 0x30a   : > { %v4265_v46 = vpop.f32.mrf.mxu1 }
 0x30b   : > { %4302 = vadd.xlane.f32.xlu0 %v4301_v24  ;;  %v4312_v35 = vadd.f32 %v4311_v38, %v4309_v39 }
 0x30d   : > { %4313 = vadd.xlane.f32.xlu1 %v4312_v35 }
 0x321   : > { %4274 = vperm.xlu0 %4776, %v4271_v34  }
 0x394   : > { %v4303_v29 = vpop.xlane.xlu0 %4302 }
 0x395   : > { %4305 = vst.msk [vmem:[%s280_s23] sm:$0xff] %vm6584_vm2, %v4303_v29 }
 0x396   : > { %v4314_v47 = vpop.xlane.xlu1 %4313 }
 0x397   : > { %4316 = vst.msk [vmem:[%s280_s23] sm:$0xff] %vm4315_vm4, %v4314_v47 }
 0x39c   : > { %v4275_v40 = vpop.permute.xlu0 %4274 }
 0x39d   : > { %v4277_v51 = vadd.f32 %v4275_v40, %v4267_v58  ;;  %v4278_v43 = vadd.f32 %v4275_v40, %v4268_v21  ;;  %v4279_v62 = vadd.f32 %v4275_v40, %v4269_v10  ;;  %v4280_v48 = vadd.f32 %v4275_v40, %v4270_v55 }
 0x39f   : > { %v4731_v18 = vpack.c.bf16 %v4278_v43, %v4277_v51  ;;  %v4732_v41 = vpack.c.bf16 %v4280_v48, %v4279_v62 }
 0x3a1   : > { %4297 = vst [vmem:[%s272_s10] sm:$0xff] %v4731_v18  ;;  %4298 = vst [vmem:[%s272_s10 + $0x8] sm:$0xff] %v4732_v41 }
 0x3a2 PF: > { %s16_s20 = sadd.s32 1, %s4813_s20   ;;  %s6585_s18 = smov %s4809_s19 }
 0x3a3   : > { %p13_p5 = scmp.ge.s32.totalorder %s16_s20, 4   ;;  %s6586_s19 = smov %s6588_s21 }
 0x3a5   :  { %15 = sbr.rel (!%p13_p5) target bundleno = 2 (0x2), region = 105 }

</bundles_post_ra>
